<compile_context>
chip_gen: v7x
topology: tpu7x:2x2x1
jax: 0.10.0
libtpu: 0.0.40
codegen_flags: <defaults>
</compile_context>

<pallas_src>
import functools

import jax
import jax.numpy as jnp
from jax.experimental import pallas as pl
from jax.experimental.pallas import tpu as pltpu

_VMEM_LIMIT = 32 * 1024 * 1024  # safe on v5e (128M), v6e (128M), v7x (64M)


def _ru(x, m):
    return (x + m - 1) // m * m


# --------------------------------------------------------------------------
# Pallas kernels
# --------------------------------------------------------------------------

def _mm_kernel(x_ref, w_ref, b_ref, o_ref, acc_ref, *, epilogue):
    """Tiled matmul, f32 accumulator, fused bias + (relu | softmax) epilogue."""
    @pl.when(pl.program_id(2) == 0)
    def _():
        acc_ref[...] = jnp.zeros_like(acc_ref)

    acc_ref[...] += jnp.dot(x_ref[...], w_ref[...],
                            preferred_element_type=jnp.float32)

    @pl.when(pl.program_id(2) == pl.num_programs(2) - 1)
    def _():
        r = acc_ref[...] + b_ref[...]
        if epilogue == "relu":
            r = jnp.maximum(r, 0.0)
        elif epilogue == "softmax":
            m = jnp.max(r, axis=-1, keepdims=True)
            e = jnp.exp(r - m)
            r = e / jnp.sum(e, axis=-1, keepdims=True)
        o_ref[...] = r.astype(o_ref.dtype)


def matmul_bias_act(x, w, b, *, epilogue="none", out_dtype=jnp.bfloat16,
                    tm=2048, tn=128, tk=512):
    """y = epilogue(x @ w + b) on the MXU.  x/w expected bf16, b f32."""
    M, K = x.shape
    K2, N = w.shape
    assert K == K2

    tm = min(tm, M)
    tn = N if N <= 256 else tn            # small Cout / classes: full-N block
    if epilogue == "softmax":
        assert tn == N, "softmax epilogue needs a single N block"

    if K <= 1024:                          # convs / small FCs: single K block
        tk, Kp = K, K
    else:                                  # large flatten dim: pad K minimally
        Kp = _ru(K, tk)
    xk = x if Kp == K else jnp.pad(x, ((0, 0), (0, Kp - K)))
    wk = w if Kp == K else jnp.pad(w, ((0, Kp - K), (0, 0)))
    b2 = b.astype(jnp.float32).reshape(1, N)

    grid = (pl.cdiv(M, tm), pl.cdiv(N, tn), Kp // tk)
    return pl.pallas_call(
        functools.partial(_mm_kernel, epilogue=epilogue),
        out_shape=jax.ShapeDtypeStruct((M, N), out_dtype),
        grid_spec=pltpu.PrefetchScalarGridSpec(
            num_scalar_prefetch=0,
            grid=grid,
            in_specs=[
                pl.BlockSpec((tm, tk), lambda i, j, k: (i, k)),
                pl.BlockSpec((tk, tn), lambda i, j, k: (k, j)),
                pl.BlockSpec((1, tn), lambda i, j, k: (0, j)),
            ],
            out_specs=pl.BlockSpec((tm, tn), lambda i, j, k: (i, j)),
            scratch_shapes=[pltpu.VMEM((tm, tn), jnp.float32)],
        ),
        compiler_params=pltpu.CompilerParams(
            dimension_semantics=("parallel", "parallel", "arbitrary"),
            vmem_limit_bytes=_VMEM_LIMIT),
    )(xk, wk, b2)


def _affine_kernel(x_ref, s_ref, t_ref, o_ref):
    # Per-channel affine (BatchNorm inference form) on lane-dense (rows, W*C)
    # slabs; also performs the f32 -> bf16 activation cast.
    o_ref[...] = (x_ref[...].astype(jnp.float32) * s_ref[...]
                  + t_ref[...]).astype(o_ref.dtype)


def affine_rows(x2d, scale_row, shift_row, *, out_dtype, tr=1024):
    R, L = x2d.shape
    tr = min(tr, R)
    return pl.pallas_call(
        _affine_kernel,
        out_shape=jax.ShapeDtypeStruct((R, L), out_dtype),
        grid_spec=pltpu.PrefetchScalarGridSpec(
            num_scalar_prefetch=0,
            grid=(pl.cdiv(R, tr),),
            in_specs=[
                pl.BlockSpec((tr, L), lambda i: (i, 0)),
                pl.BlockSpec((1, L), lambda i: (0, 0)),
                pl.BlockSpec((1, L), lambda i: (0, 0)),
            ],
            out_specs=pl.BlockSpec((tr, L), lambda i: (i, 0)),
        ),
        compiler_params=pltpu.CompilerParams(
            dimension_semantics=("parallel",),
            vmem_limit_bytes=_VMEM_LIMIT),
    )(x2d, scale_row, shift_row)


def _pool_relu_kernel(x_ref, o_ref, *, C):
    # 2x2 max-pool over a (rows, 2, Wo, 2*C) block, fused with ReLU.
    x = x_ref[...]                             # (tr, 2, Wo, 2C)
    v = jnp.maximum(x[:, 0], x[:, 1])          # vertical max  (tr, Wo, 2C)
    m = jnp.maximum(v[:, :, :C], v[:, :, C:])  # horizontal max (tr, Wo, C)
    o_ref[...] = jnp.maximum(m, 0).astype(o_ref.dtype)


def maxpool2x2_relu(y_nhwc, *, tr=256):
    N, H, W, C = y_nhwc.shape
    Ho, Wo = H // 2, W // 2
    y = y_nhwc[:, :2 * Ho, :2 * Wo, :]          # drop odd row/col (floor pool)
    # Free (metadata-only) reshape of contiguous NHWC: (N*Ho, 2, Wo, 2*C).
    x4 = y.reshape(N * Ho, 2, Wo, 2 * C)
    R = N * Ho
    tr = min(tr, R)
    out = pl.pallas_call(
        functools.partial(_pool_relu_kernel, C=C),
        out_shape=jax.ShapeDtypeStruct((R, Wo, C), y_nhwc.dtype),
        grid_spec=pltpu.PrefetchScalarGridSpec(
            num_scalar_prefetch=0,
            grid=(pl.cdiv(R, tr),),
            in_specs=[pl.BlockSpec((tr, 2, Wo, 2 * C),
                                   lambda i: (i, 0, 0, 0))],
            out_specs=pl.BlockSpec((tr, Wo, C), lambda i: (i, 0, 0)),
        ),
        compiler_params=pltpu.CompilerParams(
            dimension_semantics=("parallel",),
            vmem_limit_bytes=_VMEM_LIMIT),
    )(x4)
    return out.reshape(N, Ho, Wo, C)


# --------------------------------------------------------------------------
# Glue (im2col, parameter setup / folding, forward orchestration)
# --------------------------------------------------------------------------

def im2col(x_nhwc, k=3, pad=2):
    """Extract kxk patches (feature order: kh, kw, cin) after zero padding."""
    N, H, W, C = x_nhwc.shape
    xp = jnp.pad(x_nhwc, ((0, 0), (pad, pad), (pad, pad), (0, 0)))
    Ho = H + 2 * pad - k + 1
    Wo = W + 2 * pad - k + 1
    cols = [xp[:, dh:dh + Ho, dw:dw + Wo, :]
            for dh in range(k) for dw in range(k)]
    patches = jnp.concatenate(cols, axis=-1)    # (N, Ho, Wo, k*k*C)
    return patches.reshape(N * Ho * Wo, k * k * C), (N, Ho, Wo)


def bn_scale_shift(gamma, beta, mean, var, eps=1e-5):
    scale = gamma * jax.lax.rsqrt(var + eps)
    shift = beta - mean * scale
    return scale, shift


def pooled_dims(h, w):
    h1, w1 = (h + 2) // 2, (w + 2) // 2
    h2, w2 = (h1 + 2) // 2, (w1 + 2) // 2
    return h2, w2


def init_params(key, flat_dim, nn_hidden=128):
    ks = jax.random.split(key, 8)
    p = {}
    # BatchNorm2d(3) / BatchNorm2d(32): PyTorch default init, inference stats.
    p["bn1_gamma"] = jnp.ones((3,), jnp.float32)
    p["bn1_beta"] = jnp.zeros((3,), jnp.float32)
    p["bn1_mean"] = jnp.zeros((3,), jnp.float32)
    p["bn1_var"] = jnp.ones((3,), jnp.float32)
    p["bn3_gamma"] = jnp.ones((32,), jnp.float32)
    p["bn3_beta"] = jnp.zeros((32,), jnp.float32)
    p["bn3_mean"] = jnp.zeros((32,), jnp.float32)
    p["bn3_var"] = jnp.ones((32,), jnp.float32)
    # Conv weights stored as (kh, kw, cin, cout) to match im2col feature order.
    p["conv1_w"] = 0.05 * jax.random.normal(ks[0], (3, 3, 3, 16), jnp.float32)
    p["conv1_b"] = 0.05 * jax.random.normal(ks[1], (16,), jnp.float32)
    p["conv2_w"] = 0.05 * jax.random.normal(ks[2], (3, 3, 16, 32), jnp.float32)
    p["conv2_b"] = 0.05 * jax.random.normal(ks[3], (32,), jnp.float32)
    # Linear weights stored as (in, out).
    p["fc1_w"] = 0.02 * jax.random.normal(ks[4], (flat_dim, nn_hidden), jnp.float32)
    p["fc1_b"] = 0.02 * jax.random.normal(ks[5], (nn_hidden,), jnp.float32)
    p["fc2_w"] = 0.02 * jax.random.normal(ks[6], (nn_hidden, 4), jnp.float32)
    p["fc2_b"] = 0.02 * jax.random.normal(ks[7], (4,), jnp.float32)
    return p


def prepare_params(p, hb, wb):
    """One-time host-side prep: fold bn3 into fc1 (exact), cast weights to bf16."""
    s1, t1 = bn_scale_shift(p["bn1_gamma"], p["bn1_beta"],
                            p["bn1_mean"], p["bn1_var"])
    s3, t3 = bn_scale_shift(p["bn3_gamma"], p["bn3_beta"],
                            p["bn3_mean"], p["bn3_var"])
    # Flatten is NCHW (channel-major), so flat index j has channel j // (hb*wb).
    scale_flat = jnp.repeat(s3, hb * wb)
    shift_flat = jnp.repeat(t3, hb * wb)
    fc1_w = p["fc1_w"] * scale_flat[:, None]
    fc1_b = p["fc1_b"] + shift_flat @ p["fc1_w"]
    return {
        "bn1_scale": s1.astype(jnp.float32),
        "bn1_shift": t1.astype(jnp.float32),
        "conv1_w": p["conv1_w"].reshape(-1, 16).astype(jnp.bfloat16),
        "conv1_b": p["conv1_b"].astype(jnp.float32),
        "conv2_w": p["conv2_w"].reshape(-1, 32).astype(jnp.bfloat16),
        "conv2_b": p["conv2_b"].astype(jnp.float32),
        "fc1_w": fc1_w.astype(jnp.bfloat16),
        "fc1_b": fc1_b.astype(jnp.float32),
        "fc2_w": p["fc2_w"].astype(jnp.bfloat16),
        "fc2_b": p["fc2_b"].astype(jnp.float32),
    }


@jax.jit
def convnn_forward(x_nchw, params):
    # NCHW (PyTorch) -> NHWC for kernel-side compute.
    x = jnp.transpose(x_nchw, (0, 2, 3, 1)).astype(jnp.float32)
    N, H, W, C = x.shape

    # normalize1_layer (BatchNorm2d(3), inference): lane-dense (N*H, W*C)
    # affine kernel, output directly in bf16.
    srow = jnp.tile(params["bn1_scale"], W).reshape(1, W * C)
    trow = jnp.tile(params["bn1_shift"], W).reshape(1, W * C)
    xb = affine_rows(x.reshape(N * H, W * C), srow, trow,
                     out_dtype=jnp.bfloat16).reshape(N, H, W, C)

    # conv1_layer: Conv2d(3, 16, k=3, padding=2) -> im2col (bf16) + MXU matmul
    # (tk = full K = 27, tn = full Cout = 16: no K/N padding of the big slab).
    p1, (n1, h1, w1) = im2col(xb, k=3, pad=2)
    y = matmul_bias_act(p1, params["conv1_w"], params["conv1_b"],
                        out_dtype=jnp.bfloat16).reshape(n1, h1, w1, 16)

    # maxpo1_layer + activation (ReLU), fused.
    y = maxpool2x2_relu(y)

    # conv2_layer: Conv2d(16, 32, k=3, padding=2)  (tk = 144, tn = 32).
    p2, (n2, h2, w2) = im2col(y, k=3, pad=2)
    z = matmul_bias_act(p2, params["conv2_w"], params["conv2_b"],
                        out_dtype=jnp.bfloat16).reshape(n2, h2, w2, 32)

    # maxpo2_layer + activation (ReLU), fused.
    z = maxpool2x2_relu(z)

    # normalize3_layer (BatchNorm2d(32), inference): folded into fc1 weights.

    # flatten_layer: PyTorch flattens NCHW, so go back to NCHW ordering.
    nb, hb, wb, cb = z.shape
    flat = jnp.transpose(z, (0, 3, 1, 2)).reshape(nb, -1)

    # fc1_layer + activation (ReLU), fused into the matmul epilogue.
    h1_out = matmul_bias_act(flat, params["fc1_w"], params["fc1_b"],
                             epilogue="relu", out_dtype=jnp.bfloat16)

    # Droput1_layer: identity in inference mode.

    # fc2_layer + softmax(dim=1), fused into a single kernel (f32 epilogue).
    probs = matmul_bias_act(h1_out, params["fc2_w"], params["fc2_b"],
                            epilogue="softmax", out_dtype=jnp.float32)
    return probs


if __name__ == "__main__":
    key = jax.random.PRNGKey(0)
    k_x, k_p = jax.random.split(key)

    # Small shapes consistent with the module: NCHW input, 3 channels.
    # 16x16 input: conv1(pad2) -> 18, pool -> 9, conv2(pad2) -> 11, pool -> 5,
    # so flatten dim = 32 * 5 * 5 = 800 (stands in for 103968).
    H = W = 16
    x = jax.random.normal(k_x, (2, 3, H, W), jnp.float32)
    hb, wb = pooled_dims(H, W)
    params_raw = init_params(k_p, flat_dim=32 * hb * wb, nn_hidden=128)
    params = prepare_params(params_raw, hb, wb)

    out = convnn_forward(x, params)
    out = jax.block_until_ready(out)

    assert out.shape == (2, 4)
    assert bool(jnp.all(jnp.isfinite(out)))
    # softmax rows sum to 1
    assert bool(jnp.allclose(jnp.sum(out, axis=-1), 1.0, atol=1e-5))
    print("KERNEL_OK")
</pallas_src>

<mosaic_0001>
module attributes {stable_mosaic.version = 11 : i64} {
  func.func @_affine_kernel(%arg0: i32, %arg1: memref<32x48xf32, #tpu.memory_space<vmem>>, %arg2: memref<1x48xf32, #tpu.memory_space<vmem>>, %arg3: memref<1x48xf32, #tpu.memory_space<vmem>>, %arg4: memref<32x48xbf16, #tpu.memory_space<vmem>>) attributes {dimension_semantics = [#tpu.dimension_semantics<parallel>], iteration_bounds = array<i64: 1>, scalar_prefetch = 0 : i64, scratch_operands = 0 : i64, tpu.core_type = #tpu.core_type<tc>, window_params = [{transform_indices = @transform_0, window_bounds = array<i64: 32, 48>}, {pipeline_mode = #tpu.pipeline_mode<synchronous>, transform_indices = @transform_1, window_bounds = array<i64: 1, 48>}, {pipeline_mode = #tpu.pipeline_mode<synchronous>, transform_indices = @transform_2, window_bounds = array<i64: 1, 48>}, {transform_indices = @transform_3, window_bounds = array<i64: 32, 48>}]} {
    %c0 = arith.constant 0 : index
    %c0_0 = arith.constant 0 : index
    %0 = vector.load %arg1[%c0, %c0_0] : memref<32x48xf32, #tpu.memory_space<vmem>>, vector<32x48xf32>
    %c0_1 = arith.constant 0 : index
    %c0_2 = arith.constant 0 : index
    %1 = vector.load %arg2[%c0_1, %c0_2] : memref<1x48xf32, #tpu.memory_space<vmem>>, vector<1x48xf32>
    %2 = vector.broadcast %1 : vector<1x48xf32> to vector<32x48xf32>
    %3 = arith.mulf %0, %2 : vector<32x48xf32>
    %c0_3 = arith.constant 0 : index
    %c0_4 = arith.constant 0 : index
    %4 = vector.load %arg3[%c0_3, %c0_4] : memref<1x48xf32, #tpu.memory_space<vmem>>, vector<1x48xf32>
    %5 = vector.broadcast %4 : vector<1x48xf32> to vector<32x48xf32>
    %6 = arith.addf %3, %5 : vector<32x48xf32>
    %7 = arith.truncf %6 : vector<32x48xf32> to vector<32x48xbf16>
    %c0_5 = arith.constant 0 : index
    %c0_6 = arith.constant 0 : index
    %8 = vector.load %arg4[%c0_5, %c0_6] : memref<32x48xbf16, #tpu.memory_space<vmem>>, vector<32x48xbf16>
    tpu.vector_store %arg4[%c0_5, %c0_6], %7 {strides = array<i32>} : memref<32x48xbf16, #tpu.memory_space<vmem>>, vector<32x48xbf16>,
    return
  }
  func.func @transform_0(%arg0: i32) -> (i32, i32) {
    %c0_i32 = arith.constant 0 : i32
    %c0_i32_0 = arith.constant 0 : i32
    return %arg0, %c0_i32 : i32, i32
  }
  func.func @transform_1(%arg0: i32) -> (i32, i32) {
    %c0_i32 = arith.constant 0 : i32
    %c0_i32_0 = arith.constant 0 : i32
    %c0_i32_1 = arith.constant 0 : i32
    return %c0_i32, %c0_i32_0 : i32, i32
  }
  func.func @transform_2(%arg0: i32) -> (i32, i32) {
    %c0_i32 = arith.constant 0 : i32
    %c0_i32_0 = arith.constant 0 : i32
    %c0_i32_1 = arith.constant 0 : i32
    return %c0_i32, %c0_i32_0 : i32, i32
  }
  func.func @transform_3(%arg0: i32) -> (i32, i32) {
    %c0_i32 = arith.constant 0 : i32
    %c0_i32_0 = arith.constant 0 : i32
    return %arg0, %c0_i32 : i32, i32
  }
}

module attributes {stable_mosaic.version = 11 : i64} {
  func.func @_mm_kernel(%arg0: i32, %arg1: i32, %arg2: i32, %arg3: memref<648x27xbf16, #tpu.memory_space<vmem>>, %arg4: memref<27x16xbf16, #tpu.memory_space<vmem>>, %arg5: memref<1x16xf32, #tpu.memory_space<vmem>>, %arg6: memref<648x16xbf16, #tpu.memory_space<vmem>>, %arg7: memref<648x16xf32, #tpu.memory_space<vmem>>) attributes {dimension_semantics = [#tpu.dimension_semantics<parallel>, #tpu.dimension_semantics<parallel>, #tpu.dimension_semantics<arbitrary>], iteration_bounds = array<i64: 1, 1, 1>, scalar_prefetch = 0 : i64, scratch_operands = 1 : i64, tpu.core_type = #tpu.core_type<tc>, window_params = [{transform_indices = @transform_0, window_bounds = array<i64: 648, 27>}, {transform_indices = @transform_1, window_bounds = array<i64: 27, 16>}, {transform_indices = @transform_2, window_bounds = array<i64: 1, 16>}, {transform_indices = @transform_3, window_bounds = array<i64: 648, 16>}]} {
    %c0_i32 = arith.constant 0 : i32
    %0 = arith.cmpi eq, %arg2, %c0_i32 : i32
    %1 = arith.extui %0 : i1 to i32
    %c0_i32_0 = arith.constant 0 : i32
    %2 = arith.cmpi ne, %1, %c0_i32_0 : i32
    scf.if %2 {
      %cst_10 = arith.constant 0.000000e+00 : f32
      %12 = vector.broadcast %cst_10 : f32 to vector<648x16xf32>
      %c0_11 = arith.constant 0 : index
      %c0_12 = arith.constant 0 : index
      %13 = vector.load %arg7[%c0_11, %c0_12] : memref<648x16xf32, #tpu.memory_space<vmem>>, vector<648x16xf32>
      tpu.vector_store %arg7[%c0_11, %c0_12], %12 {strides = array<i32>} : memref<648x16xf32, #tpu.memory_space<vmem>>, vector<648x16xf32>,
    } else {
    }
    %c0 = arith.constant 0 : index
    %c0_1 = arith.constant 0 : index
    %3 = vector.load %arg7[%c0, %c0_1] : memref<648x16xf32, #tpu.memory_space<vmem>>, vector<648x16xf32>
    %c0_2 = arith.constant 0 : index
    %c0_3 = arith.constant 0 : index
    %4 = vector.load %arg3[%c0_2, %c0_3] : memref<648x27xbf16, #tpu.memory_space<vmem>>, vector<648x27xbf16>
    %c0_4 = arith.constant 0 : index
    %c0_5 = arith.constant 0 : index
    %5 = vector.load %arg4[%c0_4, %c0_5] : memref<27x16xbf16, #tpu.memory_space<vmem>>, vector<27x16xbf16>
    %cst = arith.constant dense<0.000000e+00> : vector<648x16xf32>
    %6 = tpu.matmul %4, %5, %cst {dimension_numbers = #tpu.dot_dimension_numbers<[1], [0], [0], [1], [0, 0, 1, 1], [], []>} : vector<648x27xbf16>, vector<27x16xbf16>, vector<648x16xf32> -> vector<648x16xf32>
    %7 = arith.addf %3, %6 : vector<648x16xf32>
    %c0_6 = arith.constant 0 : index
    %c0_7 = arith.constant 0 : index
    %8 = vector.load %arg7[%c0_6, %c0_7] : memref<648x16xf32, #tpu.memory_space<vmem>>, vector<648x16xf32>
    tpu.vector_store %arg7[%c0_6, %c0_7], %7 {strides = array<i32>} : memref<648x16xf32, #tpu.memory_space<vmem>>, vector<648x16xf32>,
    %c0_i32_8 = arith.constant 0 : i32
    %9 = arith.cmpi eq, %arg2, %c0_i32_8 : i32
    %10 = arith.extui %9 : i1 to i32
    %c0_i32_9 = arith.constant 0 : i32
    %11 = arith.cmpi ne, %10, %c0_i32_9 : i32
    scf.if %11 {
      %c0_10 = arith.constant 0 : index
      %c0_11 = arith.constant 0 : index
      %12 = vector.load %arg7[%c0_10, %c0_11] : memref<648x16xf32, #tpu.memory_space<vmem>>, vector<648x16xf32>
      %c0_12 = arith.constant 0 : index
      %c0_13 = arith.constant 0 : index
      %13 = vector.load %arg5[%c0_12, %c0_13] : memref<1x16xf32, #tpu.memory_space<vmem>>, vector<1x16xf32>
      %14 = vector.broadcast %13 : vector<1x16xf32> to vector<648x16xf32>
      %15 = arith.addf %12, %14 : vector<648x16xf32>
      %16 = arith.truncf %15 : vector<648x16xf32> to vector<648x16xbf16>
      %c0_14 = arith.constant 0 : index
      %c0_15 = arith.constant 0 : index
      %17 = vector.load %arg6[%c0_14, %c0_15] : memref<648x16xbf16, #tpu.memory_space<vmem>>, vector<648x16xbf16>
      tpu.vector_store %arg6[%c0_14, %c0_15], %16 {strides = array<i32>} : memref<648x16xbf16, #tpu.memory_space<vmem>>, vector<648x16xbf16>,
    } else {
    }
    return
  }
  func.func @transform_0(%arg0: i32, %arg1: i32, %arg2: i32) -> (i32, i32) {
    %c0_i32 = arith.constant 0 : i32
    return %arg0, %arg2 : i32, i32
  }
  func.func @transform_1(%arg0: i32, %arg1: i32, %arg2: i32) -> (i32, i32) {
    %c0_i32 = arith.constant 0 : i32
    return %arg2, %arg1 : i32, i32
  }
  func.func @transform_2(%arg0: i32, %arg1: i32, %arg2: i32) -> (i32, i32) {
    %c0_i32 = arith.constant 0 : i32
    %c0_i32_0 = arith.constant 0 : i32
    return %c0_i32, %arg1 : i32, i32
  }
  func.func @transform_3(%arg0: i32, %arg1: i32, %arg2: i32) -> (i32, i32) {
    %c0_i32 = arith.constant 0 : i32
    return %arg0, %arg1 : i32, i32
  }
}

module attributes {stable_mosaic.version = 11 : i64} {
  func.func @_pool_relu_kernel(%arg0: i32, %arg1: memref<18x2x9x32xbf16, #tpu.memory_space<vmem>>, %arg2: memref<18x9x16xbf16, #tpu.memory_space<vmem>>) attributes {dimension_semantics = [#tpu.dimension_semantics<parallel>], iteration_bounds = array<i64: 1>, scalar_prefetch = 0 : i64, scratch_operands = 0 : i64, tpu.core_type = #tpu.core_type<tc>, window_params = [{transform_indices = @transform_0, window_bounds = array<i64: 18, 2, 9, 32>}, {transform_indices = @transform_1, window_bounds = array<i64: 18, 9, 16>}]} {
    %c0 = arith.constant 0 : index
    %c0_0 = arith.constant 0 : index
    %c0_1 = arith.constant 0 : index
    %c0_2 = arith.constant 0 : index
    %0 = vector.load %arg1[%c0, %c0_0, %c0_1, %c0_2] : memref<18x2x9x32xbf16, #tpu.memory_space<vmem>>, vector<18x2x9x32xbf16>
    %1 = vector.extract_strided_slice %0 {offsets = [0, 0, 0, 0], sizes = [18, 1, 9, 32], strides = [1, 1, 1, 1]} : vector<18x2x9x32xbf16> to vector<18x1x9x32xbf16>
    %2 = vector.shape_cast %1 : vector<18x1x9x32xbf16> to vector<18x9x32xbf16>
    %3 = vector.extract_strided_slice %0 {offsets = [0, 1, 0, 0], sizes = [18, 1, 9, 32], strides = [1, 1, 1, 1]} : vector<18x2x9x32xbf16> to vector<18x1x9x32xbf16>
    %4 = vector.shape_cast %3 : vector<18x1x9x32xbf16> to vector<18x9x32xbf16>
    %5 = arith.maximumf %2, %4 : vector<18x9x32xbf16>
    %6 = vector.extract_strided_slice %5 {offsets = [0, 0, 0], sizes = [18, 9, 16], strides = [1, 1, 1]} : vector<18x9x32xbf16> to vector<18x9x16xbf16>
    %7 = vector.extract_strided_slice %5 {offsets = [0, 0, 16], sizes = [18, 9, 16], strides = [1, 1, 1]} : vector<18x9x32xbf16> to vector<18x9x16xbf16>
    %8 = arith.maximumf %6, %7 : vector<18x9x16xbf16>
    %cst = arith.constant 0.000000e+00 : bf16
    %9 = vector.broadcast %cst : bf16 to vector<18x9x16xbf16>
    %10 = arith.maximumf %8, %9 : vector<18x9x16xbf16>
    %c0_3 = arith.constant 0 : index
    %c0_4 = arith.constant 0 : index
    %c0_5 = arith.constant 0 : index
    %11 = vector.load %arg2[%c0_3, %c0_4, %c0_5] : memref<18x9x16xbf16, #tpu.memory_space<vmem>>, vector<18x9x16xbf16>
    tpu.vector_store %arg2[%c0_3, %c0_4, %c0_5], %10 {strides = array<i32>} : memref<18x9x16xbf16, #tpu.memory_space<vmem>>, vector<18x9x16xbf16>,
    return
  }
  func.func @transform_0(%arg0: i32) -> (i32, i32, i32, i32) {
    %c0_i32 = arith.constant 0 : i32
    %c0_i32_0 = arith.constant 0 : i32
    %c0_i32_1 = arith.constant 0 : i32
    %c0_i32_2 = arith.constant 0 : i32
    return %arg0, %c0_i32, %c0_i32_0, %c0_i32_1 : i32, i32, i32, i32
  }
  func.func @transform_1(%arg0: i32) -> (i32, i32, i32) {
    %c0_i32 = arith.constant 0 : i32
    %c0_i32_0 = arith.constant 0 : i32
    %c0_i32_1 = arith.constant 0 : i32
    return %arg0, %c0_i32, %c0_i32_0 : i32, i32, i32
  }
}

module attributes {stable_mosaic.version = 11 : i64} {
  func.func @_mm_kernel(%arg0: i32, %arg1: i32, %arg2: i32, %arg3: memref<242x144xbf16, #tpu.memory_space<vmem>>, %arg4: memref<144x32xbf16, #tpu.memory_space<vmem>>, %arg5: memref<1x32xf32, #tpu.memory_space<vmem>>, %arg6: memref<242x32xbf16, #tpu.memory_space<vmem>>, %arg7: memref<242x32xf32, #tpu.memory_space<vmem>>) attributes {dimension_semantics = [#tpu.dimension_semantics<parallel>, #tpu.dimension_semantics<parallel>, #tpu.dimension_semantics<arbitrary>], iteration_bounds = array<i64: 1, 1, 1>, scalar_prefetch = 0 : i64, scratch_operands = 1 : i64, tpu.core_type = #tpu.core_type<tc>, window_params = [{transform_indices = @transform_0, window_bounds = array<i64: 242, 144>}, {transform_indices = @transform_1, window_bounds = array<i64: 144, 32>}, {transform_indices = @transform_2, window_bounds = array<i64: 1, 32>}, {transform_indices = @transform_3, window_bounds = array<i64: 242, 32>}]} {
    %c0_i32 = arith.constant 0 : i32
    %0 = arith.cmpi eq, %arg2, %c0_i32 : i32
    %1 = arith.extui %0 : i1 to i32
    %c0_i32_0 = arith.constant 0 : i32
    %2 = arith.cmpi ne, %1, %c0_i32_0 : i32
    scf.if %2 {
      %cst_10 = arith.constant 0.000000e+00 : f32
      %12 = vector.broadcast %cst_10 : f32 to vector<242x32xf32>
      %c0_11 = arith.constant 0 : index
      %c0_12 = arith.constant 0 : index
      %13 = vector.load %arg7[%c0_11, %c0_12] : memref<242x32xf32, #tpu.memory_space<vmem>>, vector<242x32xf32>
      tpu.vector_store %arg7[%c0_11, %c0_12], %12 {strides = array<i32>} : memref<242x32xf32, #tpu.memory_space<vmem>>, vector<242x32xf32>,
    } else {
    }
    %c0 = arith.constant 0 : index
    %c0_1 = arith.constant 0 : index
    %3 = vector.load %arg7[%c0, %c0_1] : memref<242x32xf32, #tpu.memory_space<vmem>>, vector<242x32xf32>
    %c0_2 = arith.constant 0 : index
    %c0_3 = arith.constant 0 : index
    %4 = vector.load %arg3[%c0_2, %c0_3] : memref<242x144xbf16, #tpu.memory_space<vmem>>, vector<242x144xbf16>
    %c0_4 = arith.constant 0 : index
    %c0_5 = arith.constant 0 : index
    %5 = vector.load %arg4[%c0_4, %c0_5] : memref<144x32xbf16, #tpu.memory_space<vmem>>, vector<144x32xbf16>
    %cst = arith.constant dense<0.000000e+00> : vector<242x32xf32>
    %6 = tpu.matmul %4, %5, %cst {dimension_numbers = #tpu.dot_dimension_numbers<[1], [0], [0], [1], [0, 0, 1, 1], [], []>} : vector<242x144xbf16>, vector<144x32xbf16>, vector<242x32xf32> -> vector<242x32xf32>
    %7 = arith.addf %3, %6 : vector<242x32xf32>
    %c0_6 = arith.constant 0 : index
    %c0_7 = arith.constant 0 : index
    %8 = vector.load %arg7[%c0_6, %c0_7] : memref<242x32xf32, #tpu.memory_space<vmem>>, vector<242x32xf32>
    tpu.vector_store %arg7[%c0_6, %c0_7], %7 {strides = array<i32>} : memref<242x32xf32, #tpu.memory_space<vmem>>, vector<242x32xf32>,
    %c0_i32_8 = arith.constant 0 : i32
    %9 = arith.cmpi eq, %arg2, %c0_i32_8 : i32
    %10 = arith.extui %9 : i1 to i32
    %c0_i32_9 = arith.constant 0 : i32
    %11 = arith.cmpi ne, %10, %c0_i32_9 : i32
    scf.if %11 {
      %c0_10 = arith.constant 0 : index
      %c0_11 = arith.constant 0 : index
      %12 = vector.load %arg7[%c0_10, %c0_11] : memref<242x32xf32, #tpu.memory_space<vmem>>, vector<242x32xf32>
      %c0_12 = arith.constant 0 : index
      %c0_13 = arith.constant 0 : index
      %13 = vector.load %arg5[%c0_12, %c0_13] : memref<1x32xf32, #tpu.memory_space<vmem>>, vector<1x32xf32>
      %14 = vector.broadcast %13 : vector<1x32xf32> to vector<242x32xf32>
      %15 = arith.addf %12, %14 : vector<242x32xf32>
      %16 = arith.truncf %15 : vector<242x32xf32> to vector<242x32xbf16>
      %c0_14 = arith.constant 0 : index
      %c0_15 = arith.constant 0 : index
      %17 = vector.load %arg6[%c0_14, %c0_15] : memref<242x32xbf16, #tpu.memory_space<vmem>>, vector<242x32xbf16>
      tpu.vector_store %arg6[%c0_14, %c0_15], %16 {strides = array<i32>} : memref<242x32xbf16, #tpu.memory_space<vmem>>, vector<242x32xbf16>,
    } else {
    }
    return
  }
  func.func @transform_0(%arg0: i32, %arg1: i32, %arg2: i32) -> (i32, i32) {
    %c0_i32 = arith.constant 0 : i32
    return %arg0, %arg2 : i32, i32
  }
  func.func @transform_1(%arg0: i32, %arg1: i32, %arg2: i32) -> (i32, i32) {
    %c0_i32 = arith.constant 0 : i32
    return %arg2, %arg1 : i32, i32
  }
  func.func @transform_2(%arg0: i32, %arg1: i32, %arg2: i32) -> (i32, i32) {
    %c0_i32 = arith.constant 0 : i32
    %c0_i32_0 = arith.constant 0 : i32
    return %c0_i32, %arg1 : i32, i32
  }
  func.func @transform_3(%arg0: i32, %arg1: i32, %arg2: i32) -> (i32, i32) {
    %c0_i32 = arith.constant 0 : i32
    return %arg0, %arg1 : i32, i32
  }
}

module attributes {stable_mosaic.version = 11 : i64} {
  func.func @_pool_relu_kernel(%arg0: i32, %arg1: memref<10x2x5x64xbf16, #tpu.memory_space<vmem>>, %arg2: memref<10x5x32xbf16, #tpu.memory_space<vmem>>) attributes {dimension_semantics = [#tpu.dimension_semantics<parallel>], iteration_bounds = array<i64: 1>, scalar_prefetch = 0 : i64, scratch_operands = 0 : i64, tpu.core_type = #tpu.core_type<tc>, window_params = [{transform_indices = @transform_0, window_bounds = array<i64: 10, 2, 5, 64>}, {transform_indices = @transform_1, window_bounds = array<i64: 10, 5, 32>}]} {
    %c0 = arith.constant 0 : index
    %c0_0 = arith.constant 0 : index
    %c0_1 = arith.constant 0 : index
    %c0_2 = arith.constant 0 : index
    %0 = vector.load %arg1[%c0, %c0_0, %c0_1, %c0_2] : memref<10x2x5x64xbf16, #tpu.memory_space<vmem>>, vector<10x2x5x64xbf16>
    %1 = vector.extract_strided_slice %0 {offsets = [0, 0, 0, 0], sizes = [10, 1, 5, 64], strides = [1, 1, 1, 1]} : vector<10x2x5x64xbf16> to vector<10x1x5x64xbf16>
    %2 = vector.shape_cast %1 : vector<10x1x5x64xbf16> to vector<10x5x64xbf16>
    %3 = vector.extract_strided_slice %0 {offsets = [0, 1, 0, 0], sizes = [10, 1, 5, 64], strides = [1, 1, 1, 1]} : vector<10x2x5x64xbf16> to vector<10x1x5x64xbf16>
    %4 = vector.shape_cast %3 : vector<10x1x5x64xbf16> to vector<10x5x64xbf16>
    %5 = arith.maximumf %2, %4 : vector<10x5x64xbf16>
    %6 = vector.extract_strided_slice %5 {offsets = [0, 0, 0], sizes = [10, 5, 32], strides = [1, 1, 1]} : vector<10x5x64xbf16> to vector<10x5x32xbf16>
    %7 = vector.extract_strided_slice %5 {offsets = [0, 0, 32], sizes = [10, 5, 32], strides = [1, 1, 1]} : vector<10x5x64xbf16> to vector<10x5x32xbf16>
    %8 = arith.maximumf %6, %7 : vector<10x5x32xbf16>
    %cst = arith.constant 0.000000e+00 : bf16
    %9 = vector.broadcast %cst : bf16 to vector<10x5x32xbf16>
    %10 = arith.maximumf %8, %9 : vector<10x5x32xbf16>
    %c0_3 = arith.constant 0 : index
    %c0_4 = arith.constant 0 : index
    %c0_5 = arith.constant 0 : index
    %11 = vector.load %arg2[%c0_3, %c0_4, %c0_5] : memref<10x5x32xbf16, #tpu.memory_space<vmem>>, vector<10x5x32xbf16>
    tpu.vector_store %arg2[%c0_3, %c0_4, %c0_5], %10 {strides = array<i32>} : memref<10x5x32xbf16, #tpu.memory_space<vmem>>, vector<10x5x32xbf16>,
    return
  }
  func.func @transform_0(%arg0: i32) -> (i32, i32, i32, i32) {
    %c0_i32 = arith.constant 0 : i32
    %c0_i32_0 = arith.constant 0 : i32
    %c0_i32_1 = arith.constant 0 : i32
    %c0_i32_2 = arith.constant 0 : i32
    return %arg0, %c0_i32, %c0_i32_0, %c0_i32_1 : i32, i32, i32, i32
  }
  func.func @transform_1(%arg0: i32) -> (i32, i32, i32) {
    %c0_i32 = arith.constant 0 : i32
    %c0_i32_0 = arith.constant 0 : i32
    %c0_i32_1 = arith.constant 0 : i32
    return %arg0, %c0_i32, %c0_i32_0 : i32, i32, i32
  }
}

module attributes {stable_mosaic.version = 11 : i64} {
  func.func @_mm_kernel(%arg0: i32, %arg1: i32, %arg2: i32, %arg3: memref<2x800xbf16, #tpu.memory_space<vmem>>, %arg4: memref<800x128xbf16, #tpu.memory_space<vmem>>, %arg5: memref<1x128xf32, #tpu.memory_space<vmem>>, %arg6: memref<2x128xbf16, #tpu.memory_space<vmem>>, %arg7: memref<2x128xf32, #tpu.memory_space<vmem>>) attributes {dimension_semantics = [#tpu.dimension_semantics<parallel>, #tpu.dimension_semantics<parallel>, #tpu.dimension_semantics<arbitrary>], iteration_bounds = array<i64: 1, 1, 1>, scalar_prefetch = 0 : i64, scratch_operands = 1 : i64, tpu.core_type = #tpu.core_type<tc>, window_params = [{transform_indices = @transform_0, window_bounds = array<i64: 2, 800>}, {transform_indices = @transform_1, window_bounds = array<i64: 800, 128>}, {transform_indices = @transform_2, window_bounds = array<i64: 1, 128>}, {transform_indices = @transform_3, window_bounds = array<i64: 2, 128>}]} {
    %c0_i32 = arith.constant 0 : i32
    %0 = arith.cmpi eq, %arg2, %c0_i32 : i32
    %1 = arith.extui %0 : i1 to i32
    %c0_i32_0 = arith.constant 0 : i32
    %2 = arith.cmpi ne, %1, %c0_i32_0 : i32
    scf.if %2 {
      %cst_10 = arith.constant 0.000000e+00 : f32
      %12 = vector.broadcast %cst_10 : f32 to vector<2x128xf32>
      %c0_11 = arith.constant 0 : index
      %c0_12 = arith.constant 0 : index
      %13 = vector.load %arg7[%c0_11, %c0_12] : memref<2x128xf32, #tpu.memory_space<vmem>>, vector<2x128xf32>
      tpu.vector_store %arg7[%c0_11, %c0_12], %12 {strides = array<i32>} : memref<2x128xf32, #tpu.memory_space<vmem>>, vector<2x128xf32>,
    } else {
    }
    %c0 = arith.constant 0 : index
    %c0_1 = arith.constant 0 : index
    %3 = vector.load %arg7[%c0, %c0_1] : memref<2x128xf32, #tpu.memory_space<vmem>>, vector<2x128xf32>
    %c0_2 = arith.constant 0 : index
    %c0_3 = arith.constant 0 : index
    %4 = vector.load %arg3[%c0_2, %c0_3] : memref<2x800xbf16, #tpu.memory_space<vmem>>, vector<2x800xbf16>
    %c0_4 = arith.constant 0 : index
    %c0_5 = arith.constant 0 : index
    %5 = vector.load %arg4[%c0_4, %c0_5] : memref<800x128xbf16, #tpu.memory_space<vmem>>, vector<800x128xbf16>
    %cst = arith.constant dense<0.000000e+00> : vector<2x128xf32>
    %6 = tpu.matmul %4, %5, %cst {dimension_numbers = #tpu.dot_dimension_numbers<[1], [0], [0], [1], [0, 0, 1, 1], [], []>} : vector<2x800xbf16>, vector<800x128xbf16>, vector<2x128xf32> -> vector<2x128xf32>
    %7 = arith.addf %3, %6 : vector<2x128xf32>
    %c0_6 = arith.constant 0 : index
    %c0_7 = arith.constant 0 : index
    %8 = vector.load %arg7[%c0_6, %c0_7] : memref<2x128xf32, #tpu.memory_space<vmem>>, vector<2x128xf32>
    tpu.vector_store %arg7[%c0_6, %c0_7], %7 {strides = array<i32>} : memref<2x128xf32, #tpu.memory_space<vmem>>, vector<2x128xf32>,
    %c0_i32_8 = arith.constant 0 : i32
    %9 = arith.cmpi eq, %arg2, %c0_i32_8 : i32
    %10 = arith.extui %9 : i1 to i32
    %c0_i32_9 = arith.constant 0 : i32
    %11 = arith.cmpi ne, %10, %c0_i32_9 : i32
    scf.if %11 {
      %c0_10 = arith.constant 0 : index
      %c0_11 = arith.constant 0 : index
      %12 = vector.load %arg7[%c0_10, %c0_11] : memref<2x128xf32, #tpu.memory_space<vmem>>, vector<2x128xf32>
      %c0_12 = arith.constant 0 : index
      %c0_13 = arith.constant 0 : index
      %13 = vector.load %arg5[%c0_12, %c0_13] : memref<1x128xf32, #tpu.memory_space<vmem>>, vector<1x128xf32>
      %14 = vector.broadcast %13 : vector<1x128xf32> to vector<2x128xf32>
      %15 = arith.addf %12, %14 : vector<2x128xf32>
      %cst_14 = arith.constant 0.000000e+00 : f32
      %16 = vector.broadcast %cst_14 : f32 to vector<2x128xf32>
      %17 = arith.maximumf %15, %16 : vector<2x128xf32>
      %18 = arith.truncf %17 : vector<2x128xf32> to vector<2x128xbf16>
      %c0_15 = arith.constant 0 : index
      %c0_16 = arith.constant 0 : index
      %19 = vector.load %arg6[%c0_15, %c0_16] : memref<2x128xbf16, #tpu.memory_space<vmem>>, vector<2x128xbf16>
      tpu.vector_store %arg6[%c0_15, %c0_16], %18 {strides = array<i32>} : memref<2x128xbf16, #tpu.memory_space<vmem>>, vector<2x128xbf16>,
    } else {
    }
    return
  }
  func.func @transform_0(%arg0: i32, %arg1: i32, %arg2: i32) -> (i32, i32) {
    %c0_i32 = arith.constant 0 : i32
    return %arg0, %arg2 : i32, i32
  }
  func.func @transform_1(%arg0: i32, %arg1: i32, %arg2: i32) -> (i32, i32) {
    %c0_i32 = arith.constant 0 : i32
    return %arg2, %arg1 : i32, i32
  }
  func.func @transform_2(%arg0: i32, %arg1: i32, %arg2: i32) -> (i32, i32) {
    %c0_i32 = arith.constant 0 : i32
    %c0_i32_0 = arith.constant 0 : i32
    return %c0_i32, %arg1 : i32, i32
  }
  func.func @transform_3(%arg0: i32, %arg1: i32, %arg2: i32) -> (i32, i32) {
    %c0_i32 = arith.constant 0 : i32
    return %arg0, %arg1 : i32, i32
  }
}

module attributes {stable_mosaic.version = 11 : i64} {
  func.func @_mm_kernel(%arg0: i32, %arg1: i32, %arg2: i32, %arg3: memref<2x128xbf16, #tpu.memory_space<vmem>>, %arg4: memref<128x4xbf16, #tpu.memory_space<vmem>>, %arg5: memref<1x4xf32, #tpu.memory_space<vmem>>, %arg6: memref<2x4xf32, #tpu.memory_space<vmem>>, %arg7: memref<2x4xf32, #tpu.memory_space<vmem>>) attributes {dimension_semantics = [#tpu.dimension_semantics<parallel>, #tpu.dimension_semantics<parallel>, #tpu.dimension_semantics<arbitrary>], iteration_bounds = array<i64: 1, 1, 1>, scalar_prefetch = 0 : i64, scratch_operands = 1 : i64, tpu.core_type = #tpu.core_type<tc>, window_params = [{transform_indices = @transform_0, window_bounds = array<i64: 2, 128>}, {transform_indices = @transform_1, window_bounds = array<i64: 128, 4>}, {transform_indices = @transform_2, window_bounds = array<i64: 1, 4>}, {transform_indices = @transform_3, window_bounds = array<i64: 2, 4>}]} {
    %c0_i32 = arith.constant 0 : i32
    %0 = arith.cmpi eq, %arg2, %c0_i32 : i32
    %1 = arith.extui %0 : i1 to i32
    %c0_i32_0 = arith.constant 0 : i32
    %2 = arith.cmpi ne, %1, %c0_i32_0 : i32
    scf.if %2 {
      %cst_10 = arith.constant 0.000000e+00 : f32
      %12 = vector.broadcast %cst_10 : f32 to vector<2x4xf32>
      %c0_11 = arith.constant 0 : index
      %c0_12 = arith.constant 0 : index
      %13 = vector.load %arg7[%c0_11, %c0_12] : memref<2x4xf32, #tpu.memory_space<vmem>>, vector<2x4xf32>
      tpu.vector_store %arg7[%c0_11, %c0_12], %12 {strides = array<i32>} : memref<2x4xf32, #tpu.memory_space<vmem>>, vector<2x4xf32>,
    } else {
    }
    %c0 = arith.constant 0 : index
    %c0_1 = arith.constant 0 : index
    %3 = vector.load %arg7[%c0, %c0_1] : memref<2x4xf32, #tpu.memory_space<vmem>>, vector<2x4xf32>
    %c0_2 = arith.constant 0 : index
    %c0_3 = arith.constant 0 : index
    %4 = vector.load %arg3[%c0_2, %c0_3] : memref<2x128xbf16, #tpu.memory_space<vmem>>, vector<2x128xbf16>
    %c0_4 = arith.constant 0 : index
    %c0_5 = arith.constant 0 : index
    %5 = vector.load %arg4[%c0_4, %c0_5] : memref<128x4xbf16, #tpu.memory_space<vmem>>, vector<128x4xbf16>
    %cst = arith.constant dense<0.000000e+00> : vector<2x4xf32>
    %6 = tpu.matmul %4, %5, %cst {dimension_numbers = #tpu.dot_dimension_numbers<[1], [0], [0], [1], [0, 0, 1, 1], [], []>} : vector<2x128xbf16>, vector<128x4xbf16>, vector<2x4xf32> -> vector<2x4xf32>
    %7 = arith.addf %3, %6 : vector<2x4xf32>
    %c0_6 = arith.constant 0 : index
    %c0_7 = arith.constant 0 : index
    %8 = vector.load %arg7[%c0_6, %c0_7] : memref<2x4xf32, #tpu.memory_space<vmem>>, vector<2x4xf32>
    tpu.vector_store %arg7[%c0_6, %c0_7], %7 {strides = array<i32>} : memref<2x4xf32, #tpu.memory_space<vmem>>, vector<2x4xf32>,
    %c0_i32_8 = arith.constant 0 : i32
    %9 = arith.cmpi eq, %arg2, %c0_i32_8 : i32
    %10 = arith.extui %9 : i1 to i32
    %c0_i32_9 = arith.constant 0 : i32
    %11 = arith.cmpi ne, %10, %c0_i32_9 : i32
    scf.if %11 {
      %c0_10 = arith.constant 0 : index
      %c0_11 = arith.constant 0 : index
      %12 = vector.load %arg7[%c0_10, %c0_11] : memref<2x4xf32, #tpu.memory_space<vmem>>, vector<2x4xf32>
      %c0_12 = arith.constant 0 : index
      %c0_13 = arith.constant 0 : index
      %13 = vector.load %arg5[%c0_12, %c0_13] : memref<1x4xf32, #tpu.memory_space<vmem>>, vector<1x4xf32>
      %14 = vector.broadcast %13 : vector<1x4xf32> to vector<2x4xf32>
      %15 = arith.addf %12, %14 : vector<2x4xf32>
      %cst_14 = arith.constant dense<0xFF800000> : vector<2xf32>
      %16 = vector.multi_reduction <maximumf>, %15, %cst_14 [1] : vector<2x4xf32> to vector<2xf32>
      %17 = vector.shape_cast %16 : vector<2xf32> to vector<2x1xf32>
      %18 = vector.broadcast %17 : vector<2x1xf32> to vector<2x4xf32>
      %19 = arith.subf %15, %18 : vector<2x4xf32>
      %20 = math.exp %19 : vector<2x4xf32>
      %cst_15 = arith.constant dense<0.000000e+00> : vector<2xf32>
      %21 = vector.multi_reduction <add>, %20, %cst_15 [1] : vector<2x4xf32> to vector<2xf32>
      %22 = vector.shape_cast %21 : vector<2xf32> to vector<2x1xf32>
      %23 = vector.broadcast %22 : vector<2x1xf32> to vector<2x4xf32>
      %24 = arith.divf %20, %23 : vector<2x4xf32>
      %c0_16 = arith.constant 0 : index
      %c0_17 = arith.constant 0 : index
      %25 = vector.load %arg6[%c0_16, %c0_17] : memref<2x4xf32, #tpu.memory_space<vmem>>, vector<2x4xf32>
      tpu.vector_store %arg6[%c0_16, %c0_17], %24 {strides = array<i32>} : memref<2x4xf32, #tpu.memory_space<vmem>>, vector<2x4xf32>,
    } else {
    }
    return
  }
  func.func @transform_0(%arg0: i32, %arg1: i32, %arg2: i32) -> (i32, i32) {
    %c0_i32 = arith.constant 0 : i32
    return %arg0, %arg2 : i32, i32
  }
  func.func @transform_1(%arg0: i32, %arg1: i32, %arg2: i32) -> (i32, i32) {
    %c0_i32 = arith.constant 0 : i32
    return %arg2, %arg1 : i32, i32
  }
  func.func @transform_2(%arg0: i32, %arg1: i32, %arg2: i32) -> (i32, i32) {
    %c0_i32 = arith.constant 0 : i32
    %c0_i32_0 = arith.constant 0 : i32
    return %c0_i32, %arg1 : i32, i32
  }
  func.func @transform_3(%arg0: i32, %arg1: i32, %arg2: i32) -> (i32, i32) {
    %c0_i32 = arith.constant 0 : i32
    return %arg0, %arg1 : i32, i32
  }
}

</mosaic_0001>

<bundles_post_ra>
// kernel: tile.13
= control target key start
LH: loop header
LB: loop body
LE: loop exit
PB: predicated region body
PF: predicated region fallthrough
CT: control target
= control target key end

     0   :  { %s28_s0 = inlined_call_operand.vmem [shape: f32[3], index: 0, kind: input, shape index: {}]   ;;  %s29_s1 = inlined_call_operand.vmem [shape: f32[16,3], index: 1, kind: output, shape index: {}]  }
   0x1   :  { %v4_v0 = vld [vmem:[%s28_s0] ss:$0 sm:$0xff] }
   0x2   :  { %5 = vst [vmem:[%s29_s1] sm:$0xff] %v4_v0  ;;  %8 = vst [vmem:[%s29_s1 + $0x8] sm:$0xff] %v4_v0 }

// kernel: tile.14
= control target key start
LH: loop header
LB: loop body
LE: loop exit
PB: predicated region body
PF: predicated region fallthrough
CT: control target
= control target key end

     0   :  { %s131_s10 = smov 45   ;;  %s132_s11 = smov 39   ;;  %vm3_vm0 = vcmask 23552   ;;  %vm9_vm1 = vcmask 392552   ;;  %vm15_vm2 = vcmask 367952   ;;  %vm21_vm3 = vcmask 343352   ;;  %s207_s0 = inlined_call_operand.vmem [shape: f32[16,3], index: 0, kind: input, shape index: {}]   ;;  %s208_s1 = inlined_call_operand.vmem [shape: f32[1,48], index: 1, kind: output, shape index: {}]  }
   0x1   :  { %v101_v0 = vld [vmem:[%s207_s0 + $0xf] sm:$0x1]   ;;  %v103_v1 = vld [vmem:[%s207_s0 + $0xd] sm:$0x1]   ;;  %v102_v2 = vld [vmem:[%s207_s0 + $0xe] sm:$0x1]  }
   0x2   :  { %7 = vrot.lane.b32.xlu0 %v101_v0, %s131_s10  ;;  %19 = vrot.lane.b32.xlu1 %v103_v1, %s132_s11  ;;  %v104_v3 = vld [vmem:[%s207_s0 + $0xc] sm:$0x1]   ;;  %s133_s16 = smov 42   ;;  %s134_s17 = smov 36   ;;  %v105_v4 = vld [vmem:[%s207_s0 + $0xb] sm:$0x1]  }
   0x3   :  { %v106_v5 = vld [vmem:[%s207_s0 + $0xa] sm:$0x1]   ;;  %v2_v6 = vld [vmem:[%s207_s0] sm:$0x1]   ;;  %s135_s24 = smov 33   ;;  %s136_s25 = smov 30  }
   0x4   :  { %4 = vst.msk [vmem:[#allocation0] sm:$0x1] %vm3_vm0, %v2_v6   ;;  %v107_v7 = vld [vmem:[%s207_s0 + $0x9] sm:$0x1]   ;;  %v108_v8 = vld [vmem:[%s207_s0 + $0x8] sm:$0x1]  }
   0x5   :  { %s137_s30 = smov 27   ;;  %s138_s2 = smov 24   ;;  %v109_v9 = vld [vmem:[%s207_s0 + $0x7] sm:$0x1]   ;;  %v110_v10 = vld [vmem:[%s207_s0 + $0x6] sm:$0x1]  }
   0x6   :  { %13 = vrot.lane.b32.xlu0 %v102_v2, %s133_s16  ;;  %25 = vrot.lane.b32.xlu1 %v104_v3, %s134_s17  ;;  %s139_s7 = smov 21   ;;  %s140_s8 = smov 18   ;;  %v111_v11 = vld [vmem:[%s207_s0 + $0x5] sm:$0x1]   ;;  %v112_v12 = vld [vmem:[%s207_s0 + $0x4] sm:$0x1]  }
   0x7   :  { %s141_s13 = smov 15   ;;  %s142_s14 = smov 12   ;;  %v113_v13 = vld [vmem:[%s207_s0 + $0x3] sm:$0x1]   ;;  %v114_v14 = vld [vmem:[%s207_s0 + $0x2] sm:$0x1]  }
   0x8   :  { %s143_s19 = smov 9   ;;  %s144_s20 = smov 6   ;;  %v115_v15 = vld [vmem:[%s207_s0 + $0x1] sm:$0x1]   ;;  %vm27_vm4 = vcmask 318752   ;;  %vm33_vm5 = vcmask 294152  }
   0x9   :  { %s145_s0 = smov 3   ;;  %vm39_vm6 = vcmask 269552   ;;  %vm45_vm7 = vcmask 244952   ;;  %vm51_vm8 = vcmask 220352   ;;  %vm57_vm9 = vcmask 195752  }
   0xa   :  { %31 = vrot.lane.b32.xlu0 %v105_v4, %s135_s24  ;;  %37 = vrot.lane.b32.xlu1 %v106_v5, %s136_s25  ;;  %vm63_vm10 = vcmask 171152   ;;  %vm69_vm11 = vcmask 146552   ;;  %vm75_vm12 = vcmask 121952   ;;  %vm81_vm13 = vcmask 97352  }
   0xb   :  { %vm87_vm14 = vcmask 72752   ;;  %vm93_vm15 = vcmask 48152  }
   0xe   :  { %43 = vrot.lane.b32.xlu0 %v107_v7, %s137_s30  ;;  %49 = vrot.lane.b32.xlu1 %v108_v8, %s138_s2 }
  0x12   :  { %55 = vrot.lane.b32.xlu0 %v109_v9, %s139_s7  ;;  %61 = vrot.lane.b32.xlu1 %v110_v10, %s140_s8 }
  0x16   :  { %67 = vrot.lane.b32.xlu0 %v111_v11, %s141_s13  ;;  %73 = vrot.lane.b32.xlu1 %v112_v12, %s142_s14 }
  0x1a   :  { %79 = vrot.lane.b32.xlu0 %v113_v13, %s143_s19  ;;  %85 = vrot.lane.b32.xlu1 %v114_v14, %s144_s20 }
  0x1e   :  { %91 = vrot.lane.b32.xlu0 %v115_v15, %s145_s0 }
  0x74   :  { %v8_v16 = vpop.permute.xlu0 %7   ;;  %v20_v17 = vpop.permute.xlu1 %19  }
  0x75   :  { %10 = vst.msk [vmem:[#allocation0] sm:$0x1] %vm9_vm1, %v8_v16  }
  0x78   :  { %v14_v18 = vpop.permute.xlu0 %13   ;;  %v26_v19 = vpop.permute.xlu1 %25  }
  0x79   :  { %16 = vst.msk [vmem:[#allocation0] sm:$0x1] %vm15_vm2, %v14_v18  }
  0x7a   :  { %22 = vst.msk [vmem:[#allocation0] sm:$0x1] %vm21_vm3, %v20_v17  }
  0x7b   :  { %28 = vst.msk [vmem:[#allocation0] sm:$0x1] %vm27_vm4, %v26_v19  }
  0x7c   :  { %v32_v20 = vpop.permute.xlu0 %31   ;;  %v38_v21 = vpop.permute.xlu1 %37  }
  0x7d   :  { %34 = vst.msk [vmem:[#allocation0] sm:$0x1] %vm33_vm5, %v32_v20  }
  0x7e   :  { %40 = vst.msk [vmem:[#allocation0] sm:$0x1] %vm39_vm6, %v38_v21  }
  0x80   :  { %v44_v22 = vpop.permute.xlu0 %43   ;;  %v50_v23 = vpop.permute.xlu1 %49  }
  0x81   :  { %46 = vst.msk [vmem:[#allocation0] sm:$0x1] %vm45_vm7, %v44_v22  }
  0x82   :  { %52 = vst.msk [vmem:[#allocation0] sm:$0x1] %vm51_vm8, %v50_v23  }
  0x84   :  { %v56_v24 = vpop.permute.xlu0 %55   ;;  %v62_v25 = vpop.permute.xlu1 %61  }
  0x85   :  { %58 = vst.msk [vmem:[#allocation0] sm:$0x1] %vm57_vm9, %v56_v24  }
  0x86   :  { %64 = vst.msk [vmem:[#allocation0] sm:$0x1] %vm63_vm10, %v62_v25  }
  0x88   :  { %v68_v26 = vpop.permute.xlu0 %67   ;;  %v74_v27 = vpop.permute.xlu1 %73  }
  0x89   :  { %70 = vst.msk [vmem:[#allocation0] sm:$0x1] %vm69_vm11, %v68_v26  }
  0x8a   :  { %76 = vst.msk [vmem:[#allocation0] sm:$0x1] %vm75_vm12, %v74_v27  }
  0x8c   :  { %v80_v28 = vpop.permute.xlu0 %79   ;;  %v86_v29 = vpop.permute.xlu1 %85  }
  0x8d   :  { %82 = vst.msk [vmem:[#allocation0] sm:$0x1] %vm81_vm13, %v80_v28  }
  0x8e   :  { %88 = vst.msk [vmem:[#allocation0] sm:$0x1] %vm87_vm14, %v86_v29  }
  0x90   :  { %v92_v30 = vpop.permute.xlu0 %91  }
  0x91   :  { %94 = vst.msk [vmem:[#allocation0] sm:$0x1] %vm93_vm15, %v92_v30  }
  0x98   :  { %v98_v31 = vld [vmem:[#allocation0] sm:$0x1] }
  0x99   :  { %100 = vst [vmem:[%s208_s1] sm:$0x1] %v98_v31 }

// kernel: convnn_forward.7
= control target key start
LH: loop header
LB: loop body
LE: loop exit
PB: predicated region body
PF: predicated region fallthrough
CT: control target
= control target key end

     0   :  { %vm56_vm0 = vcmask 388096   ;;  %s125_s0 = inlined_call_operand.vmem [shape: f32[32,48], index: 0, kind: input, shape index: {}]   ;;  %s126_s1 = inlined_call_operand.vmem [shape: f32[1,48], index: 1, kind: input, shape index: {}]   ;;  %s127_s2 = inlined_call_operand.vmem [shape: f32[1,48], index: 2, kind: input, shape index: {}]   ;;  %s128_s3 = inlined_call_operand.vmem [shape: bf16[32,48], index: 3, kind: output, shape index: {}]  }
   0x1   :  { %v14_v0 = vld [vmem:[%s125_s0] sm:$0xff]  ;;  %v15_v4 = vld [vmem:[%s125_s0 + $0x8] sm:$0xff]  ;;  %v16_v5 = vld [vmem:[%s125_s0 + $0x10] sm:$0xff] }
   0x2   :  { %v65_v1 = vld [vmem:[%s126_s1] ss:$0 sm:$0xff]  ;;  %v17_v6 = vld [vmem:[%s125_s0 + $0x18] sm:$0xff] }
   0x3   :  { %v66_v2 = vld [vmem:[%s127_s2] ss:$0 sm:$0xff]  ;;  %v25_v3 = vmul.f32 %v65_v1, %v14_v0  ;;  %v26_v7 = vmul.f32 %v65_v1, %v15_v4  ;;  %v27_v8 = vmul.f32 %v65_v1, %v16_v5  ;;  %v28_v9 = vmul.f32 %v65_v1, %v17_v6 }
   0x5   :  { %v36_v10 = vadd.f32 %v66_v2, %v25_v3  ;;  %v37_v11 = vadd.f32 %v66_v2, %v26_v7  ;;  %v38_v12 = vadd.f32 %v66_v2, %v27_v8  ;;  %v39_v13 = vadd.f32 %v66_v2, %v28_v9 }
   0x7   :  { %v71_v14 = vpack.c.bf16 %v36_v10, %v36_v10  ;;  %v72_v15 = vpack.c.bf16 %v37_v11, %v37_v11  ;;  %v73_v16 = vpack.c.bf16 %v38_v12, %v38_v12  ;;  %v74_v17 = vpack.c.bf16 %v39_v13, %v39_v13 }
   0x9   :  { %57 = vst.msk [vmem:[%s128_s3] sm:$0xf] %vm56_vm0, %v71_v14  ;;  %58 = vst.msk [vmem:[%s128_s3 + $0x4] sm:$0xf] %vm56_vm0, %v72_v15 }
   0xa   :  { %59 = vst.msk [vmem:[%s128_s3 + $0x8] sm:$0xf] %vm56_vm0, %v73_v16  ;;  %60 = vst.msk [vmem:[%s128_s3 + $0xc] sm:$0xf] %vm56_vm0, %v74_v17 }

// kernel: convnn_forward.9
= control target key start
LH: loop header
LB: loop body
LE: loop exit
PB: predicated region body
PF: predicated region fallthrough
CT: control target
= control target key end

     0   :  { %s415_s22 = smov 112   ;;  %vm333_vm0 = vcmask 125952   ;;  %vm335_vm1 = vcmask 122880   ;;  %vm336_vm2 = vsmask.f32 256  ;;  %s1079_s0 = inlined_call_operand.vmem [shape: bf16[18,2,9,32], index: 0, kind: input, shape index: {}]   ;;  %s1080_s1 = inlined_call_operand.vmem [shape: bf16[18,9,16], index: 1, kind: output, shape index: {}]  }
   0x1   :  { %v13_v0 = vld [vmem:[%s1079_s0 + $0x10] sm:$0xf]  ;;  %v15_v1 = vld [vmem:[%s1079_s0 + $0x18] sm:$0xf]  ;;  %v9_v2 = vld [vmem:[%s1079_s0] sm:$0xf] }
   0x2   :  { %v436_v3 = vmax.bf16 %v15_v1, %v13_v0  ;;  %v11_v4 = vld [vmem:[%s1079_s0 + $0x8] sm:$0xf]  ;;  %v14_v5 = vld [vmem:[%s1079_s0 + $0x14] sm:$0x1]  ;;  %v16_v6 = vld [vmem:[%s1079_s0 + $0x1c] sm:$0x1] }
   0x3   :  { %v447_v7 = vmax.bf16 %v11_v4, %v9_v2  ;;  %v10_v8 = vld [vmem:[%s1079_s0 + $0x4] sm:$0x1]  ;;  %v12_v9 = vld [vmem:[%s1079_s0 + $0xc] sm:$0x1]  ;;  %v457_v10 = vmax.bf16 %v16_v6, %v14_v5  ;;  %v17_v14 = vld [vmem:[%s1079_s0 + $0x20] sm:$0xf] }
   0x4   :  { %157 = vrot.lane.b32.xlu1 %v436_v3, %s415_s22  ;;  %v461_v11 = vmax.bf16 %v12_v9, %v10_v8  ;;  %v18_v12 = vld [vmem:[%s1079_s0 + $0x24] sm:$0x1]  ;;  %v20_v13 = vld [vmem:[%s1079_s0 + $0x2c] sm:$0x1]  ;;  %v19_v15 = vld [vmem:[%s1079_s0 + $0x28] sm:$0xf] }
   0x5   :  { %153 = vrot.lane.b32.xlu0 %v447_v7, %s415_s22  ;;  %v477_v16 = vmax.bf16 %v20_v13, %v18_v12  ;;  %v481_v17 = vmax.bf16 %v19_v15, %v17_v14  ;;  %v26_v18 = vld [vmem:[%s1079_s0 + $0x44] sm:$0x1]  ;;  %v28_v19 = vld [vmem:[%s1079_s0 + $0x4c] sm:$0x1]  ;;  %v22_v20 = vld [vmem:[%s1079_s0 + $0x34] sm:$0x1] }
   0x6   :  { %v24_v21 = vld [vmem:[%s1079_s0 + $0x3c] sm:$0x1]  ;;  %v497_v22 = vmax.bf16 %v28_v19, %v26_v18  ;;  %v34_v24 = vld [vmem:[%s1079_s0 + $0x64] sm:$0x1]  ;;  %v36_v25 = vld [vmem:[%s1079_s0 + $0x6c] sm:$0x1] }
   0x7   :  { %v501_v23 = vmax.bf16 %v24_v21, %v22_v20  ;;  %v30_v26 = vld [vmem:[%s1079_s0 + $0x54] sm:$0x1]  ;;  %v32_v27 = vld [vmem:[%s1079_s0 + $0x5c] sm:$0x1]  ;;  %v517_v28 = vmax.bf16 %v36_v25, %v34_v24  ;;  %v42_v30 = vld [vmem:[%s1079_s0 + $0x84] sm:$0x1] }
   0x8   :  { %159 = vrot.lane.b32.xlu1 %v457_v10, %s415_s22  ;;  %v521_v29 = vmax.bf16 %v32_v27, %v30_v26  ;;  %v44_v31 = vld [vmem:[%s1079_s0 + $0x8c] sm:$0x1]  ;;  %v38_v32 = vld [vmem:[%s1079_s0 + $0x74] sm:$0x1]  ;;  %v40_v33 = vld [vmem:[%s1079_s0 + $0x7c] sm:$0x1] }
   0x9   :  { %155 = vrot.lane.b32.xlu0 %v461_v11, %s415_s22  ;;  %v537_v34 = vmax.bf16 %v44_v31, %v42_v30  ;;  %v541_v35 = vmax.bf16 %v40_v33, %v38_v32  ;;  %v50_v36 = vld [vmem:[%s1079_s0 + $0xa4] sm:$0x1]  ;;  %v52_v37 = vld [vmem:[%s1079_s0 + $0xac] sm:$0x1]  ;;  %v46_v38 = vld [vmem:[%s1079_s0 + $0x94] sm:$0x1] }
   0xa   :  { %v48_v39 = vld [vmem:[%s1079_s0 + $0x9c] sm:$0x1]  ;;  %v557_v40 = vmax.bf16 %v52_v37, %v50_v36  ;;  %v58_v42 = vld [vmem:[%s1079_s0 + $0xc4] sm:$0x1]  ;;  %v60_v43 = vld [vmem:[%s1079_s0 + $0xcc] sm:$0x1] }
   0xb   :  { %v561_v41 = vmax.bf16 %v48_v39, %v46_v38  ;;  %v54_v44 = vld [vmem:[%s1079_s0 + $0xb4] sm:$0x1]  ;;  %v56_v45 = vld [vmem:[%s1079_s0 + $0xbc] sm:$0x1]  ;;  %v577_v46 = vmax.bf16 %v60_v43, %v58_v42  ;;  %v66_v48 = vld [vmem:[%s1079_s0 + $0xe4] sm:$0x1] }
   0xc   :  { %163 = vrot.lane.b32.xlu1 %v477_v16, %s415_s22  ;;  %v581_v47 = vmax.bf16 %v56_v45, %v54_v44  ;;  %v68_v49 = vld [vmem:[%s1079_s0 + $0xec] sm:$0x1]  ;;  %v62_v50 = vld [vmem:[%s1079_s0 + $0xd4] sm:$0x1]  ;;  %v64_v51 = vld [vmem:[%s1079_s0 + $0xdc] sm:$0x1] }
   0xd   :  { %161 = vrot.lane.b32.xlu0 %v481_v17, %s415_s22  ;;  %v597_v52 = vmax.bf16 %v68_v49, %v66_v48  ;;  %v601_v53 = vmax.bf16 %v64_v51, %v62_v50  ;;  %v74_v54 = vld [vmem:[%s1079_s0 + $0x104] sm:$0x1]  ;;  %v76_v55 = vld [vmem:[%s1079_s0 + $0x10c] sm:$0x1]  ;;  %v70_v56 = vld [vmem:[%s1079_s0 + $0xf4] sm:$0x1] }
   0xe   :  { %v72_v57 = vld [vmem:[%s1079_s0 + $0xfc] sm:$0x1]  ;;  %v617_v58 = vmax.bf16 %v76_v55, %v74_v54  ;;  %v21_v60 = vld [vmem:[%s1079_s0 + $0x30] sm:$0xf]  ;;  %v23_v61 = vld [vmem:[%s1079_s0 + $0x38] sm:$0xf] }
   0xf   :  { %v621_v59 = vmax.bf16 %v72_v57, %v70_v56  ;;  %v78_v62 = vld [vmem:[%s1079_s0 + $0x114] sm:$0x1]  ;;  %v80_v63 = vld [vmem:[%s1079_s0 + $0x11c] sm:$0x1]  ;;  %v637_v0 = vmax.bf16 %v23_v61, %v21_v60  ;;  %v29_v2 = vld [vmem:[%s1079_s0 + $0x50] sm:$0xf] }
  0x10   :  { %171 = vrot.lane.b32.xlu1 %v497_v22, %s415_s22  ;;  %v641_v1 = vmax.bf16 %v80_v63, %v78_v62  ;;  %v31_v4 = vld [vmem:[%s1079_s0 + $0x58] sm:$0xf]  ;;  %v25_v5 = vld [vmem:[%s1079_s0 + $0x40] sm:$0xf]  ;;  %v27_v6 = vld [vmem:[%s1079_s0 + $0x48] sm:$0xf] }
  0x11   :  { %167 = vrot.lane.b32.xlu0 %v501_v23, %s415_s22  ;;  %v657_v8 = vmax.bf16 %v31_v4, %v29_v2  ;;  %v661_v9 = vmax.bf16 %v27_v6, %v25_v5  ;;  %v37_v12 = vld [vmem:[%s1079_s0 + $0x70] sm:$0xf]  ;;  %v39_v13 = vld [vmem:[%s1079_s0 + $0x78] sm:$0xf]  ;;  %v33_v14 = vld [vmem:[%s1079_s0 + $0x60] sm:$0xf] }
  0x12   :  { %v35_v15 = vld [vmem:[%s1079_s0 + $0x68] sm:$0xf]  ;;  %v677_v18 = vmax.bf16 %v39_v13, %v37_v12  ;;  %v45_v20 = vld [vmem:[%s1079_s0 + $0x90] sm:$0xf]  ;;  %v47_v21 = vld [vmem:[%s1079_s0 + $0x98] sm:$0xf] }
  0x13   :  { %v681_v19 = vmax.bf16 %v35_v15, %v33_v14  ;;  %v41_v24 = vld [vmem:[%s1079_s0 + $0x80] sm:$0xf]  ;;  %v43_v25 = vld [vmem:[%s1079_s0 + $0x88] sm:$0xf]  ;;  %v697_v26 = vmax.bf16 %v47_v21, %v45_v20  ;;  %v53_v30 = vld [vmem:[%s1079_s0 + $0xb0] sm:$0xf] }
  0x14   :  { %179 = vrot.lane.b32.xlu1 %v517_v28, %s415_s22  ;;  %v701_v27 = vmax.bf16 %v43_v25, %v41_v24  ;;  %v55_v31 = vld [vmem:[%s1079_s0 + $0xb8] sm:$0xf]  ;;  %v49_v32 = vld [vmem:[%s1079_s0 + $0xa0] sm:$0xf]  ;;  %v51_v33 = vld [vmem:[%s1079_s0 + $0xa8] sm:$0xf] }
  0x15   :  { %175 = vrot.lane.b32.xlu0 %v521_v29, %s415_s22  ;;  %v717_v36 = vmax.bf16 %v55_v31, %v53_v30  ;;  %v721_v37 = vmax.bf16 %v51_v33, %v49_v32  ;;  %v61_v38 = vld [vmem:[%s1079_s0 + $0xd0] sm:$0xf]  ;;  %v63_v39 = vld [vmem:[%s1079_s0 + $0xd8] sm:$0xf]  ;;  %v57_v42 = vld [vmem:[%s1079_s0 + $0xc0] sm:$0xf] }
  0x16   :  { %v59_v43 = vld [vmem:[%s1079_s0 + $0xc8] sm:$0xf]  ;;  %v737_v44 = vmax.bf16 %v63_v39, %v61_v38  ;;  %v69_v48 = vld [vmem:[%s1079_s0 + $0xf0] sm:$0xf]  ;;  %v71_v49 = vld [vmem:[%s1079_s0 + $0xf8] sm:$0xf] }
  0x17   :  { %v741_v45 = vmax.bf16 %v59_v43, %v57_v42  ;;  %v65_v50 = vld [vmem:[%s1079_s0 + $0xe0] sm:$0xf]  ;;  %v67_v51 = vld [vmem:[%s1079_s0 + $0xe8] sm:$0xf]  ;;  %v757_v54 = vmax.bf16 %v71_v49, %v69_v48  ;;  %v77_v56 = vld [vmem:[%s1079_s0 + $0x110] sm:$0xf] }
  0x18   :  { %187 = vrot.lane.b32.xlu1 %v537_v34, %s415_s22  ;;  %v761_v55 = vmax.bf16 %v67_v51, %v65_v50  ;;  %v79_v57 = vld [vmem:[%s1079_s0 + $0x118] sm:$0xf]  ;;  %v73_v60 = vld [vmem:[%s1079_s0 + $0x100] sm:$0xf]  ;;  %v75_v61 = vld [vmem:[%s1079_s0 + $0x108] sm:$0xf] }
  0x19   :  { %183 = vrot.lane.b32.xlu0 %v541_v35, %s415_s22  ;;  %v777_v62 = vmax.bf16 %v79_v57, %v77_v56  ;;  %v781_v63 = vmax.bf16 %v75_v61, %v73_v60  ;;  %v416_v12 = vmov 0   ;;  %vm800_vm3 = vmand %vm335_vm1, %vm336_vm2  ;;  %v342_v21 = vld [vmem:[%s1080_s1 + $0xc] sm:$0x1]  ;;  %v346_v39 = vld [vmem:[%s1080_s1 + $0x14] sm:$0x1] }
  0x1c   :  { %195 = vrot.lane.b32.xlu1 %v557_v40, %s415_s22 }
  0x1d   :  { %191 = vrot.lane.b32.xlu0 %v561_v41, %s415_s22 }
  0x20   :  { %203 = vrot.lane.b32.xlu1 %v577_v46, %s415_s22 }
  0x21   :  { %199 = vrot.lane.b32.xlu0 %v581_v47, %s415_s22 }
  0x24   :  { %211 = vrot.lane.b32.xlu1 %v597_v52, %s415_s22 }
  0x25   :  { %207 = vrot.lane.b32.xlu0 %v601_v53, %s415_s22 }
  0x28   :  { %219 = vrot.lane.b32.xlu1 %v617_v58, %s415_s22 }
  0x29   :  { %215 = vrot.lane.b32.xlu0 %v621_v59, %s415_s22 }
  0x2c   :  { %165 = vrot.lane.b32.xlu1 %v637_v0, %s415_s22 }
  0x2d   :  { %223 = vrot.lane.b32.xlu0 %v641_v1, %s415_s22 }
  0x30   :  { %173 = vrot.lane.b32.xlu1 %v657_v8, %s415_s22 }
  0x31   :  { %169 = vrot.lane.b32.xlu0 %v661_v9, %s415_s22 }
  0x34   :  { %181 = vrot.lane.b32.xlu1 %v677_v18, %s415_s22 }
  0x35   :  { %177 = vrot.lane.b32.xlu0 %v681_v19, %s415_s22 }
  0x38   :  { %189 = vrot.lane.b32.xlu1 %v697_v26, %s415_s22 }
  0x39   :  { %185 = vrot.lane.b32.xlu0 %v701_v27, %s415_s22 }
  0x3c   :  { %197 = vrot.lane.b32.xlu1 %v717_v36, %s415_s22 }
  0x3d   :  { %193 = vrot.lane.b32.xlu0 %v721_v37, %s415_s22 }
  0x40   :  { %205 = vrot.lane.b32.xlu1 %v737_v44, %s415_s22 }
  0x41   :  { %201 = vrot.lane.b32.xlu0 %v741_v45, %s415_s22 }
  0x44   :  { %213 = vrot.lane.b32.xlu1 %v757_v54, %s415_s22 }
  0x45   :  { %209 = vrot.lane.b32.xlu0 %v761_v55, %s415_s22 }
  0x48   :  { %221 = vrot.lane.b32.xlu1 %v777_v62, %s415_s22 }
  0x49   :  { %217 = vrot.lane.b32.xlu0 %v781_v63, %s415_s22 }
  0x76   :  { %v158_v2 = vpop.permute.xlu1 %157 }
  0x77   :  { %v263_v4 = vmax.bf16 %v158_v2, %v436_v3  ;;  %v154_v5 = vpop.permute.xlu0 %153 }
  0x78   :  { %v261_v6 = vmax.bf16 %v154_v5, %v447_v7 }
  0x79   :  { %v299_v13 = vmax.bf16 %v416_v12, %v263_v4 }
  0x7a   :  { %v297_v14 = vmax.bf16 %v416_v12, %v261_v6  ;;  %v160_v15 = vpop.permute.xlu1 %159  ;;  %v362_v6 = vld [vmem:[%s1080_s1 + $0x34] sm:$0x1] }
  0x7b   :  { %341 = vst.msk [vmem:[%s1080_s1 + $0x8] sm:$0xf] %vm333_vm0, %v299_v13  ;;  %v264_v20 = vmax.bf16 %v160_v15, %v457_v10  ;;  %v156_v3 = vpop.permute.xlu0 %155  ;;  %v338_v10 = vld [vmem:[%s1080_s1 + $0x4] sm:$0x1] }
  0x7c   :  { %334 = vst.msk [vmem:[%s1080_s1] sm:$0xf] %vm333_vm0, %v297_v14  ;;  %v262_v24 = vmax.bf16 %v156_v3, %v461_v11  ;;  %v358_v14 = vld [vmem:[%s1080_s1 + $0x2c] sm:$0x1] }
  0x7d   :  { %v300_v25 = vmax.bf16 %v416_v12, %v264_v20 }
  0x7e   :  { %v298_v30 = vmax.bf16 %v416_v12, %v262_v24  ;;  %v164_v31 = vpop.permute.xlu1 %163 }
  0x7f   :  { %v343_v32 = vsel %vm800_vm3, %v300_v25, %v342_v21  ;;  %v266_v33 = vmax.bf16 %v164_v31, %v477_v16  ;;  %v162_v38 = vpop.permute.xlu0 %161  ;;  %v370_v25 = vld [vmem:[%s1080_s1 + $0x44] sm:$0x1] }
  0x80   :  { %344 = vst [vmem:[%s1080_s1 + $0xc] sm:$0x1] %v343_v32  ;;  %v339_v11 = vsel %vm800_vm3, %v298_v30, %v338_v10  ;;  %v265_v42 = vmax.bf16 %v162_v38, %v481_v17  ;;  %v354_v17 = vld [vmem:[%s1080_s1 + $0x24] sm:$0x1]  ;;  %v366_v30 = vld [vmem:[%s1080_s1 + $0x3c] sm:$0x1] }
  0x81   :  { %340 = vst [vmem:[%s1080_s1 + $0x4] sm:$0x1] %v339_v11  ;;  %v302_v16 = vmax.bf16 %v416_v12, %v266_v33 }
  0x82   :  { %v301_v43 = vmax.bf16 %v416_v12, %v265_v42  ;;  %v172_v48 = vpop.permute.xlu1 %171 }
  0x83   :  { %v347_v49 = vsel %vm800_vm3, %v302_v16, %v346_v39  ;;  %v270_v50 = vmax.bf16 %v172_v48, %v497_v22  ;;  %v168_v51 = vpop.permute.xlu0 %167  ;;  %v350_v22 = vld [vmem:[%s1080_s1 + $0x1c] sm:$0x1]  ;;  %v378_v39 = vld [vmem:[%s1080_s1 + $0x54] sm:$0x1]  ;;  %v374_v16 = vld [vmem:[%s1080_s1 + $0x4c] sm:$0x1] }
  0x84   :  { %348 = vst [vmem:[%s1080_s1 + $0x14] sm:$0x1] %v347_v49  ;;  %345 = vst.msk [vmem:[%s1080_s1 + $0x10] sm:$0xf] %vm333_vm0, %v301_v43  ;;  %v268_v56 = vmax.bf16 %v168_v51, %v501_v23 }
  0x85   :  { %v306_v57 = vmax.bf16 %v416_v12, %v270_v50 }
  0x86   :  { %v304_v60 = vmax.bf16 %v416_v12, %v268_v56  ;;  %v180_v61 = vpop.permute.xlu1 %179 }
  0x87   :  { %v355_v2 = vsel %vm800_vm3, %v306_v57, %v354_v17  ;;  %v274_v4 = vmax.bf16 %v180_v61, %v517_v28  ;;  %v176_v5 = vpop.permute.xlu0 %175  ;;  %v386_v17 = vld [vmem:[%s1080_s1 + $0x64] sm:$0x1]  ;;  %v382_v57 = vld [vmem:[%s1080_s1 + $0x5c] sm:$0x1] }
  0x88   :  { %356 = vst [vmem:[%s1080_s1 + $0x24] sm:$0x1] %v355_v2  ;;  %v351_v23 = vsel %vm800_vm3, %v304_v60, %v350_v22  ;;  %v272_v13 = vmax.bf16 %v176_v5, %v521_v29  ;;  %v394_v5 = vld [vmem:[%s1080_s1 + $0x74] sm:$0x1] }
  0x89   :  { %352 = vst [vmem:[%s1080_s1 + $0x1c] sm:$0x1] %v351_v23  ;;  %v310_v28 = vmax.bf16 %v416_v12, %v274_v4 }
  0x8a   :  { %v308_v15 = vmax.bf16 %v416_v12, %v272_v13  ;;  %v188_v20 = vpop.permute.xlu1 %187 }
  0x8b   :  { %v363_v3 = vsel %vm800_vm3, %v310_v28, %v362_v6  ;;  %v278_v21 = vmax.bf16 %v188_v20, %v537_v34  ;;  %v184_v24 = vpop.permute.xlu0 %183  ;;  %v390_v6 = vld [vmem:[%s1080_s1 + $0x6c] sm:$0x1] }
  0x8c   :  { %364 = vst [vmem:[%s1080_s1 + $0x34] sm:$0x1] %v363_v3  ;;  %v359_v29 = vsel %vm800_vm3, %v308_v15, %v358_v14  ;;  %v276_v10 = vmax.bf16 %v184_v24, %v541_v35  ;;  %v402_v3 = vld [vmem:[%s1080_s1 + $0x84] sm:$0x1]  ;;  %v398_v24 = vld [vmem:[%s1080_s1 + $0x7c] sm:$0x1] }
  0x8d   :  { %360 = vst [vmem:[%s1080_s1 + $0x2c] sm:$0x1] %v359_v29  ;;  %v314_v34 = vmax.bf16 %v416_v12, %v278_v21 }
  0x8e   :  { %v312_v31 = vmax.bf16 %v416_v12, %v276_v10  ;;  %v196_v32 = vpop.permute.xlu1 %195 }
  0x8f   :  { %v371_v33 = vsel %vm800_vm3, %v314_v34, %v370_v25  ;;  %v282_v38 = vmax.bf16 %v196_v32, %v557_v40  ;;  %v192_v11 = vpop.permute.xlu0 %191 }
  0x90   :  { %372 = vst [vmem:[%s1080_s1 + $0x44] sm:$0x1] %v371_v33  ;;  %v367_v35 = vsel %vm800_vm3, %v312_v31, %v366_v30  ;;  %v280_v42 = vmax.bf16 %v192_v11, %v561_v41 }
  0x91   :  { %368 = vst [vmem:[%s1080_s1 + $0x3c] sm:$0x1] %v367_v35  ;;  %v318_v40 = vmax.bf16 %v416_v12, %v282_v38 }
  0x92   :  { %v316_v43 = vmax.bf16 %v416_v12, %v280_v42  ;;  %v204_v48 = vpop.permute.xlu1 %203 }
  0x93   :  { %v379_v49 = vsel %vm800_vm3, %v318_v40, %v378_v39  ;;  %v286_v50 = vmax.bf16 %v204_v48, %v577_v46  ;;  %v200_v51 = vpop.permute.xlu0 %199 }
  0x94   :  { %380 = vst [vmem:[%s1080_s1 + $0x54] sm:$0x1] %v379_v49  ;;  %v375_v41 = vsel %vm800_vm3, %v316_v43, %v374_v16  ;;  %v284_v56 = vmax.bf16 %v200_v51, %v581_v47 }
  0x95   :  { %376 = vst [vmem:[%s1080_s1 + $0x4c] sm:$0x1] %v375_v41  ;;  %v322_v46 = vmax.bf16 %v416_v12, %v286_v50 }
  0x96   :  { %v320_v22 = vmax.bf16 %v416_v12, %v284_v56  ;;  %v212_v60 = vpop.permute.xlu1 %211 }
  0x97   :  { %v387_v61 = vsel %vm800_vm3, %v322_v46, %v386_v17  ;;  %v290_v2 = vmax.bf16 %v212_v60, %v597_v52  ;;  %v208_v4 = vpop.permute.xlu0 %207 }
  0x98   :  { %388 = vst [vmem:[%s1080_s1 + $0x64] sm:$0x1] %v387_v61  ;;  %v383_v47 = vsel %vm800_vm3, %v320_v22, %v382_v57  ;;  %v288_v23 = vmax.bf16 %v208_v4, %v601_v53 }
  0x99   :  { %384 = vst [vmem:[%s1080_s1 + $0x5c] sm:$0x1] %v383_v47  ;;  %v326_v52 = vmax.bf16 %v416_v12, %v290_v2 }
  0x9a   :  { %v324_v13 = vmax.bf16 %v416_v12, %v288_v23  ;;  %v220_v28 = vpop.permute.xlu1 %219 }
  0x9b   :  { %v395_v14 = vsel %vm800_vm3, %v326_v52, %v394_v5  ;;  %v294_v15 = vmax.bf16 %v220_v28, %v617_v58  ;;  %v216_v20 = vpop.permute.xlu0 %215 }
  0x9c   :  { %396 = vst [vmem:[%s1080_s1 + $0x74] sm:$0x1] %v395_v14  ;;  %v391_v53 = vsel %vm800_vm3, %v324_v13, %v390_v6  ;;  %v292_v21 = vmax.bf16 %v216_v20, %v621_v59 }
  0x9d   :  { %392 = vst [vmem:[%s1080_s1 + $0x6c] sm:$0x1] %v391_v53  ;;  %v330_v58 = vmax.bf16 %v416_v12, %v294_v15 }
  0x9e   :  { %v328_v29 = vmax.bf16 %v416_v12, %v292_v21  ;;  %v166_v25 = vpop.permute.xlu1 %165 }
  0x9f   :  { %v403_v10 = vsel %vm800_vm3, %v330_v58, %v402_v3  ;;  %v267_v34 = vmax.bf16 %v166_v25, %v637_v0  ;;  %v224_v30 = vpop.permute.xlu0 %223  ;;  %v406_v0 = vld [vmem:[%s1080_s1 + $0x8c] sm:$0x1] }
  0xa0   :  { %404 = vst [vmem:[%s1080_s1 + $0x84] sm:$0x1] %v403_v10  ;;  %v399_v59 = vsel %vm800_vm3, %v328_v29, %v398_v24  ;;  %v296_v31 = vmax.bf16 %v224_v30, %v641_v1 }
  0xa1   :  { %400 = vst [vmem:[%s1080_s1 + $0x7c] sm:$0x1] %v399_v59  ;;  %v303_v32 = vmax.bf16 %v416_v12, %v267_v34 }
  0xa2   :  { %v332_v33 = vmax.bf16 %v416_v12, %v296_v31  ;;  %v174_v38 = vpop.permute.xlu1 %173 }
  0xa3   :  { %349 = vst.msk [vmem:[%s1080_s1 + $0x18] sm:$0xf] %vm333_vm0, %v303_v32  ;;  %v271_v1 = vmax.bf16 %v174_v38, %v657_v8  ;;  %v170_v11 = vpop.permute.xlu0 %169 }
  0xa4   :  { %v407_v35 = vsel %vm800_vm3, %v332_v33, %v406_v0  ;;  %v269_v39 = vmax.bf16 %v170_v11, %v661_v9 }
  0xa5   :  { %408 = vst [vmem:[%s1080_s1 + $0x8c] sm:$0x1] %v407_v35  ;;  %v307_v42 = vmax.bf16 %v416_v12, %v271_v1 }
  0xa6   :  { %v305_v40 = vmax.bf16 %v416_v12, %v269_v39  ;;  %v182_v16 = vpop.permute.xlu1 %181 }
  0xa7   :  { %357 = vst.msk [vmem:[%s1080_s1 + $0x28] sm:$0xf] %vm333_vm0, %v307_v42  ;;  %v275_v8 = vmax.bf16 %v182_v16, %v677_v18  ;;  %v178_v7 = vpop.permute.xlu0 %177 }
  0xa8   :  { %353 = vst.msk [vmem:[%s1080_s1 + $0x20] sm:$0xf] %vm333_vm0, %v305_v40  ;;  %v273_v9 = vmax.bf16 %v178_v7, %v681_v19 }
  0xa9   :  { %v311_v43 = vmax.bf16 %v416_v12, %v275_v8 }
  0xaa   :  { %v309_v48 = vmax.bf16 %v416_v12, %v273_v9  ;;  %v190_v49 = vpop.permute.xlu1 %189 }
  0xab   :  { %365 = vst.msk [vmem:[%s1080_s1 + $0x38] sm:$0xf] %vm333_vm0, %v311_v43  ;;  %v279_v18 = vmax.bf16 %v190_v49, %v697_v26  ;;  %v186_v50 = vpop.permute.xlu0 %185 }
  0xac   :  { %361 = vst.msk [vmem:[%s1080_s1 + $0x30] sm:$0xf] %vm333_vm0, %v309_v48  ;;  %v277_v19 = vmax.bf16 %v186_v50, %v701_v27 }
  0xad   :  { %v315_v51 = vmax.bf16 %v416_v12, %v279_v18 }
  0xae   :  { %v313_v41 = vmax.bf16 %v416_v12, %v277_v19  ;;  %v198_v17 = vpop.permute.xlu1 %197 }
  0xaf   :  { %373 = vst.msk [vmem:[%s1080_s1 + $0x48] sm:$0xf] %vm333_vm0, %v315_v51  ;;  %v283_v26 = vmax.bf16 %v198_v17, %v717_v36  ;;  %v194_v56 = vpop.permute.xlu0 %193 }
  0xb0   :  { %369 = vst.msk [vmem:[%s1080_s1 + $0x40] sm:$0xf] %vm333_vm0, %v313_v41  ;;  %v281_v27 = vmax.bf16 %v194_v56, %v721_v37 }
  0xb1   :  { %v319_v46 = vmax.bf16 %v416_v12, %v283_v26 }
  0xb2   :  { %v317_v57 = vmax.bf16 %v416_v12, %v281_v27  ;;  %v206_v22 = vpop.permute.xlu1 %205 }
  0xb3   :  { %381 = vst.msk [vmem:[%s1080_s1 + $0x58] sm:$0xf] %vm333_vm0, %v319_v46  ;;  %v287_v36 = vmax.bf16 %v206_v22, %v737_v44  ;;  %v202_v60 = vpop.permute.xlu0 %201 }
  0xb4   :  { %377 = vst.msk [vmem:[%s1080_s1 + $0x50] sm:$0xf] %vm333_vm0, %v317_v57  ;;  %v285_v37 = vmax.bf16 %v202_v60, %v741_v45 }
  0xb5   :  { %v323_v61 = vmax.bf16 %v416_v12, %v287_v36 }
  0xb6   :  { %v321_v2 = vmax.bf16 %v416_v12, %v285_v37  ;;  %v214_v4 = vpop.permute.xlu1 %213 }
  0xb7   :  { %389 = vst.msk [vmem:[%s1080_s1 + $0x68] sm:$0xf] %vm333_vm0, %v323_v61  ;;  %v291_v44 = vmax.bf16 %v214_v4, %v757_v54  ;;  %v210_v47 = vpop.permute.xlu0 %209 }
  0xb8   :  { %385 = vst.msk [vmem:[%s1080_s1 + $0x60] sm:$0xf] %vm333_vm0, %v321_v2  ;;  %v289_v45 = vmax.bf16 %v210_v47, %v761_v55 }
  0xb9   :  { %v327_v5 = vmax.bf16 %v416_v12, %v291_v44 }
  0xba   :  { %v325_v23 = vmax.bf16 %v416_v12, %v289_v45  ;;  %v222_v52 = vpop.permute.xlu1 %221 }
  0xbb   :  { %397 = vst.msk [vmem:[%s1080_s1 + $0x78] sm:$0xf] %vm333_vm0, %v327_v5  ;;  %v295_v54 = vmax.bf16 %v222_v52, %v777_v62  ;;  %v218_v6 = vpop.permute.xlu0 %217 }
  0xbc   :  { %393 = vst.msk [vmem:[%s1080_s1 + $0x70] sm:$0xf] %vm333_vm0, %v325_v23  ;;  %v293_v55 = vmax.bf16 %v218_v6, %v781_v63 }
  0xbd   :  { %v331_v13 = vmax.bf16 %v416_v12, %v295_v54 }
  0xbe   :  { %v329_v28 = vmax.bf16 %v416_v12, %v293_v55 }
  0xbf   :  { %405 = vst.msk [vmem:[%s1080_s1 + $0x88] sm:$0xf] %vm333_vm0, %v331_v13 }
  0xc0   :  { %401 = vst.msk [vmem:[%s1080_s1 + $0x80] sm:$0xf] %vm333_vm0, %v329_v28 }

// kernel: convnn_forward.8
= control target key start
LH: loop header
LB: loop body
LE: loop exit
PB: predicated region body
PF: predicated region fallthrough
CT: control target
= control target key end

     0   :  { %vm605_vm0 = vcmask 1044480   ;;  %vm606_vm1 = vcmask 1045504   ;;  %v2227_v0 = vmov 0.0   ;;  %v2228_v2 = vmov 65535   ;;  %s3164_s1 = inlined_call_operand.vmem [shape: bf16[27,16], index: 1, kind: input, shape index: {}]   ;;  %s3165_s0 = inlined_call_operand.vmem [shape: bf16[648,27], index: 0, kind: input, shape index: {}]   ;;  %s3166_s2 = inlined_call_operand.vmem [shape: f32[1,16], index: 2, kind: input, shape index: {}]   ;;  %s3167_s3 = inlined_call_operand.vmem [shape: bf16[648,16], index: 3, kind: output, shape index: {}]  }
   0x1   :  { %2008 = vmatprep.subr.bf16.mxu0 %v2227_v0  ;;  %v2183_v1 = vld [vmem:[%s3164_s1] sm:$0xff]   ;;  %v607_v3 = vsel %vm605_vm0, 4294967295, %v2228_v2  ;;  %2176 = vmatprep.subr.bf16.mxu1 %v2227_v0  ;;  %v2184_v4 = vld [vmem:[%s3164_s1 + $0x8] sm:$0x3f]   ;;  %vm2229_vm2 = vmmov 0   ;;  %vm481_vm3 = vcmask 220160  }
   0x2   :  { %2009 = vmatpush3.bf16.msra.mxu0 %v2183_v1  ;;  %v608_v5 = vsel %vm606_vm1, %v607_v3, 0  ;;  %2178 = vmatpush3.bf16.msra.mxu1 %v2183_v1  ;;  %v2185_v7 = vld [vmem:[%s3165_s0] sm:$0xff]   ;;  %v2186_v8 = vld [vmem:[%s3165_s0 + $0xa8] sm:$0xff]   ;;  %v2188_v10 = vld [vmem:[%s3165_s0 + $0xb0] sm:$0xff]   ;;  %vm19_vm4 = vcmask 130048   ;;  %vm1632_vm5 = vcmask 125952  }
   0x3   :  { %2010 = vmatprep.subr.bf16.mxu0 %v2227_v0  ;;  %v610_v6 = vand.u32 %v2184_v4, %v608_v5  ;;  %2012 = vmatprep.mubr.msk.bf16.mxu0 %vm2229_vm2, %v2227_v0  ;;  %v2187_v9 = vld [vmem:[%s3165_s0 + $0x8] sm:$0xff]   ;;  %v2189_v11 = vld [vmem:[%s3165_s0 + $0x10] sm:$0xff]   ;;  %v2190_v12 = vld [vmem:[%s3165_s0 + $0xb8] sm:$0xff]   ;;  %20 = vst.msk [vmem:[#allocation2] sm:$0xff] %vm19_vm4, %v2227_v0 }
   0x4   :  { %2177 = vmatprep.subr.bf16.mxu1 %v2227_v0  ;;  %2096 = vmatprep.mubr.msk.bf16.mxu1 %vm2229_vm2, %v2227_v0  ;;  %v2191_v13 = vld [vmem:[%s3165_s0 + $0x18] sm:$0xff]   ;;  %v2192_v14 = vld [vmem:[%s3165_s0 + $0xc0] sm:$0xff]   ;;  %v2194_v16 = vld [vmem:[%s3165_s0 + $0xc8] sm:$0xff]   ;;  %21 = vst.msk [vmem:[#allocation2 + $0x8] sm:$0xff] %vm19_vm4, %v2227_v0 }
   0x5   :  { %v2193_v15 = vld [vmem:[%s3165_s0 + $0x20] sm:$0xff]   ;;  %22 = vst.msk [vmem:[#allocation2 + $0x10] sm:$0xff] %vm19_vm4, %v2227_v0  ;;  %23 = vst.msk [vmem:[#allocation2 + $0x18] sm:$0xff] %vm19_vm4, %v2227_v0  ;;  %v2195_v17 = vld [vmem:[%s3165_s0 + $0x28] sm:$0xff]  }
   0x6   :  { %2011 = vmatpush3.bf16.msra.mxu0 %v610_v6  ;;  %2179 = vmatpush3.bf16.msra.mxu1 %v610_v6  ;;  %24 = vst.msk [vmem:[#allocation2 + $0x20] sm:$0xff] %vm19_vm4, %v2227_v0  ;;  %25 = vst.msk [vmem:[#allocation2 + $0x28] sm:$0xff] %vm19_vm4, %v2227_v0  ;;  %v2196_v18 = vld [vmem:[%s3165_s0 + $0xd0] sm:$0xff]   ;;  %v2198_v20 = vld [vmem:[%s3165_s0 + $0xd8] sm:$0xff]  }
   0x7   :  { %26 = vst.msk [vmem:[#allocation2 + $0x30] sm:$0xff] %vm19_vm4, %v2227_v0  ;;  %27 = vst.msk [vmem:[#allocation2 + $0x38] sm:$0xff] %vm19_vm4, %v2227_v0  ;;  %v2197_v19 = vld [vmem:[%s3165_s0 + $0x30] sm:$0xff]   ;;  %v2199_v21 = vld [vmem:[%s3165_s0 + $0x38] sm:$0xff]  }
   0x8   :  { %28 = vst.msk [vmem:[#allocation2 + $0x40] sm:$0xff] %vm19_vm4, %v2227_v0  ;;  %29 = vst.msk [vmem:[#allocation2 + $0x48] sm:$0xff] %vm19_vm4, %v2227_v0  ;;  %v2200_v22 = vld [vmem:[%s3165_s0 + $0xe0] sm:$0xff]   ;;  %v2202_v24 = vld [vmem:[%s3165_s0 + $0xe8] sm:$0xff]  }
   0x9   :  { %2013 = vmatmul.mubr.msk.bf16.vlgmr.msra.gmra.mrb[0].mxu0 %vm481_vm3, %v2185_v7  ;;  %2097 = vmatmul.mubr.msk.bf16.vlgmr.msra.gmra.mrb[0].mxu1 %vm481_vm3, %v2186_v8  ;;  %30 = vst.msk [vmem:[#allocation2 + $0x50] sm:$0xff] %vm19_vm4, %v2227_v0  ;;  %31 = vst.msk [vmem:[#allocation2 + $0x58] sm:$0xff] %vm19_vm4, %v2227_v0  ;;  %v2201_v23 = vld [vmem:[%s3165_s0 + $0x40] sm:$0xff]   ;;  %v2203_v25 = vld [vmem:[%s3165_s0 + $0x48] sm:$0xff]  }
   0xa   :  { %2016 = vmatprep.mubr.msk.bf16.mxu0 %vm2229_vm2, %v2227_v0  ;;  %2100 = vmatprep.mubr.msk.bf16.mxu1 %vm2229_vm2, %v2227_v0  ;;  %32 = vst.msk [vmem:[#allocation2 + $0x60] sm:$0xff] %vm19_vm4, %v2227_v0  ;;  %33 = vst.msk [vmem:[#allocation2 + $0x68] sm:$0xff] %vm19_vm4, %v2227_v0  ;;  %v2204_v26 = vld [vmem:[%s3165_s0 + $0xf0] sm:$0xff]   ;;  %v2206_v28 = vld [vmem:[%s3165_s0 + $0xf8] sm:$0xff]  }
   0xb   :  { %34 = vst.msk [vmem:[#allocation2 + $0x70] sm:$0xff] %vm19_vm4, %v2227_v0  ;;  %35 = vst.msk [vmem:[#allocation2 + $0x78] sm:$0xff] %vm19_vm4, %v2227_v0  ;;  %v2205_v27 = vld [vmem:[%s3165_s0 + $0x50] sm:$0xff]   ;;  %v2207_v29 = vld [vmem:[%s3165_s0 + $0x58] sm:$0xff]  }
   0xc   :  { %36 = vst.msk [vmem:[#allocation2 + $0x80] sm:$0xff] %vm19_vm4, %v2227_v0  ;;  %37 = vst.msk [vmem:[#allocation2 + $0x88] sm:$0xff] %vm19_vm4, %v2227_v0  ;;  %v2208_v30 = vld [vmem:[%s3165_s0 + $0x100] sm:$0xff]   ;;  %v2210_v32 = vld [vmem:[%s3165_s0 + $0x108] sm:$0xff]  }
   0xd   :  { %38 = vst.msk [vmem:[#allocation2 + $0x90] sm:$0xff] %vm19_vm4, %v2227_v0  ;;  %39 = vst.msk [vmem:[#allocation2 + $0x98] sm:$0xff] %vm19_vm4, %v2227_v0  ;;  %v2209_v31 = vld [vmem:[%s3165_s0 + $0x60] sm:$0xff]   ;;  %v2211_v33 = vld [vmem:[%s3165_s0 + $0x68] sm:$0xff]  }
   0xe   :  { %40 = vst.msk [vmem:[#allocation2 + $0xa0] sm:$0xff] %vm19_vm4, %v2227_v0  ;;  %41 = vst.msk [vmem:[#allocation2 + $0xa8] sm:$0xff] %vm19_vm4, %v2227_v0  ;;  %v2212_v34 = vld [vmem:[%s3165_s0 + $0x110] sm:$0xff]   ;;  %v2214_v36 = vld [vmem:[%s3165_s0 + $0x118] sm:$0xff]  }
   0xf   :  { %42 = vst.msk [vmem:[#allocation2 + $0xb0] sm:$0xff] %vm19_vm4, %v2227_v0  ;;  %43 = vst.msk [vmem:[#allocation2 + $0xb8] sm:$0xff] %vm19_vm4, %v2227_v0  ;;  %v2213_v35 = vld [vmem:[%s3165_s0 + $0x70] sm:$0xff]   ;;  %v2215_v37 = vld [vmem:[%s3165_s0 + $0x78] sm:$0xff]  }
  0x10   :  { %44 = vst.msk [vmem:[#allocation2 + $0xc0] sm:$0xff] %vm19_vm4, %v2227_v0  ;;  %45 = vst.msk [vmem:[#allocation2 + $0xc8] sm:$0xff] %vm19_vm4, %v2227_v0  ;;  %v2216_v38 = vld [vmem:[%s3165_s0 + $0x120] sm:$0xff]   ;;  %v2218_v40 = vld [vmem:[%s3165_s0 + $0x128] sm:$0xff]  }
  0x11   :  { %2017 = vmatmul.mubr.msk.bf16.gmra.mrb[4].mxu0 %vm481_vm3, %v2187_v9  ;;  %2101 = vmatmul.mubr.msk.bf16.gmra.mrb[4].mxu1 %vm481_vm3, %v2188_v10  ;;  %46 = vst.msk [vmem:[#allocation2 + $0xd0] sm:$0xff] %vm19_vm4, %v2227_v0  ;;  %47 = vst.msk [vmem:[#allocation2 + $0xd8] sm:$0xff] %vm19_vm4, %v2227_v0  ;;  %v2217_v39 = vld [vmem:[%s3165_s0 + $0x80] sm:$0xff]   ;;  %v2219_v41 = vld [vmem:[%s3165_s0 + $0x88] sm:$0xff]  }
  0x12   :  { %2020 = vmatprep.mubr.msk.bf16.mxu0 %vm2229_vm2, %v2227_v0  ;;  %2104 = vmatprep.mubr.msk.bf16.mxu1 %vm2229_vm2, %v2227_v0  ;;  %48 = vst.msk [vmem:[#allocation2 + $0xe0] sm:$0xff] %vm19_vm4, %v2227_v0  ;;  %49 = vst.msk [vmem:[#allocation2 + $0xe8] sm:$0xff] %vm19_vm4, %v2227_v0  ;;  %v2220_v42 = vld [vmem:[%s3165_s0 + $0x130] sm:$0xff]   ;;  %v2222_v44 = vld [vmem:[%s3165_s0 + $0x138] sm:$0xff]  }
  0x13   :  { %50 = vst.msk [vmem:[#allocation2 + $0xf0] sm:$0xff] %vm19_vm4, %v2227_v0  ;;  %51 = vst.msk [vmem:[#allocation2 + $0xf8] sm:$0xff] %vm19_vm4, %v2227_v0  ;;  %v2221_v43 = vld [vmem:[%s3165_s0 + $0x90] sm:$0xff]   ;;  %v2223_v45 = vld [vmem:[%s3165_s0 + $0x98] sm:$0xff]  }
  0x14   :  { %52 = vst.msk [vmem:[#allocation2 + $0x100] sm:$0xff] %vm19_vm4, %v2227_v0  ;;  %53 = vst.msk [vmem:[#allocation2 + $0x108] sm:$0xff] %vm19_vm4, %v2227_v0  ;;  %v2224_v46 = vld [vmem:[%s3165_s0 + $0x140] ss:$0 sps:$4 sm:$0xff]   ;;  %v102_v51 = vld [vmem:[#allocation2 + $0x8] sm:$0xff] }
  0x15   :  { %54 = vst.msk [vmem:[#allocation2 + $0x110] sm:$0xff] %vm19_vm4, %v2227_v0  ;;  %55 = vst.msk [vmem:[#allocation2 + $0x118] sm:$0xff] %vm19_vm4, %v2227_v0  ;;  %v2225_v47 = vld [vmem:[%s3165_s0 + $0xa0] sm:$0xff]   ;;  %v104_v4 = vld [vmem:[#allocation2 + $0x18] sm:$0xff] }
  0x16   :  { %56 = vst.msk [vmem:[#allocation2 + $0x120] sm:$0xff] %vm19_vm4, %v2227_v0  ;;  %57 = vst.msk [vmem:[#allocation2 + $0x128] sm:$0xff] %vm19_vm4, %v2227_v0  ;;  %v101_v48 = vld [vmem:[#allocation2] sm:$0xff] }
  0x17   :  { %58 = vst.msk [vmem:[#allocation2 + $0x130] sm:$0xff] %vm19_vm4, %v2227_v0  ;;  %59 = vst.msk [vmem:[#allocation2 + $0x138] sm:$0xff] %vm19_vm4, %v2227_v0  ;;  %v2675_v2 = vld [vmem:[%s3166_s2] ss:$0 sm:$0xff] }
  0x18   :  { %60 = vst.msk [vmem:[#allocation2 + $0x140] sm:$0xff] %vm19_vm4, %v2227_v0  ;;  %61 = vst.msk [vmem:[#allocation2 + $0x148] sm:$0xff] %vm19_vm4, %v2227_v0 }
  0x19   :  { %2021 = vmatmul.mubr.msk.bf16.gmra.mrb[8].mxu0 %vm481_vm3, %v2189_v11  ;;  %2105 = vmatmul.mubr.msk.bf16.gmra.mrb[8].mxu1 %vm481_vm3, %v2190_v12  ;;  %62 = vst.msk [vmem:[#allocation2 + $0x150] sm:$0xff] %vm19_vm4, %v2227_v0  ;;  %63 = vst.msk [vmem:[#allocation2 + $0x158] sm:$0xff] %vm19_vm4, %v2227_v0 }
  0x1a   :  { %2024 = vmatprep.mubr.msk.bf16.mxu0 %vm2229_vm2, %v2227_v0  ;;  %2108 = vmatprep.mubr.msk.bf16.mxu1 %vm2229_vm2, %v2227_v0  ;;  %64 = vst.msk [vmem:[#allocation2 + $0x160] sm:$0xff] %vm19_vm4, %v2227_v0  ;;  %65 = vst.msk [vmem:[#allocation2 + $0x168] sm:$0xff] %vm19_vm4, %v2227_v0 }
  0x1b   :  { %66 = vst.msk [vmem:[#allocation2 + $0x170] sm:$0xff] %vm19_vm4, %v2227_v0  ;;  %67 = vst.msk [vmem:[#allocation2 + $0x178] sm:$0xff] %vm19_vm4, %v2227_v0 }
  0x1c   :  { %68 = vst.msk [vmem:[#allocation2 + $0x180] sm:$0xff] %vm19_vm4, %v2227_v0  ;;  %69 = vst.msk [vmem:[#allocation2 + $0x188] sm:$0xff] %vm19_vm4, %v2227_v0 }
  0x1d   :  { %70 = vst.msk [vmem:[#allocation2 + $0x190] sm:$0xff] %vm19_vm4, %v2227_v0  ;;  %71 = vst.msk [vmem:[#allocation2 + $0x198] sm:$0xff] %vm19_vm4, %v2227_v0 }
  0x1e   :  { %72 = vst.msk [vmem:[#allocation2 + $0x1a0] sm:$0xff] %vm19_vm4, %v2227_v0  ;;  %73 = vst.msk [vmem:[#allocation2 + $0x1a8] sm:$0xff] %vm19_vm4, %v2227_v0 }
  0x1f   :  { %74 = vst.msk [vmem:[#allocation2 + $0x1b0] sm:$0xff] %vm19_vm4, %v2227_v0  ;;  %75 = vst.msk [vmem:[#allocation2 + $0x1b8] sm:$0xff] %vm19_vm4, %v2227_v0 }
  0x20   :  { %76 = vst.msk [vmem:[#allocation2 + $0x1c0] sm:$0xff] %vm19_vm4, %v2227_v0  ;;  %77 = vst.msk [vmem:[#allocation2 + $0x1c8] sm:$0xff] %vm19_vm4, %v2227_v0  ;;  %v143_v49 = vld [vmem:[#allocation2 + $0x150] sm:$0xff]  ;;  %v144_v53 = vld [vmem:[#allocation2 + $0x158] sm:$0xff] }
  0x21   :  { %2025 = vmatmul.mubr.msk.bf16.gmra.mrb[12].mxu0 %vm481_vm3, %v2191_v13  ;;  %2109 = vmatmul.mubr.msk.bf16.gmra.mrb[12].mxu1 %vm481_vm3, %v2192_v14  ;;  %78 = vst.msk [vmem:[#allocation2 + $0x1d0] sm:$0xff] %vm19_vm4, %v2227_v0  ;;  %79 = vst.msk [vmem:[#allocation2 + $0x1d8] sm:$0xff] %vm19_vm4, %v2227_v0  ;;  %v145_v1 = vld [vmem:[#allocation2 + $0x160] sm:$0xff]  ;;  %v146_v6 = vld [vmem:[#allocation2 + $0x168] sm:$0xff] }
  0x22   :  { %2028 = vmatprep.mubr.msk.bf16.mxu0 %vm2229_vm2, %v2227_v0  ;;  %2112 = vmatprep.mubr.msk.bf16.mxu1 %vm2229_vm2, %v2227_v0  ;;  %80 = vst.msk [vmem:[#allocation2 + $0x1e0] sm:$0xff] %vm19_vm4, %v2227_v0  ;;  %81 = vst.msk [vmem:[#allocation2 + $0x1e8] sm:$0xff] %vm19_vm4, %v2227_v0 }
  0x23   :  { %82 = vst.msk [vmem:[#allocation2 + $0x1f0] sm:$0xff] %vm19_vm4, %v2227_v0  ;;  %83 = vst.msk [vmem:[#allocation2 + $0x1f8] sm:$0xff] %vm19_vm4, %v2227_v0 }
  0x24   :  { %84 = vst.msk [vmem:[#allocation2 + $0x200] sm:$0xff] %vm19_vm4, %v2227_v0  ;;  %85 = vst.msk [vmem:[#allocation2 + $0x208] sm:$0xff] %vm19_vm4, %v2227_v0 }
  0x25   :  { %86 = vst.msk [vmem:[#allocation2 + $0x210] sm:$0xff] %vm19_vm4, %v2227_v0  ;;  %87 = vst.msk [vmem:[#allocation2 + $0x218] sm:$0xff] %vm19_vm4, %v2227_v0 }
  0x26   :  { %88 = vst.msk [vmem:[#allocation2 + $0x220] sm:$0xff] %vm19_vm4, %v2227_v0  ;;  %89 = vst.msk [vmem:[#allocation2 + $0x228] sm:$0xff] %vm19_vm4, %v2227_v0 }
  0x27   :  { %90 = vst.msk [vmem:[#allocation2 + $0x230] sm:$0xff] %vm19_vm4, %v2227_v0  ;;  %91 = vst.msk [vmem:[#allocation2 + $0x238] sm:$0xff] %vm19_vm4, %v2227_v0 }
  0x28   :  { %92 = vst.msk [vmem:[#allocation2 + $0x240] sm:$0xff] %vm19_vm4, %v2227_v0  ;;  %93 = vst.msk [vmem:[#allocation2 + $0x248] sm:$0xff] %vm19_vm4, %v2227_v0 }
  0x29   :  { %2029 = vmatmul.mubr.msk.bf16.gmra.mrb[16].mxu0 %vm481_vm3, %v2193_v15  ;;  %2113 = vmatmul.mubr.msk.bf16.gmra.mrb[16].mxu1 %vm481_vm3, %v2194_v16  ;;  %94 = vst.msk [vmem:[#allocation2 + $0x250] sm:$0xff] %vm19_vm4, %v2227_v0  ;;  %95 = vst.msk [vmem:[#allocation2 + $0x258] sm:$0xff] %vm19_vm4, %v2227_v0 }
  0x2a   :  { %2032 = vmatprep.mubr.msk.bf16.mxu0 %vm2229_vm2, %v2227_v0  ;;  %2116 = vmatprep.mubr.msk.bf16.mxu1 %vm2229_vm2, %v2227_v0  ;;  %96 = vst.msk [vmem:[#allocation2 + $0x260] sm:$0xff] %vm19_vm4, %v2227_v0  ;;  %97 = vst.msk [vmem:[#allocation2 + $0x268] sm:$0xff] %vm19_vm4, %v2227_v0 }
  0x2b   :  { %98 = vst.msk [vmem:[#allocation2 + $0x270] sm:$0xff] %vm19_vm4, %v2227_v0  ;;  %99 = vst.msk [vmem:[#allocation2 + $0x278] sm:$0xff] %vm19_vm4, %v2227_v0 }
  0x2c   :  { %100 = vst.msk [vmem:[#allocation2 + $0x280] sm:$0xff] %vm19_vm4, %v2227_v0 }
  0x31   :  { %2033 = vmatmul.mubr.msk.bf16.gmra.mrb[20].mxu0 %vm481_vm3, %v2195_v17  ;;  %2117 = vmatmul.mubr.msk.bf16.gmra.mrb[20].mxu1 %vm481_vm3, %v2196_v18 }
  0x32   :  { %2036 = vmatprep.mubr.msk.bf16.mxu0 %vm2229_vm2, %v2227_v0  ;;  %2120 = vmatprep.mubr.msk.bf16.mxu1 %vm2229_vm2, %v2227_v0 }
  0x39   :  { %2037 = vmatmul.mubr.msk.bf16.gmra.mrb[24].mxu0 %vm481_vm3, %v2197_v19  ;;  %2121 = vmatmul.mubr.msk.bf16.gmra.mrb[24].mxu1 %vm481_vm3, %v2198_v20 }
  0x3a   :  { %2040 = vmatprep.mubr.msk.bf16.mxu0 %vm2229_vm2, %v2227_v0  ;;  %2124 = vmatprep.mubr.msk.bf16.mxu1 %vm2229_vm2, %v2227_v0 }
  0x41   :  { %2041 = vmatmul.mubr.msk.bf16.gmra.mrb[28].mxu0 %vm481_vm3, %v2199_v21  ;;  %2125 = vmatmul.mubr.msk.bf16.gmra.mrb[28].mxu1 %vm481_vm3, %v2200_v22 }
  0x42   :  { %2044 = vmatprep.mubr.msk.bf16.mxu0 %vm2229_vm2, %v2227_v0  ;;  %2128 = vmatprep.mubr.msk.bf16.mxu1 %vm2229_vm2, %v2227_v0 }
  0x49   :  { %2045 = vmatmul.mubr.msk.bf16.gmra.mrb[32].mxu0 %vm481_vm3, %v2201_v23  ;;  %2129 = vmatmul.mubr.msk.bf16.gmra.mrb[32].mxu1 %vm481_vm3, %v2202_v24 }
  0x4a   :  { %2048 = vmatprep.mubr.msk.bf16.mxu0 %vm2229_vm2, %v2227_v0  ;;  %2132 = vmatprep.mubr.msk.bf16.mxu1 %vm2229_vm2, %v2227_v0 }
  0x51   :  { %2049 = vmatmul.mubr.msk.bf16.gmra.mrb[36].mxu0 %vm481_vm3, %v2203_v25  ;;  %2133 = vmatmul.mubr.msk.bf16.gmra.mrb[36].mxu1 %vm481_vm3, %v2204_v26 }
  0x52   :  { %2052 = vmatprep.mubr.msk.bf16.mxu0 %vm2229_vm2, %v2227_v0  ;;  %2136 = vmatprep.mubr.msk.bf16.mxu1 %vm2229_vm2, %v2227_v0 }
  0x59   :  { %2053 = vmatmul.mubr.msk.bf16.gmra.mrb[40].mxu0 %vm481_vm3, %v2205_v27  ;;  %2137 = vmatmul.mubr.msk.bf16.gmra.mrb[40].mxu1 %vm481_vm3, %v2206_v28  ;;  %v105_v27 = vld [vmem:[#allocation2 + $0x20] sm:$0xff]  ;;  %v147_v28 = vld [vmem:[#allocation2 + $0x170] sm:$0xff] }
  0x5a   :  { %2056 = vmatprep.mubr.msk.bf16.mxu0 %vm2229_vm2, %v2227_v0  ;;  %2140 = vmatprep.mubr.msk.bf16.mxu1 %vm2229_vm2, %v2227_v0 }
  0x61   :  { %2057 = vmatmul.mubr.msk.bf16.gmra.mrb[44].mxu0 %vm481_vm3, %v2207_v29  ;;  %2141 = vmatmul.mubr.msk.bf16.gmra.mrb[44].mxu1 %vm481_vm3, %v2208_v30 }
  0x62   :  { %2060 = vmatprep.mubr.msk.bf16.mxu0 %vm2229_vm2, %v2227_v0  ;;  %2144 = vmatprep.mubr.msk.bf16.mxu1 %vm2229_vm2, %v2227_v0 }
  0x69   :  { %2061 = vmatmul.mubr.msk.bf16.gmra.mrb[48].mxu0 %vm481_vm3, %v2209_v31  ;;  %2145 = vmatmul.mubr.msk.bf16.gmra.mrb[48].mxu1 %vm481_vm3, %v2210_v32  ;;  %v106_v32 = vld [vmem:[#allocation2 + $0x28] sm:$0xff] }
  0x6a   :  { %2064 = vmatprep.mubr.msk.bf16.mxu0 %vm2229_vm2, %v2227_v0  ;;  %2148 = vmatprep.mubr.msk.bf16.mxu1 %vm2229_vm2, %v2227_v0 }
  0x71   :  { %2065 = vmatmul.mubr.msk.bf16.gmra.mrb[52].mxu0 %vm481_vm3, %v2211_v33  ;;  %2149 = vmatmul.mubr.msk.bf16.gmra.mrb[52].mxu1 %vm481_vm3, %v2212_v34  ;;  %v148_v34 = vld [vmem:[#allocation2 + $0x178] sm:$0xff] }
  0x72   :  { %2068 = vmatprep.mubr.msk.bf16.mxu0 %vm2229_vm2, %v2227_v0  ;;  %2152 = vmatprep.mubr.msk.bf16.mxu1 %vm2229_vm2, %v2227_v0 }
  0x79   :  { %2069 = vmatmul.mubr.msk.bf16.gmra.mrb[56].mxu0 %vm481_vm3, %v2213_v35  ;;  %2153 = vmatmul.mubr.msk.bf16.gmra.mrb[56].mxu1 %vm481_vm3, %v2214_v36 }
  0x7a   :  { %2072 = vmatprep.mubr.msk.bf16.mxu0 %vm2229_vm2, %v2227_v0  ;;  %2156 = vmatprep.mubr.msk.bf16.mxu1 %vm2229_vm2, %v2227_v0 }
  0x81   :  { %2073 = vmatmul.mubr.msk.bf16.gmra.mrb[60].mxu0 %vm481_vm3, %v2215_v37  ;;  %2157 = vmatmul.mubr.msk.bf16.gmra.mrb[60].mxu1 %vm481_vm3, %v2216_v38 }
  0x82   :  { %2076 = vmatprep.mubr.msk.bf16.mxu0 %vm2229_vm2, %v2227_v0  ;;  %2160 = vmatprep.mubr.msk.bf16.mxu1 %vm2229_vm2, %v2227_v0 }
  0x89   :  { %2077 = vmatmul.mubr.msk.bf16.gmra.mrb[64].mxu0 %vm481_vm3, %v2217_v39  ;;  %2161 = vmatmul.mubr.msk.bf16.gmra.mrb[64].mxu1 %vm481_vm3, %v2218_v40 }
  0x8a   :  { %2080 = vmatprep.mubr.msk.bf16.mxu0 %vm2229_vm2, %v2227_v0  ;;  %2164 = vmatprep.mubr.msk.bf16.mxu1 %vm2229_vm2, %v2227_v0 }
  0x91   :  { %2081 = vmatmul.mubr.msk.bf16.gmra.mrb[68].mxu0 %vm481_vm3, %v2219_v41  ;;  %2165 = vmatmul.mubr.msk.bf16.gmra.mrb[68].mxu1 %vm481_vm3, %v2220_v42 }
  0x92   :  { %2084 = vmatprep.mubr.msk.bf16.mxu0 %vm2229_vm2, %v2227_v0  ;;  %2168 = vmatprep.mubr.msk.bf16.mxu1 %vm2229_vm2, %v2227_v0 }
  0x99   :  { %2085 = vmatmul.mubr.msk.bf16.gmra.mrb[72].mxu0 %vm481_vm3, %v2221_v43  ;;  %2169 = vmatmul.mubr.msk.bf16.gmra.mrb[72].mxu1 %vm481_vm3, %v2222_v44 }
  0x9a   :  { %2088 = vmatprep.mubr.msk.bf16.mxu0 %vm2229_vm2, %v2227_v0  ;;  %2172 = vmatprep.mubr.msk.bf16.mxu1 %vm2229_vm2, %v2227_v0 }
  0xa1   :  { %2089 = vmatmul.mubr.msk.bf16.gmra.mrb[76].mxu0 %vm481_vm3, %v2223_v45  ;;  %2173 = vmatmul.mubr.msk.bf16.gmra.mrb[76].mxu1 %vm481_vm3, %v2224_v46 }
  0xa2   :  { %2092 = vmatprep.mubr.msk.bf16.mxu0 %vm2229_vm2, %v2227_v0  ;;  %v103_v0 = vld [vmem:[#allocation2 + $0x10] sm:$0xff] }
  0xa9   :  { %2093 = vmatmul.mubr.msk.bf16.gmra.mrb[80].mxu0 %vm481_vm3, %v2225_v47 }
  0xdc   :  { %v646_v50 = vpop.f32.mrb[0].mxu0  ;;  %v814_v52 = vpop.f32.mrb[0].mxu1 }
  0xdd   :  { %v972_v54 = vadd.f32 %v646_v50, %v101_v48  ;;  %v2014_v55 = vpop.f32.mrb[1].mxu0  ;;  %v1014_v56 = vadd.f32 %v814_v52, %v143_v49  ;;  %v2098_v57 = vpop.f32.mrb[1].mxu1 }
  0xde   :  { %v649_v58 = vpop.f32.mrb[2].mxu0  ;;  %v817_v59 = vpop.f32.mrb[2].mxu1  ;;  %v107_v55 = vld [vmem:[#allocation2 + $0x30] sm:$0xff] }
  0xdf   :  { %1054 = vst.msk [vmem:[#allocation2] sm:$0xff] %vm19_vm4, %v972_v54  ;;  %v973_v60 = vadd.f32 %v649_v58, %v102_v51  ;;  %v2015_v61 = vpop.f32.mrb[3].mxu0  ;;  %1096 = vst.msk [vmem:[#allocation2 + $0x150] sm:$0xff] %vm19_vm4, %v1014_v56  ;;  %v1015_v62 = vadd.f32 %v817_v59, %v144_v53  ;;  %v2099_v63 = vpop.f32.mrb[3].mxu1  ;;  %v149_v56 = vld [vmem:[#allocation2 + $0x180] sm:$0xff] }
  0xe1   :  { %1055 = vst.msk [vmem:[#allocation2 + $0x8] sm:$0xff] %vm19_vm4, %v973_v60  ;;  %1097 = vst.msk [vmem:[#allocation2 + $0x158] sm:$0xff] %vm19_vm4, %v1015_v62  ;;  %v108_v60 = vld [vmem:[#allocation2 + $0x38] sm:$0xff]  ;;  %v150_v62 = vld [vmem:[#allocation2 + $0x188] sm:$0xff] }
  0xe4   :  { %v654_v3 = vpop.f32.mrb[4].mxu0  ;;  %v822_v5 = vpop.f32.mrb[4].mxu1 }
  0xe5   :  { %v974_v7 = vadd.f32 %v654_v3, %v103_v0  ;;  %v2018_v8 = vpop.f32.mrb[5].mxu0  ;;  %v1016_v9 = vadd.f32 %v822_v5, %v145_v1  ;;  %v2102_v10 = vpop.f32.mrb[5].mxu1 }
  0xe6   :  { %v1138_v11 = vld [vmem:[#allocation2] sm:$0xff]  ;;  %v1180_v12 = vld [vmem:[#allocation2 + $0x150] sm:$0xff]  ;;  %v657_v13 = vpop.f32.mrb[6].mxu0  ;;  %v825_v14 = vpop.f32.mrb[6].mxu1 }
  0xe7   :  { %v1226_v15 = vadd.f32 %v2675_v2, %v1138_v11  ;;  %v1268_v16 = vadd.f32 %v2675_v2, %v1180_v12  ;;  %1056 = vst.msk [vmem:[#allocation2 + $0x10] sm:$0xff] %vm19_vm4, %v974_v7  ;;  %v975_v17 = vadd.f32 %v657_v13, %v104_v4  ;;  %v2019_v18 = vpop.f32.mrb[7].mxu0  ;;  %1098 = vst.msk [vmem:[#allocation2 + $0x160] sm:$0xff] %vm19_vm4, %v1016_v9  ;;  %v2103_v20 = vpop.f32.mrb[7].mxu1 }
  0xe8   :  { %v1017_v19 = vadd.f32 %v825_v14, %v146_v6  ;;  %v1139_v21 = vld [vmem:[#allocation2 + $0x8] sm:$0xff]  ;;  %v1181_v22 = vld [vmem:[#allocation2 + $0x158] sm:$0xff]  ;;  %v109_v20 = vld [vmem:[#allocation2 + $0x40] sm:$0xff] }
  0xe9   :  { %v1884_v23 = vpack.c.bf16 %v1226_v15, %v1226_v15  ;;  %v1227_v24 = vadd.f32 %v2675_v2, %v1139_v21  ;;  %v1926_v25 = vpack.c.bf16 %v1268_v16, %v1268_v16  ;;  %v1269_v26 = vadd.f32 %v2675_v2, %v1181_v22  ;;  %1057 = vst.msk [vmem:[#allocation2 + $0x18] sm:$0xff] %vm19_vm4, %v975_v17  ;;  %v151_v21 = vld [vmem:[#allocation2 + $0x190] sm:$0xff] }
  0xea   :  { %1099 = vst.msk [vmem:[#allocation2 + $0x168] sm:$0xff] %vm19_vm4, %v1017_v19 }
  0xeb   :  { %1633 = vst.msk [vmem:[%s3167_s3] sm:$0xf] %vm1632_vm5, %v1884_v23  ;;  %v1885_v29 = vpack.c.bf16 %v1227_v24, %v1227_v24  ;;  %1675 = vst.msk [vmem:[%s3167_s3 + $0xa8] sm:$0xf] %vm1632_vm5, %v1926_v25  ;;  %v1927_v30 = vpack.c.bf16 %v1269_v26, %v1269_v26  ;;  %v110_v25 = vld [vmem:[#allocation2 + $0x48] sm:$0xff] }
  0xec   :  { %v662_v31 = vpop.f32.mrb[8].mxu0  ;;  %v830_v33 = vpop.f32.mrb[8].mxu1 }
  0xed   :  { %1634 = vst.msk [vmem:[%s3167_s3 + $0x4] sm:$0xf] %vm1632_vm5, %v1885_v29  ;;  %1676 = vst.msk [vmem:[%s3167_s3 + $0xac] sm:$0xf] %vm1632_vm5, %v1927_v30  ;;  %v976_v35 = vadd.f32 %v662_v31, %v105_v27  ;;  %v2022_v36 = vpop.f32.mrb[9].mxu0  ;;  %v1018_v37 = vadd.f32 %v830_v33, %v147_v28  ;;  %v2106_v38 = vpop.f32.mrb[9].mxu1 }
  0xee   :  { %v1140_v39 = vld [vmem:[#allocation2 + $0x10] sm:$0xff]  ;;  %v1182_v40 = vld [vmem:[#allocation2 + $0x160] sm:$0xff]  ;;  %v665_v41 = vpop.f32.mrb[10].mxu0  ;;  %v833_v42 = vpop.f32.mrb[10].mxu1  ;;  %v152_v27 = vld [vmem:[#allocation2 + $0x198] sm:$0xff] }
  0xef   :  { %v1228_v43 = vadd.f32 %v2675_v2, %v1140_v39  ;;  %v1270_v44 = vadd.f32 %v2675_v2, %v1182_v40  ;;  %1058 = vst.msk [vmem:[#allocation2 + $0x20] sm:$0xff] %vm19_vm4, %v976_v35  ;;  %v977_v45 = vadd.f32 %v665_v41, %v106_v32  ;;  %v2023_v46 = vpop.f32.mrb[11].mxu0  ;;  %1100 = vst.msk [vmem:[#allocation2 + $0x170] sm:$0xff] %vm19_vm4, %v1018_v37  ;;  %v2107_v48 = vpop.f32.mrb[11].mxu1 }
  0xf0   :  { %v1019_v47 = vadd.f32 %v833_v42, %v148_v34  ;;  %v1141_v49 = vld [vmem:[#allocation2 + $0x18] sm:$0xff]  ;;  %v111_v48 = vld [vmem:[#allocation2 + $0x50] sm:$0xff] }
  0xf1   :  { %v1183_v50 = vld [vmem:[#allocation2 + $0x168] sm:$0xff]  ;;  %v1886_v51 = vpack.c.bf16 %v1228_v43, %v1228_v43  ;;  %v1229_v52 = vadd.f32 %v2675_v2, %v1141_v49  ;;  %v1928_v53 = vpack.c.bf16 %v1270_v44, %v1270_v44  ;;  %1059 = vst.msk [vmem:[#allocation2 + $0x28] sm:$0xff] %vm19_vm4, %v977_v45  ;;  %v153_v49 = vld [vmem:[#allocation2 + $0x1a0] sm:$0xff] }
  0xf2   :  { %v1271_v54 = vadd.f32 %v2675_v2, %v1183_v50  ;;  %1101 = vst.msk [vmem:[#allocation2 + $0x178] sm:$0xff] %vm19_vm4, %v1019_v47 }
  0xf3   :  { %1635 = vst.msk [vmem:[%s3167_s3 + $0x8] sm:$0xf] %vm1632_vm5, %v1886_v51  ;;  %v1887_v57 = vpack.c.bf16 %v1229_v52, %v1229_v52  ;;  %1677 = vst.msk [vmem:[%s3167_s3 + $0xb0] sm:$0xf] %vm1632_vm5, %v1928_v53  ;;  %v112_v53 = vld [vmem:[#allocation2 + $0x58] sm:$0xff] }
  0xf4   :  { %v1929_v58 = vpack.c.bf16 %v1271_v54, %v1271_v54  ;;  %v670_v59 = vpop.f32.mrb[12].mxu0  ;;  %v838_v61 = vpop.f32.mrb[12].mxu1 }
  0xf5   :  { %1636 = vst.msk [vmem:[%s3167_s3 + $0xc] sm:$0xf] %vm1632_vm5, %v1887_v57  ;;  %v978_v63 = vadd.f32 %v670_v59, %v107_v55  ;;  %v2026_v0 = vpop.f32.mrb[13].mxu0  ;;  %v1020_v1 = vadd.f32 %v838_v61, %v149_v56  ;;  %v2110_v3 = vpop.f32.mrb[13].mxu1  ;;  %v154_v55 = vld [vmem:[#allocation2 + $0x1a8] sm:$0xff] }
  0xf6   :  { %1678 = vst.msk [vmem:[%s3167_s3 + $0xb4] sm:$0xf] %vm1632_vm5, %v1929_v58  ;;  %v1142_v4 = vld [vmem:[#allocation2 + $0x20] sm:$0xff]  ;;  %v1184_v5 = vld [vmem:[#allocation2 + $0x170] sm:$0xff]  ;;  %v673_v6 = vpop.f32.mrb[14].mxu0  ;;  %v841_v7 = vpop.f32.mrb[14].mxu1 }
  0xf7   :  { %v1230_v8 = vadd.f32 %v2675_v2, %v1142_v4  ;;  %v1272_v9 = vadd.f32 %v2675_v2, %v1184_v5  ;;  %1060 = vst.msk [vmem:[#allocation2 + $0x30] sm:$0xff] %vm19_vm4, %v978_v63  ;;  %v979_v10 = vadd.f32 %v673_v6, %v108_v60  ;;  %v2027_v11 = vpop.f32.mrb[15].mxu0  ;;  %1102 = vst.msk [vmem:[#allocation2 + $0x180] sm:$0xff] %vm19_vm4, %v1020_v1  ;;  %v2111_v13 = vpop.f32.mrb[15].mxu1 }
  0xf8   :  { %v1021_v12 = vadd.f32 %v841_v7, %v150_v62  ;;  %v1143_v14 = vld [vmem:[#allocation2 + $0x28] sm:$0xff]  ;;  %v113_v13 = vld [vmem:[#allocation2 + $0x60] sm:$0xff] }
  0xf9   :  { %v1185_v15 = vld [vmem:[#allocation2 + $0x178] sm:$0xff]  ;;  %v1888_v16 = vpack.c.bf16 %v1230_v8, %v1230_v8  ;;  %v1231_v17 = vadd.f32 %v2675_v2, %v1143_v14  ;;  %v1930_v18 = vpack.c.bf16 %v1272_v9, %v1272_v9  ;;  %1061 = vst.msk [vmem:[#allocation2 + $0x38] sm:$0xff] %vm19_vm4, %v979_v10  ;;  %v155_v14 = vld [vmem:[#allocation2 + $0x1b0] sm:$0xff] }
  0xfa   :  { %v1273_v19 = vadd.f32 %v2675_v2, %v1185_v15  ;;  %1103 = vst.msk [vmem:[#allocation2 + $0x188] sm:$0xff] %vm19_vm4, %v1021_v12 }
  0xfb   :  { %1637 = vst.msk [vmem:[%s3167_s3 + $0x10] sm:$0xf] %vm1632_vm5, %v1888_v16  ;;  %v1889_v22 = vpack.c.bf16 %v1231_v17, %v1231_v17  ;;  %1679 = vst.msk [vmem:[%s3167_s3 + $0xb8] sm:$0xf] %vm1632_vm5, %v1930_v18  ;;  %v114_v18 = vld [vmem:[#allocation2 + $0x68] sm:$0xff] }
  0xfc   :  { %v1931_v23 = vpack.c.bf16 %v1273_v19, %v1273_v19  ;;  %v678_v24 = vpop.f32.mrb[16].mxu0  ;;  %v846_v26 = vpop.f32.mrb[16].mxu1 }
  0xfd   :  { %1638 = vst.msk [vmem:[%s3167_s3 + $0x14] sm:$0xf] %vm1632_vm5, %v1889_v22  ;;  %v980_v28 = vadd.f32 %v678_v24, %v109_v20  ;;  %v2030_v29 = vpop.f32.mrb[17].mxu0  ;;  %v1022_v30 = vadd.f32 %v846_v26, %v151_v21  ;;  %v2114_v31 = vpop.f32.mrb[17].mxu1  ;;  %v156_v20 = vld [vmem:[#allocation2 + $0x1b8] sm:$0xff] }
  0xfe   :  { %1680 = vst.msk [vmem:[%s3167_s3 + $0xbc] sm:$0xf] %vm1632_vm5, %v1931_v23  ;;  %v1144_v32 = vld [vmem:[#allocation2 + $0x30] sm:$0xff]  ;;  %v1186_v33 = vld [vmem:[#allocation2 + $0x180] sm:$0xff]  ;;  %v681_v34 = vpop.f32.mrb[18].mxu0  ;;  %v849_v35 = vpop.f32.mrb[18].mxu1 }
  0xff   :  { %v1232_v36 = vadd.f32 %v2675_v2, %v1144_v32  ;;  %v1274_v37 = vadd.f32 %v2675_v2, %v1186_v33  ;;  %1062 = vst.msk [vmem:[#allocation2 + $0x40] sm:$0xff] %vm19_vm4, %v980_v28  ;;  %v981_v38 = vadd.f32 %v681_v34, %v110_v25  ;;  %v2031_v39 = vpop.f32.mrb[19].mxu0  ;;  %1104 = vst.msk [vmem:[#allocation2 + $0x190] sm:$0xff] %vm19_vm4, %v1022_v30  ;;  %v2115_v41 = vpop.f32.mrb[19].mxu1 }
 0x100   :  { %v1023_v40 = vadd.f32 %v849_v35, %v152_v27  ;;  %v1145_v42 = vld [vmem:[#allocation2 + $0x38] sm:$0xff]  ;;  %v115_v41 = vld [vmem:[#allocation2 + $0x70] sm:$0xff] }
 0x101   :  { %v1187_v43 = vld [vmem:[#allocation2 + $0x188] sm:$0xff]  ;;  %v1890_v44 = vpack.c.bf16 %v1232_v36, %v1232_v36  ;;  %v1233_v45 = vadd.f32 %v2675_v2, %v1145_v42  ;;  %v1932_v46 = vpack.c.bf16 %v1274_v37, %v1274_v37  ;;  %1063 = vst.msk [vmem:[#allocation2 + $0x48] sm:$0xff] %vm19_vm4, %v981_v38  ;;  %v157_v42 = vld [vmem:[#allocation2 + $0x1c0] sm:$0xff] }
 0x102   :  { %v1275_v47 = vadd.f32 %v2675_v2, %v1187_v43  ;;  %1105 = vst.msk [vmem:[#allocation2 + $0x198] sm:$0xff] %vm19_vm4, %v1023_v40 }
 0x103   :  { %1639 = vst.msk [vmem:[%s3167_s3 + $0x18] sm:$0xf] %vm1632_vm5, %v1890_v44  ;;  %v1891_v50 = vpack.c.bf16 %v1233_v45, %v1233_v45  ;;  %1681 = vst.msk [vmem:[%s3167_s3 + $0xc0] sm:$0xf] %vm1632_vm5, %v1932_v46  ;;  %v116_v46 = vld [vmem:[#allocation2 + $0x78] sm:$0xff] }
 0x104   :  { %v1933_v51 = vpack.c.bf16 %v1275_v47, %v1275_v47  ;;  %v686_v52 = vpop.f32.mrb[20].mxu0  ;;  %v854_v54 = vpop.f32.mrb[20].mxu1 }
 0x105   :  { %1640 = vst.msk [vmem:[%s3167_s3 + $0x1c] sm:$0xf] %vm1632_vm5, %v1891_v50  ;;  %v982_v56 = vadd.f32 %v686_v52, %v111_v48  ;;  %v2034_v57 = vpop.f32.mrb[21].mxu0  ;;  %v1024_v58 = vadd.f32 %v854_v54, %v153_v49  ;;  %v2118_v59 = vpop.f32.mrb[21].mxu1  ;;  %v158_v48 = vld [vmem:[#allocation2 + $0x1c8] sm:$0xff] }
 0x106   :  { %1682 = vst.msk [vmem:[%s3167_s3 + $0xc4] sm:$0xf] %vm1632_vm5, %v1933_v51  ;;  %v1146_v60 = vld [vmem:[#allocation2 + $0x40] sm:$0xff]  ;;  %v1188_v61 = vld [vmem:[#allocation2 + $0x190] sm:$0xff]  ;;  %v689_v62 = vpop.f32.mrb[22].mxu0  ;;  %v857_v63 = vpop.f32.mrb[22].mxu1 }
 0x107   :  { %v1234_v0 = vadd.f32 %v2675_v2, %v1146_v60  ;;  %v1276_v1 = vadd.f32 %v2675_v2, %v1188_v61  ;;  %1064 = vst.msk [vmem:[#allocation2 + $0x50] sm:$0xff] %vm19_vm4, %v982_v56  ;;  %v983_v3 = vadd.f32 %v689_v62, %v112_v53  ;;  %v2035_v4 = vpop.f32.mrb[23].mxu0  ;;  %1106 = vst.msk [vmem:[#allocation2 + $0x1a0] sm:$0xff] %vm19_vm4, %v1024_v58  ;;  %v2119_v6 = vpop.f32.mrb[23].mxu1 }
 0x108   :  { %v1025_v5 = vadd.f32 %v857_v63, %v154_v55  ;;  %v1147_v7 = vld [vmem:[#allocation2 + $0x48] sm:$0xff]  ;;  %v117_v6 = vld [vmem:[#allocation2 + $0x80] sm:$0xff] }
 0x109   :  { %v1189_v8 = vld [vmem:[#allocation2 + $0x198] sm:$0xff]  ;;  %v1892_v9 = vpack.c.bf16 %v1234_v0, %v1234_v0  ;;  %v1235_v10 = vadd.f32 %v2675_v2, %v1147_v7  ;;  %v1934_v11 = vpack.c.bf16 %v1276_v1, %v1276_v1  ;;  %1065 = vst.msk [vmem:[#allocation2 + $0x58] sm:$0xff] %vm19_vm4, %v983_v3  ;;  %v159_v7 = vld [vmem:[#allocation2 + $0x1d0] sm:$0xff] }
 0x10a   :  { %v1277_v12 = vadd.f32 %v2675_v2, %v1189_v8  ;;  %1107 = vst.msk [vmem:[#allocation2 + $0x1a8] sm:$0xff] %vm19_vm4, %v1025_v5 }
 0x10b   :  { %1641 = vst.msk [vmem:[%s3167_s3 + $0x20] sm:$0xf] %vm1632_vm5, %v1892_v9  ;;  %v1893_v15 = vpack.c.bf16 %v1235_v10, %v1235_v10  ;;  %1683 = vst.msk [vmem:[%s3167_s3 + $0xc8] sm:$0xf] %vm1632_vm5, %v1934_v11  ;;  %v118_v11 = vld [vmem:[#allocation2 + $0x88] sm:$0xff] }
 0x10c   :  { %v1935_v16 = vpack.c.bf16 %v1277_v12, %v1277_v12  ;;  %v694_v17 = vpop.f32.mrb[24].mxu0  ;;  %v862_v19 = vpop.f32.mrb[24].mxu1 }
 0x10d   :  { %1642 = vst.msk [vmem:[%s3167_s3 + $0x24] sm:$0xf] %vm1632_vm5, %v1893_v15  ;;  %v984_v21 = vadd.f32 %v694_v17, %v113_v13  ;;  %v2038_v22 = vpop.f32.mrb[25].mxu0  ;;  %v1026_v23 = vadd.f32 %v862_v19, %v155_v14  ;;  %v2122_v24 = vpop.f32.mrb[25].mxu1  ;;  %v160_v13 = vld [vmem:[#allocation2 + $0x1d8] sm:$0xff] }
 0x10e   :  { %1684 = vst.msk [vmem:[%s3167_s3 + $0xcc] sm:$0xf] %vm1632_vm5, %v1935_v16  ;;  %v1148_v25 = vld [vmem:[#allocation2 + $0x50] sm:$0xff]  ;;  %v1190_v26 = vld [vmem:[#allocation2 + $0x1a0] sm:$0xff]  ;;  %v697_v27 = vpop.f32.mrb[26].mxu0  ;;  %v865_v28 = vpop.f32.mrb[26].mxu1 }
 0x10f   :  { %v1236_v29 = vadd.f32 %v2675_v2, %v1148_v25  ;;  %v1278_v30 = vadd.f32 %v2675_v2, %v1190_v26  ;;  %1066 = vst.msk [vmem:[#allocation2 + $0x60] sm:$0xff] %vm19_vm4, %v984_v21  ;;  %v985_v31 = vadd.f32 %v697_v27, %v114_v18  ;;  %v2039_v32 = vpop.f32.mrb[27].mxu0  ;;  %1108 = vst.msk [vmem:[#allocation2 + $0x1b0] sm:$0xff] %vm19_vm4, %v1026_v23  ;;  %v2123_v34 = vpop.f32.mrb[27].mxu1 }
 0x110   :  { %v1027_v33 = vadd.f32 %v865_v28, %v156_v20  ;;  %v1149_v35 = vld [vmem:[#allocation2 + $0x58] sm:$0xff]  ;;  %v119_v34 = vld [vmem:[#allocation2 + $0x90] sm:$0xff] }
 0x111   :  { %v1191_v36 = vld [vmem:[#allocation2 + $0x1a8] sm:$0xff]  ;;  %v1894_v37 = vpack.c.bf16 %v1236_v29, %v1236_v29  ;;  %v1237_v38 = vadd.f32 %v2675_v2, %v1149_v35  ;;  %v1936_v39 = vpack.c.bf16 %v1278_v30, %v1278_v30  ;;  %1067 = vst.msk [vmem:[#allocation2 + $0x68] sm:$0xff] %vm19_vm4, %v985_v31  ;;  %v161_v35 = vld [vmem:[#allocation2 + $0x1e0] sm:$0xff] }
 0x112   :  { %v1279_v40 = vadd.f32 %v2675_v2, %v1191_v36  ;;  %1109 = vst.msk [vmem:[#allocation2 + $0x1b8] sm:$0xff] %vm19_vm4, %v1027_v33 }
 0x113   :  { %1643 = vst.msk [vmem:[%s3167_s3 + $0x28] sm:$0xf] %vm1632_vm5, %v1894_v37  ;;  %v1895_v43 = vpack.c.bf16 %v1237_v38, %v1237_v38  ;;  %1685 = vst.msk [vmem:[%s3167_s3 + $0xd0] sm:$0xf] %vm1632_vm5, %v1936_v39  ;;  %v120_v39 = vld [vmem:[#allocation2 + $0x98] sm:$0xff] }
 0x114   :  { %v1937_v44 = vpack.c.bf16 %v1279_v40, %v1279_v40  ;;  %v702_v45 = vpop.f32.mrb[28].mxu0  ;;  %v870_v47 = vpop.f32.mrb[28].mxu1 }
 0x115   :  { %1644 = vst.msk [vmem:[%s3167_s3 + $0x2c] sm:$0xf] %vm1632_vm5, %v1895_v43  ;;  %v986_v49 = vadd.f32 %v702_v45, %v115_v41  ;;  %v2042_v50 = vpop.f32.mrb[29].mxu0  ;;  %v1028_v51 = vadd.f32 %v870_v47, %v157_v42  ;;  %v2126_v52 = vpop.f32.mrb[29].mxu1  ;;  %v162_v41 = vld [vmem:[#allocation2 + $0x1e8] sm:$0xff] }
 0x116   :  { %1686 = vst.msk [vmem:[%s3167_s3 + $0xd4] sm:$0xf] %vm1632_vm5, %v1937_v44  ;;  %v1150_v53 = vld [vmem:[#allocation2 + $0x60] sm:$0xff]  ;;  %v1192_v54 = vld [vmem:[#allocation2 + $0x1b0] sm:$0xff]  ;;  %v705_v55 = vpop.f32.mrb[30].mxu0  ;;  %v873_v56 = vpop.f32.mrb[30].mxu1 }
 0x117   :  { %v1238_v57 = vadd.f32 %v2675_v2, %v1150_v53  ;;  %v1280_v58 = vadd.f32 %v2675_v2, %v1192_v54  ;;  %1068 = vst.msk [vmem:[#allocation2 + $0x70] sm:$0xff] %vm19_vm4, %v986_v49  ;;  %v987_v59 = vadd.f32 %v705_v55, %v116_v46  ;;  %v2043_v60 = vpop.f32.mrb[31].mxu0  ;;  %1110 = vst.msk [vmem:[#allocation2 + $0x1c0] sm:$0xff] %vm19_vm4, %v1028_v51  ;;  %v2127_v62 = vpop.f32.mrb[31].mxu1 }
 0x118   :  { %v1029_v61 = vadd.f32 %v873_v56, %v158_v48  ;;  %v1151_v63 = vld [vmem:[#allocation2 + $0x68] sm:$0xff]  ;;  %v121_v62 = vld [vmem:[#allocation2 + $0xa0] sm:$0xff] }
 0x119   :  { %v1193_v0 = vld [vmem:[#allocation2 + $0x1b8] sm:$0xff]  ;;  %v1896_v1 = vpack.c.bf16 %v1238_v57, %v1238_v57  ;;  %v1239_v3 = vadd.f32 %v2675_v2, %v1151_v63  ;;  %v1938_v4 = vpack.c.bf16 %v1280_v58, %v1280_v58  ;;  %1069 = vst.msk [vmem:[#allocation2 + $0x78] sm:$0xff] %vm19_vm4, %v987_v59  ;;  %v163_v63 = vld [vmem:[#allocation2 + $0x1f0] sm:$0xff] }
 0x11a   :  { %v1281_v5 = vadd.f32 %v2675_v2, %v1193_v0  ;;  %1111 = vst.msk [vmem:[#allocation2 + $0x1c8] sm:$0xff] %vm19_vm4, %v1029_v61 }
 0x11b   :  { %1645 = vst.msk [vmem:[%s3167_s3 + $0x30] sm:$0xf] %vm1632_vm5, %v1896_v1  ;;  %v1897_v8 = vpack.c.bf16 %v1239_v3, %v1239_v3  ;;  %1687 = vst.msk [vmem:[%s3167_s3 + $0xd8] sm:$0xf] %vm1632_vm5, %v1938_v4  ;;  %v122_v4 = vld [vmem:[#allocation2 + $0xa8] sm:$0xff] }
 0x11c   :  { %v1939_v9 = vpack.c.bf16 %v1281_v5, %v1281_v5  ;;  %v710_v10 = vpop.f32.mrb[32].mxu0  ;;  %v878_v12 = vpop.f32.mrb[32].mxu1 }
 0x11d   :  { %1646 = vst.msk [vmem:[%s3167_s3 + $0x34] sm:$0xf] %vm1632_vm5, %v1897_v8  ;;  %v988_v14 = vadd.f32 %v710_v10, %v117_v6  ;;  %v2046_v15 = vpop.f32.mrb[33].mxu0  ;;  %v1030_v16 = vadd.f32 %v878_v12, %v159_v7  ;;  %v2130_v17 = vpop.f32.mrb[33].mxu1  ;;  %v164_v6 = vld [vmem:[#allocation2 + $0x1f8] sm:$0xff] }
 0x11e   :  { %1688 = vst.msk [vmem:[%s3167_s3 + $0xdc] sm:$0xf] %vm1632_vm5, %v1939_v9  ;;  %v1152_v18 = vld [vmem:[#allocation2 + $0x70] sm:$0xff]  ;;  %v1194_v19 = vld [vmem:[#allocation2 + $0x1c0] sm:$0xff]  ;;  %v713_v20 = vpop.f32.mrb[34].mxu0  ;;  %v881_v21 = vpop.f32.mrb[34].mxu1 }
 0x11f   :  { %v1240_v22 = vadd.f32 %v2675_v2, %v1152_v18  ;;  %v1282_v23 = vadd.f32 %v2675_v2, %v1194_v19  ;;  %1070 = vst.msk [vmem:[#allocation2 + $0x80] sm:$0xff] %vm19_vm4, %v988_v14  ;;  %v989_v24 = vadd.f32 %v713_v20, %v118_v11  ;;  %v2047_v25 = vpop.f32.mrb[35].mxu0  ;;  %1112 = vst.msk [vmem:[#allocation2 + $0x1d0] sm:$0xff] %vm19_vm4, %v1030_v16  ;;  %v2131_v27 = vpop.f32.mrb[35].mxu1 }
 0x120   :  { %v1031_v26 = vadd.f32 %v881_v21, %v160_v13  ;;  %v1153_v28 = vld [vmem:[#allocation2 + $0x78] sm:$0xff]  ;;  %v123_v27 = vld [vmem:[#allocation2 + $0xb0] sm:$0xff] }
 0x121   :  { %v1195_v29 = vld [vmem:[#allocation2 + $0x1c8] sm:$0xff]  ;;  %v1898_v30 = vpack.c.bf16 %v1240_v22, %v1240_v22  ;;  %v1241_v31 = vadd.f32 %v2675_v2, %v1153_v28  ;;  %v1940_v32 = vpack.c.bf16 %v1282_v23, %v1282_v23  ;;  %1071 = vst.msk [vmem:[#allocation2 + $0x88] sm:$0xff] %vm19_vm4, %v989_v24  ;;  %v165_v28 = vld [vmem:[#allocation2 + $0x200] sm:$0xff] }
 0x122   :  { %v1283_v33 = vadd.f32 %v2675_v2, %v1195_v29  ;;  %1113 = vst.msk [vmem:[#allocation2 + $0x1d8] sm:$0xff] %vm19_vm4, %v1031_v26 }
 0x123   :  { %1647 = vst.msk [vmem:[%s3167_s3 + $0x38] sm:$0xf] %vm1632_vm5, %v1898_v30  ;;  %v1899_v36 = vpack.c.bf16 %v1241_v31, %v1241_v31  ;;  %1689 = vst.msk [vmem:[%s3167_s3 + $0xe0] sm:$0xf] %vm1632_vm5, %v1940_v32  ;;  %v124_v32 = vld [vmem:[#allocation2 + $0xb8] sm:$0xff] }
 0x124   :  { %v1941_v37 = vpack.c.bf16 %v1283_v33, %v1283_v33  ;;  %v718_v38 = vpop.f32.mrb[36].mxu0  ;;  %v886_v40 = vpop.f32.mrb[36].mxu1 }
 0x125   :  { %1648 = vst.msk [vmem:[%s3167_s3 + $0x3c] sm:$0xf] %vm1632_vm5, %v1899_v36  ;;  %v990_v42 = vadd.f32 %v718_v38, %v119_v34  ;;  %v2050_v43 = vpop.f32.mrb[37].mxu0  ;;  %v1032_v44 = vadd.f32 %v886_v40, %v161_v35  ;;  %v2134_v45 = vpop.f32.mrb[37].mxu1  ;;  %v166_v34 = vld [vmem:[#allocation2 + $0x208] sm:$0xff] }
 0x126   :  { %1690 = vst.msk [vmem:[%s3167_s3 + $0xe4] sm:$0xf] %vm1632_vm5, %v1941_v37  ;;  %v1154_v46 = vld [vmem:[#allocation2 + $0x80] sm:$0xff]  ;;  %v1196_v47 = vld [vmem:[#allocation2 + $0x1d0] sm:$0xff]  ;;  %v721_v48 = vpop.f32.mrb[38].mxu0  ;;  %v889_v49 = vpop.f32.mrb[38].mxu1 }
 0x127   :  { %v1242_v50 = vadd.f32 %v2675_v2, %v1154_v46  ;;  %v1284_v51 = vadd.f32 %v2675_v2, %v1196_v47  ;;  %1072 = vst.msk [vmem:[#allocation2 + $0x90] sm:$0xff] %vm19_vm4, %v990_v42  ;;  %v991_v52 = vadd.f32 %v721_v48, %v120_v39  ;;  %v2051_v53 = vpop.f32.mrb[39].mxu0  ;;  %1114 = vst.msk [vmem:[#allocation2 + $0x1e0] sm:$0xff] %vm19_vm4, %v1032_v44  ;;  %v2135_v55 = vpop.f32.mrb[39].mxu1 }
 0x128   :  { %v1033_v54 = vadd.f32 %v889_v49, %v162_v41  ;;  %v1155_v56 = vld [vmem:[#allocation2 + $0x88] sm:$0xff]  ;;  %v125_v55 = vld [vmem:[#allocation2 + $0xc0] sm:$0xff] }
 0x129   :  { %v1197_v57 = vld [vmem:[#allocation2 + $0x1d8] sm:$0xff]  ;;  %v1900_v58 = vpack.c.bf16 %v1242_v50, %v1242_v50  ;;  %v1243_v59 = vadd.f32 %v2675_v2, %v1155_v56  ;;  %v1942_v60 = vpack.c.bf16 %v1284_v51, %v1284_v51  ;;  %1073 = vst.msk [vmem:[#allocation2 + $0x98] sm:$0xff] %vm19_vm4, %v991_v52  ;;  %v167_v56 = vld [vmem:[#allocation2 + $0x210] sm:$0xff] }
 0x12a   :  { %v1285_v61 = vadd.f32 %v2675_v2, %v1197_v57  ;;  %1115 = vst.msk [vmem:[#allocation2 + $0x1e8] sm:$0xff] %vm19_vm4, %v1033_v54 }
 0x12b   :  { %1649 = vst.msk [vmem:[%s3167_s3 + $0x40] sm:$0xf] %vm1632_vm5, %v1900_v58  ;;  %v1901_v0 = vpack.c.bf16 %v1243_v59, %v1243_v59  ;;  %1691 = vst.msk [vmem:[%s3167_s3 + $0xe8] sm:$0xf] %vm1632_vm5, %v1942_v60  ;;  %v126_v60 = vld [vmem:[#allocation2 + $0xc8] sm:$0xff] }
 0x12c   :  { %v1943_v1 = vpack.c.bf16 %v1285_v61, %v1285_v61  ;;  %v726_v3 = vpop.f32.mrb[40].mxu0  ;;  %v894_v5 = vpop.f32.mrb[40].mxu1 }
 0x12d   :  { %1650 = vst.msk [vmem:[%s3167_s3 + $0x44] sm:$0xf] %vm1632_vm5, %v1901_v0  ;;  %v992_v7 = vadd.f32 %v726_v3, %v121_v62  ;;  %v2054_v8 = vpop.f32.mrb[41].mxu0  ;;  %v1034_v9 = vadd.f32 %v894_v5, %v163_v63  ;;  %v2138_v10 = vpop.f32.mrb[41].mxu1  ;;  %v168_v62 = vld [vmem:[#allocation2 + $0x218] sm:$0xff] }
 0x12e   :  { %1692 = vst.msk [vmem:[%s3167_s3 + $0xec] sm:$0xf] %vm1632_vm5, %v1943_v1  ;;  %v1156_v11 = vld [vmem:[#allocation2 + $0x90] sm:$0xff]  ;;  %v1198_v12 = vld [vmem:[#allocation2 + $0x1e0] sm:$0xff]  ;;  %v729_v13 = vpop.f32.mrb[42].mxu0  ;;  %v897_v14 = vpop.f32.mrb[42].mxu1 }
 0x12f   :  { %v1244_v15 = vadd.f32 %v2675_v2, %v1156_v11  ;;  %v1286_v16 = vadd.f32 %v2675_v2, %v1198_v12  ;;  %1074 = vst.msk [vmem:[#allocation2 + $0xa0] sm:$0xff] %vm19_vm4, %v992_v7  ;;  %v993_v17 = vadd.f32 %v729_v13, %v122_v4  ;;  %v2055_v18 = vpop.f32.mrb[43].mxu0  ;;  %1116 = vst.msk [vmem:[#allocation2 + $0x1f0] sm:$0xff] %vm19_vm4, %v1034_v9  ;;  %v2139_v20 = vpop.f32.mrb[43].mxu1 }
 0x130   :  { %v1035_v19 = vadd.f32 %v897_v14, %v164_v6  ;;  %v1157_v21 = vld [vmem:[#allocation2 + $0x98] sm:$0xff]  ;;  %v127_v20 = vld [vmem:[#allocation2 + $0xd0] sm:$0xff] }
 0x131   :  { %v1199_v22 = vld [vmem:[#allocation2 + $0x1e8] sm:$0xff]  ;;  %v1902_v23 = vpack.c.bf16 %v1244_v15, %v1244_v15  ;;  %v1245_v24 = vadd.f32 %v2675_v2, %v1157_v21  ;;  %v1944_v25 = vpack.c.bf16 %v1286_v16, %v1286_v16  ;;  %1075 = vst.msk [vmem:[#allocation2 + $0xa8] sm:$0xff] %vm19_vm4, %v993_v17  ;;  %v169_v21 = vld [vmem:[#allocation2 + $0x220] sm:$0xff] }
 0x132   :  { %v1287_v26 = vadd.f32 %v2675_v2, %v1199_v22  ;;  %1117 = vst.msk [vmem:[#allocation2 + $0x1f8] sm:$0xff] %vm19_vm4, %v1035_v19 }
 0x133   :  { %1651 = vst.msk [vmem:[%s3167_s3 + $0x48] sm:$0xf] %vm1632_vm5, %v1902_v23  ;;  %v1903_v29 = vpack.c.bf16 %v1245_v24, %v1245_v24  ;;  %1693 = vst.msk [vmem:[%s3167_s3 + $0xf0] sm:$0xf] %vm1632_vm5, %v1944_v25  ;;  %v128_v25 = vld [vmem:[#allocation2 + $0xd8] sm:$0xff] }
 0x134   :  { %v1945_v30 = vpack.c.bf16 %v1287_v26, %v1287_v26  ;;  %v734_v31 = vpop.f32.mrb[44].mxu0  ;;  %v902_v33 = vpop.f32.mrb[44].mxu1 }
 0x135   :  { %1652 = vst.msk [vmem:[%s3167_s3 + $0x4c] sm:$0xf] %vm1632_vm5, %v1903_v29  ;;  %v994_v35 = vadd.f32 %v734_v31, %v123_v27  ;;  %v2058_v36 = vpop.f32.mrb[45].mxu0  ;;  %v1036_v37 = vadd.f32 %v902_v33, %v165_v28  ;;  %v2142_v38 = vpop.f32.mrb[45].mxu1  ;;  %v170_v27 = vld [vmem:[#allocation2 + $0x228] sm:$0xff] }
 0x136   :  { %1694 = vst.msk [vmem:[%s3167_s3 + $0xf4] sm:$0xf] %vm1632_vm5, %v1945_v30  ;;  %v1158_v39 = vld [vmem:[#allocation2 + $0xa0] sm:$0xff]  ;;  %v1200_v40 = vld [vmem:[#allocation2 + $0x1f0] sm:$0xff]  ;;  %v737_v41 = vpop.f32.mrb[46].mxu0  ;;  %v905_v42 = vpop.f32.mrb[46].mxu1 }
 0x137   :  { %v1246_v43 = vadd.f32 %v2675_v2, %v1158_v39  ;;  %v1288_v44 = vadd.f32 %v2675_v2, %v1200_v40  ;;  %1076 = vst.msk [vmem:[#allocation2 + $0xb0] sm:$0xff] %vm19_vm4, %v994_v35  ;;  %v995_v45 = vadd.f32 %v737_v41, %v124_v32  ;;  %v2059_v46 = vpop.f32.mrb[47].mxu0  ;;  %1118 = vst.msk [vmem:[#allocation2 + $0x200] sm:$0xff] %vm19_vm4, %v1036_v37  ;;  %v2143_v48 = vpop.f32.mrb[47].mxu1 }
 0x138   :  { %v1037_v47 = vadd.f32 %v905_v42, %v166_v34  ;;  %v1159_v49 = vld [vmem:[#allocation2 + $0xa8] sm:$0xff]  ;;  %v129_v48 = vld [vmem:[#allocation2 + $0xe0] sm:$0xff] }
 0x139   :  { %v1201_v50 = vld [vmem:[#allocation2 + $0x1f8] sm:$0xff]  ;;  %v1904_v51 = vpack.c.bf16 %v1246_v43, %v1246_v43  ;;  %v1247_v52 = vadd.f32 %v2675_v2, %v1159_v49  ;;  %v1946_v53 = vpack.c.bf16 %v1288_v44, %v1288_v44  ;;  %1077 = vst.msk [vmem:[#allocation2 + $0xb8] sm:$0xff] %vm19_vm4, %v995_v45  ;;  %v171_v49 = vld [vmem:[#allocation2 + $0x230] sm:$0xff] }
 0x13a   :  { %v1289_v54 = vadd.f32 %v2675_v2, %v1201_v50  ;;  %1119 = vst.msk [vmem:[#allocation2 + $0x208] sm:$0xff] %vm19_vm4, %v1037_v47 }
 0x13b   :  { %1653 = vst.msk [vmem:[%s3167_s3 + $0x50] sm:$0xf] %vm1632_vm5, %v1904_v51  ;;  %v1905_v57 = vpack.c.bf16 %v1247_v52, %v1247_v52  ;;  %1695 = vst.msk [vmem:[%s3167_s3 + $0xf8] sm:$0xf] %vm1632_vm5, %v1946_v53  ;;  %v130_v53 = vld [vmem:[#allocation2 + $0xe8] sm:$0xff] }
 0x13c   :  { %v1947_v58 = vpack.c.bf16 %v1289_v54, %v1289_v54  ;;  %v742_v59 = vpop.f32.mrb[48].mxu0  ;;  %v910_v61 = vpop.f32.mrb[48].mxu1 }
 0x13d   :  { %1654 = vst.msk [vmem:[%s3167_s3 + $0x54] sm:$0xf] %vm1632_vm5, %v1905_v57  ;;  %v996_v63 = vadd.f32 %v742_v59, %v125_v55  ;;  %v2062_v0 = vpop.f32.mrb[49].mxu0  ;;  %v1038_v1 = vadd.f32 %v910_v61, %v167_v56  ;;  %v2146_v3 = vpop.f32.mrb[49].mxu1  ;;  %v172_v55 = vld [vmem:[#allocation2 + $0x238] sm:$0xff] }
 0x13e   :  { %1696 = vst.msk [vmem:[%s3167_s3 + $0xfc] sm:$0xf] %vm1632_vm5, %v1947_v58  ;;  %v1160_v4 = vld [vmem:[#allocation2 + $0xb0] sm:$0xff]  ;;  %v1202_v5 = vld [vmem:[#allocation2 + $0x200] sm:$0xff]  ;;  %v745_v6 = vpop.f32.mrb[50].mxu0  ;;  %v913_v7 = vpop.f32.mrb[50].mxu1 }
 0x13f   :  { %v1248_v8 = vadd.f32 %v2675_v2, %v1160_v4  ;;  %v1290_v9 = vadd.f32 %v2675_v2, %v1202_v5  ;;  %1078 = vst.msk [vmem:[#allocation2 + $0xc0] sm:$0xff] %vm19_vm4, %v996_v63  ;;  %v997_v10 = vadd.f32 %v745_v6, %v126_v60  ;;  %v2063_v11 = vpop.f32.mrb[51].mxu0  ;;  %1120 = vst.msk [vmem:[#allocation2 + $0x210] sm:$0xff] %vm19_vm4, %v1038_v1  ;;  %v2147_v13 = vpop.f32.mrb[51].mxu1 }
 0x140   :  { %v1039_v12 = vadd.f32 %v913_v7, %v168_v62  ;;  %v1161_v14 = vld [vmem:[#allocation2 + $0xb8] sm:$0xff]  ;;  %v131_v13 = vld [vmem:[#allocation2 + $0xf0] sm:$0xff] }
 0x141   :  { %v1203_v15 = vld [vmem:[#allocation2 + $0x208] sm:$0xff]  ;;  %v1906_v16 = vpack.c.bf16 %v1248_v8, %v1248_v8  ;;  %v1249_v17 = vadd.f32 %v2675_v2, %v1161_v14  ;;  %v1948_v18 = vpack.c.bf16 %v1290_v9, %v1290_v9  ;;  %1079 = vst.msk [vmem:[#allocation2 + $0xc8] sm:$0xff] %vm19_vm4, %v997_v10  ;;  %v173_v14 = vld [vmem:[#allocation2 + $0x240] sm:$0xff] }
 0x142   :  { %v1291_v19 = vadd.f32 %v2675_v2, %v1203_v15  ;;  %1121 = vst.msk [vmem:[#allocation2 + $0x218] sm:$0xff] %vm19_vm4, %v1039_v12 }
 0x143   :  { %1655 = vst.msk [vmem:[%s3167_s3 + $0x58] sm:$0xf] %vm1632_vm5, %v1906_v16  ;;  %v1907_v22 = vpack.c.bf16 %v1249_v17, %v1249_v17  ;;  %1697 = vst.msk [vmem:[%s3167_s3 + $0x100] sm:$0xf] %vm1632_vm5, %v1948_v18 }
 0x144   :  { %v1949_v23 = vpack.c.bf16 %v1291_v19, %v1291_v19  ;;  %v750_v24 = vpop.f32.mrb[52].mxu0  ;;  %v918_v26 = vpop.f32.mrb[52].mxu1  ;;  %v174_v19 = vld [vmem:[#allocation2 + $0x248] sm:$0xff] }
 0x145   :  { %1656 = vst.msk [vmem:[%s3167_s3 + $0x5c] sm:$0xf] %vm1632_vm5, %v1907_v22  ;;  %v998_v28 = vadd.f32 %v750_v24, %v127_v20  ;;  %v2066_v29 = vpop.f32.mrb[53].mxu0  ;;  %v1040_v30 = vadd.f32 %v918_v26, %v169_v21  ;;  %v2150_v31 = vpop.f32.mrb[53].mxu1 }
 0x146   :  { %1698 = vst.msk [vmem:[%s3167_s3 + $0x104] sm:$0xf] %vm1632_vm5, %v1949_v23  ;;  %v1162_v32 = vld [vmem:[#allocation2 + $0xc0] sm:$0xff]  ;;  %v1204_v33 = vld [vmem:[#allocation2 + $0x210] sm:$0xff]  ;;  %v753_v34 = vpop.f32.mrb[54].mxu0  ;;  %v921_v35 = vpop.f32.mrb[54].mxu1 }
 0x147   :  { %v1250_v36 = vadd.f32 %v2675_v2, %v1162_v32  ;;  %v1292_v37 = vadd.f32 %v2675_v2, %v1204_v33  ;;  %1080 = vst.msk [vmem:[#allocation2 + $0xd0] sm:$0xff] %vm19_vm4, %v998_v28  ;;  %v999_v38 = vadd.f32 %v753_v34, %v128_v25  ;;  %v2067_v39 = vpop.f32.mrb[55].mxu0  ;;  %1122 = vst.msk [vmem:[#allocation2 + $0x220] sm:$0xff] %vm19_vm4, %v1040_v30  ;;  %v2151_v41 = vpop.f32.mrb[55].mxu1  ;;  %v3016_v28 = vld [vmem:[%s3166_s2] ss:$0 sm:$0xff] }
 0x148   :  { %v1041_v40 = vadd.f32 %v921_v35, %v170_v27  ;;  %v1163_v42 = vld [vmem:[#allocation2 + $0xc8] sm:$0xff]  ;;  %v133_v41 = vld [vmem:[#allocation2 + $0x100] sm:$0xff] }
 0x149   :  { %v1205_v43 = vld [vmem:[#allocation2 + $0x218] sm:$0xff]  ;;  %v1908_v44 = vpack.c.bf16 %v1250_v36, %v1250_v36  ;;  %v1251_v45 = vadd.f32 %v2675_v2, %v1163_v42  ;;  %v1950_v46 = vpack.c.bf16 %v1292_v37, %v1292_v37  ;;  %1081 = vst.msk [vmem:[#allocation2 + $0xd8] sm:$0xff] %vm19_vm4, %v999_v38  ;;  %v175_v42 = vld [vmem:[#allocation2 + $0x250] sm:$0xff] }
 0x14a   :  { %v1293_v47 = vadd.f32 %v2675_v2, %v1205_v43  ;;  %1123 = vst.msk [vmem:[#allocation2 + $0x228] sm:$0xff] %vm19_vm4, %v1041_v40 }
 0x14b   :  { %1657 = vst.msk [vmem:[%s3167_s3 + $0x60] sm:$0xf] %vm1632_vm5, %v1908_v44  ;;  %v1909_v50 = vpack.c.bf16 %v1251_v45, %v1251_v45  ;;  %1699 = vst.msk [vmem:[%s3167_s3 + $0x108] sm:$0xf] %vm1632_vm5, %v1950_v46  ;;  %v134_v46 = vld [vmem:[#allocation2 + $0x108] sm:$0xff] }
 0x14c   :  { %v1951_v51 = vpack.c.bf16 %v1293_v47, %v1293_v47  ;;  %v758_v52 = vpop.f32.mrb[56].mxu0  ;;  %v926_v54 = vpop.f32.mrb[56].mxu1 }
 0x14d   :  { %1658 = vst.msk [vmem:[%s3167_s3 + $0x64] sm:$0xf] %vm1632_vm5, %v1909_v50  ;;  %v1000_v56 = vadd.f32 %v758_v52, %v129_v48  ;;  %v2070_v57 = vpop.f32.mrb[57].mxu0  ;;  %v1042_v58 = vadd.f32 %v926_v54, %v171_v49  ;;  %v2154_v59 = vpop.f32.mrb[57].mxu1  ;;  %v176_v48 = vld [vmem:[#allocation2 + $0x258] sm:$0xff] }
 0x14e   :  { %1700 = vst.msk [vmem:[%s3167_s3 + $0x10c] sm:$0xf] %vm1632_vm5, %v1951_v51  ;;  %v1164_v60 = vld [vmem:[#allocation2 + $0xd0] sm:$0xff]  ;;  %v1206_v61 = vld [vmem:[#allocation2 + $0x220] sm:$0xff]  ;;  %v761_v62 = vpop.f32.mrb[58].mxu0  ;;  %v929_v63 = vpop.f32.mrb[58].mxu1 }
 0x14f   :  { %v1252_v0 = vadd.f32 %v2675_v2, %v1164_v60  ;;  %v1294_v1 = vadd.f32 %v2675_v2, %v1206_v61  ;;  %1082 = vst.msk [vmem:[#allocation2 + $0xe0] sm:$0xff] %vm19_vm4, %v1000_v56  ;;  %v1001_v3 = vadd.f32 %v761_v62, %v130_v53  ;;  %v2071_v4 = vpop.f32.mrb[59].mxu0  ;;  %1124 = vst.msk [vmem:[#allocation2 + $0x230] sm:$0xff] %vm19_vm4, %v1042_v58  ;;  %v2155_v6 = vpop.f32.mrb[59].mxu1 }
 0x150   :  { %v1043_v5 = vadd.f32 %v929_v63, %v172_v55  ;;  %v1165_v7 = vld [vmem:[#allocation2 + $0xd8] sm:$0xff]  ;;  %v135_v6 = vld [vmem:[#allocation2 + $0x110] sm:$0xff] }
 0x151   :  { %v1207_v8 = vld [vmem:[#allocation2 + $0x228] sm:$0xff]  ;;  %v1910_v9 = vpack.c.bf16 %v1252_v0, %v1252_v0  ;;  %v1253_v10 = vadd.f32 %v2675_v2, %v1165_v7  ;;  %v1952_v11 = vpack.c.bf16 %v1294_v1, %v1294_v1  ;;  %1083 = vst.msk [vmem:[#allocation2 + $0xe8] sm:$0xff] %vm19_vm4, %v1001_v3  ;;  %v177_v7 = vld [vmem:[#allocation2 + $0x260] sm:$0xff] }
 0x152   :  { %v1295_v12 = vadd.f32 %v2675_v2, %v1207_v8  ;;  %1125 = vst.msk [vmem:[#allocation2 + $0x238] sm:$0xff] %vm19_vm4, %v1043_v5  ;;  %v132_v2 = vld [vmem:[#allocation2 + $0xf8] sm:$0xff] }
 0x153   :  { %1659 = vst.msk [vmem:[%s3167_s3 + $0x68] sm:$0xf] %vm1632_vm5, %v1910_v9  ;;  %v1911_v15 = vpack.c.bf16 %v1253_v10, %v1253_v10  ;;  %1701 = vst.msk [vmem:[%s3167_s3 + $0x110] sm:$0xf] %vm1632_vm5, %v1952_v11  ;;  %v136_v11 = vld [vmem:[#allocation2 + $0x118] sm:$0xff] }
 0x154   :  { %v1953_v16 = vpack.c.bf16 %v1295_v12, %v1295_v12  ;;  %v766_v17 = vpop.f32.mrb[60].mxu0  ;;  %v934_v18 = vpop.f32.mrb[60].mxu1 }
 0x155   :  { %1660 = vst.msk [vmem:[%s3167_s3 + $0x6c] sm:$0xf] %vm1632_vm5, %v1911_v15  ;;  %v1002_v20 = vadd.f32 %v766_v17, %v131_v13  ;;  %v2074_v21 = vpop.f32.mrb[61].mxu0  ;;  %v1044_v22 = vadd.f32 %v934_v18, %v173_v14  ;;  %v2158_v23 = vpop.f32.mrb[61].mxu1  ;;  %v178_v13 = vld [vmem:[#allocation2 + $0x268] sm:$0xff] }
 0x156   :  { %1702 = vst.msk [vmem:[%s3167_s3 + $0x114] sm:$0xf] %vm1632_vm5, %v1953_v16  ;;  %v1166_v24 = vld [vmem:[#allocation2 + $0xe0] sm:$0xff]  ;;  %v1208_v25 = vld [vmem:[#allocation2 + $0x230] sm:$0xff]  ;;  %v769_v26 = vpop.f32.mrb[62].mxu0  ;;  %v937_v27 = vpop.f32.mrb[62].mxu1 }
 0x157   :  { %v1254_v29 = vadd.f32 %v3016_v28, %v1166_v24  ;;  %v1296_v30 = vadd.f32 %v3016_v28, %v1208_v25  ;;  %1084 = vst.msk [vmem:[#allocation2 + $0xf0] sm:$0xff] %vm19_vm4, %v1002_v20  ;;  %v1003_v31 = vadd.f32 %v769_v26, %v132_v2  ;;  %v2075_v32 = vpop.f32.mrb[63].mxu0  ;;  %1126 = vst.msk [vmem:[#allocation2 + $0x240] sm:$0xff] %vm19_vm4, %v1044_v22  ;;  %v2159_v34 = vpop.f32.mrb[63].mxu1 }
 0x158   :  { %v1045_v33 = vadd.f32 %v937_v27, %v174_v19  ;;  %v1167_v35 = vld [vmem:[#allocation2 + $0xe8] sm:$0xff]  ;;  %v137_v34 = vld [vmem:[#allocation2 + $0x120] sm:$0xff] }
 0x159   :  { %v1209_v36 = vld [vmem:[#allocation2 + $0x238] sm:$0xff]  ;;  %v1912_v37 = vpack.c.bf16 %v1254_v29, %v1254_v29  ;;  %v1255_v38 = vadd.f32 %v3016_v28, %v1167_v35  ;;  %v1954_v39 = vpack.c.bf16 %v1296_v30, %v1296_v30  ;;  %1085 = vst.msk [vmem:[#allocation2 + $0xf8] sm:$0xff] %vm19_vm4, %v1003_v31  ;;  %v179_v35 = vld [vmem:[#allocation2 + $0x270] sm:$0xff] }
 0x15a   :  { %v1297_v40 = vadd.f32 %v3016_v28, %v1209_v36  ;;  %1127 = vst.msk [vmem:[#allocation2 + $0x248] sm:$0xff] %vm19_vm4, %v1045_v33 }
 0x15b   :  { %1661 = vst.msk [vmem:[%s3167_s3 + $0x70] sm:$0xf] %vm1632_vm5, %v1912_v37  ;;  %v1913_v43 = vpack.c.bf16 %v1255_v38, %v1255_v38  ;;  %1703 = vst.msk [vmem:[%s3167_s3 + $0x118] sm:$0xf] %vm1632_vm5, %v1954_v39  ;;  %v138_v39 = vld [vmem:[#allocation2 + $0x128] sm:$0xff] }
 0x15c   :  { %v1955_v44 = vpack.c.bf16 %v1297_v40, %v1297_v40  ;;  %v774_v45 = vpop.f32.mrb[64].mxu0  ;;  %v942_v47 = vpop.f32.mrb[64].mxu1 }
 0x15d   :  { %1662 = vst.msk [vmem:[%s3167_s3 + $0x74] sm:$0xf] %vm1632_vm5, %v1913_v43  ;;  %v1004_v49 = vadd.f32 %v774_v45, %v133_v41  ;;  %v2078_v50 = vpop.f32.mrb[65].mxu0  ;;  %v1046_v51 = vadd.f32 %v942_v47, %v175_v42  ;;  %v2162_v52 = vpop.f32.mrb[65].mxu1  ;;  %v180_v41 = vld [vmem:[#allocation2 + $0x278] sm:$0xff] }
 0x15e   :  { %1704 = vst.msk [vmem:[%s3167_s3 + $0x11c] sm:$0xf] %vm1632_vm5, %v1955_v44  ;;  %v1168_v53 = vld [vmem:[#allocation2 + $0xf0] sm:$0xff]  ;;  %v1210_v54 = vld [vmem:[#allocation2 + $0x240] sm:$0xff]  ;;  %v777_v55 = vpop.f32.mrb[66].mxu0  ;;  %v945_v56 = vpop.f32.mrb[66].mxu1 }
 0x15f   :  { %v1256_v57 = vadd.f32 %v3016_v28, %v1168_v53  ;;  %v1298_v58 = vadd.f32 %v3016_v28, %v1210_v54  ;;  %1086 = vst.msk [vmem:[#allocation2 + $0x100] sm:$0xff] %vm19_vm4, %v1004_v49  ;;  %v1005_v59 = vadd.f32 %v777_v55, %v134_v46  ;;  %v2079_v60 = vpop.f32.mrb[67].mxu0  ;;  %1128 = vst.msk [vmem:[#allocation2 + $0x250] sm:$0xff] %vm19_vm4, %v1046_v51  ;;  %v2163_v62 = vpop.f32.mrb[67].mxu1 }
 0x160   :  { %v1047_v61 = vadd.f32 %v945_v56, %v176_v48  ;;  %v1169_v63 = vld [vmem:[#allocation2 + $0xf8] sm:$0xff]  ;;  %v139_v62 = vld [vmem:[#allocation2 + $0x130] sm:$0xff] }
 0x161   :  { %v1211_v0 = vld [vmem:[#allocation2 + $0x248] sm:$0xff]  ;;  %v1914_v1 = vpack.c.bf16 %v1256_v57, %v1256_v57  ;;  %v1257_v3 = vadd.f32 %v3016_v28, %v1169_v63  ;;  %v1956_v4 = vpack.c.bf16 %v1298_v58, %v1298_v58  ;;  %1087 = vst.msk [vmem:[#allocation2 + $0x108] sm:$0xff] %vm19_vm4, %v1005_v59  ;;  %v181_v63 = vld [vmem:[#allocation2 + $0x280] sm:$0xff] }
 0x162   :  { %v1299_v5 = vadd.f32 %v3016_v28, %v1211_v0  ;;  %1129 = vst.msk [vmem:[#allocation2 + $0x258] sm:$0xff] %vm19_vm4, %v1047_v61 }
 0x163   :  { %1663 = vst.msk [vmem:[%s3167_s3 + $0x78] sm:$0xf] %vm1632_vm5, %v1914_v1  ;;  %v1915_v8 = vpack.c.bf16 %v1257_v3, %v1257_v3  ;;  %1705 = vst.msk [vmem:[%s3167_s3 + $0x120] sm:$0xf] %vm1632_vm5, %v1956_v4  ;;  %v140_v4 = vld [vmem:[#allocation2 + $0x138] sm:$0xff] }
 0x164   :  { %v1957_v9 = vpack.c.bf16 %v1299_v5, %v1299_v5  ;;  %v782_v10 = vpop.f32.mrb[68].mxu0  ;;  %v950_v12 = vpop.f32.mrb[68].mxu1 }
 0x165   :  { %1664 = vst.msk [vmem:[%s3167_s3 + $0x7c] sm:$0xf] %vm1632_vm5, %v1915_v8  ;;  %v1006_v14 = vadd.f32 %v782_v10, %v135_v6  ;;  %v2082_v15 = vpop.f32.mrb[69].mxu0  ;;  %v1048_v16 = vadd.f32 %v950_v12, %v177_v7  ;;  %v2166_v17 = vpop.f32.mrb[69].mxu1 }
 0x166   :  { %1706 = vst.msk [vmem:[%s3167_s3 + $0x124] sm:$0xf] %vm1632_vm5, %v1957_v9  ;;  %v1170_v2 = vld [vmem:[#allocation2 + $0x100] sm:$0xff]  ;;  %v1212_v18 = vld [vmem:[#allocation2 + $0x250] sm:$0xff]  ;;  %v785_v19 = vpop.f32.mrb[70].mxu0  ;;  %v953_v20 = vpop.f32.mrb[70].mxu1 }
 0x167   :  { %v1258_v21 = vadd.f32 %v3016_v28, %v1170_v2  ;;  %v1300_v22 = vadd.f32 %v3016_v28, %v1212_v18  ;;  %1088 = vst.msk [vmem:[#allocation2 + $0x110] sm:$0xff] %vm19_vm4, %v1006_v14  ;;  %v1007_v23 = vadd.f32 %v785_v19, %v136_v11  ;;  %v2083_v24 = vpop.f32.mrb[71].mxu0  ;;  %1130 = vst.msk [vmem:[#allocation2 + $0x260] sm:$0xff] %vm19_vm4, %v1048_v16  ;;  %v2167_v26 = vpop.f32.mrb[71].mxu1 }
 0x168   :  { %v1049_v25 = vadd.f32 %v953_v20, %v178_v13  ;;  %v1171_v27 = vld [vmem:[#allocation2 + $0x108] sm:$0xff]  ;;  %v141_v24 = vld [vmem:[#allocation2 + $0x140] sm:$0xff] }
 0x169   :  { %v1213_v29 = vld [vmem:[#allocation2 + $0x258] sm:$0xff]  ;;  %v1916_v30 = vpack.c.bf16 %v1258_v21, %v1258_v21  ;;  %v1259_v31 = vadd.f32 %v3016_v28, %v1171_v27  ;;  %v1958_v32 = vpack.c.bf16 %v1300_v22, %v1300_v22  ;;  %1089 = vst.msk [vmem:[#allocation2 + $0x118] sm:$0xff] %vm19_vm4, %v1007_v23 }
 0x16a   :  { %v1301_v33 = vadd.f32 %v3016_v28, %v1213_v29  ;;  %1131 = vst.msk [vmem:[#allocation2 + $0x268] sm:$0xff] %vm19_vm4, %v1049_v25  ;;  %v142_v29 = vld [vmem:[#allocation2 + $0x148] sm:$0xff] }
 0x16b   :  { %1665 = vst.msk [vmem:[%s3167_s3 + $0x80] sm:$0xf] %vm1632_vm5, %v1916_v30  ;;  %v1917_v36 = vpack.c.bf16 %v1259_v31, %v1259_v31  ;;  %1707 = vst.msk [vmem:[%s3167_s3 + $0x128] sm:$0xf] %vm1632_vm5, %v1958_v32 }
 0x16c   :  { %v1959_v37 = vpack.c.bf16 %v1301_v33, %v1301_v33  ;;  %v790_v38 = vpop.f32.mrb[72].mxu0  ;;  %v958_v40 = vpop.f32.mrb[72].mxu1 }
 0x16d   :  { %1666 = vst.msk [vmem:[%s3167_s3 + $0x84] sm:$0xf] %vm1632_vm5, %v1917_v36  ;;  %v1008_v42 = vadd.f32 %v790_v38, %v137_v34  ;;  %v2086_v43 = vpop.f32.mrb[73].mxu0  ;;  %v1050_v44 = vadd.f32 %v958_v40, %v179_v35  ;;  %v2170_v45 = vpop.f32.mrb[73].mxu1 }
 0x16e   :  { %1708 = vst.msk [vmem:[%s3167_s3 + $0x12c] sm:$0xf] %vm1632_vm5, %v1959_v37  ;;  %v1172_v46 = vld [vmem:[#allocation2 + $0x110] sm:$0xff]  ;;  %v1214_v47 = vld [vmem:[#allocation2 + $0x260] sm:$0xff]  ;;  %v793_v48 = vpop.f32.mrb[74].mxu0  ;;  %v961_v49 = vpop.f32.mrb[74].mxu1 }
 0x16f   :  { %v1260_v50 = vadd.f32 %v3016_v28, %v1172_v46  ;;  %v1302_v51 = vadd.f32 %v3016_v28, %v1214_v47  ;;  %1090 = vst.msk [vmem:[#allocation2 + $0x120] sm:$0xff] %vm19_vm4, %v1008_v42  ;;  %v1009_v52 = vadd.f32 %v793_v48, %v138_v39  ;;  %v2087_v53 = vpop.f32.mrb[75].mxu0  ;;  %1132 = vst.msk [vmem:[#allocation2 + $0x270] sm:$0xff] %vm19_vm4, %v1050_v44  ;;  %v2171_v55 = vpop.f32.mrb[75].mxu1 }
 0x170   :  { %v1051_v54 = vadd.f32 %v961_v49, %v180_v41  ;;  %v1173_v56 = vld [vmem:[#allocation2 + $0x118] sm:$0xff] }
 0x171   :  { %v1215_v57 = vld [vmem:[#allocation2 + $0x268] sm:$0xff]  ;;  %v1918_v58 = vpack.c.bf16 %v1260_v50, %v1260_v50  ;;  %v1261_v59 = vadd.f32 %v3016_v28, %v1173_v56  ;;  %v1960_v60 = vpack.c.bf16 %v1302_v51, %v1302_v51  ;;  %1091 = vst.msk [vmem:[#allocation2 + $0x128] sm:$0xff] %vm19_vm4, %v1009_v52 }
 0x172   :  { %v1303_v61 = vadd.f32 %v3016_v28, %v1215_v57  ;;  %1133 = vst.msk [vmem:[#allocation2 + $0x278] sm:$0xff] %vm19_vm4, %v1051_v54 }
 0x173   :  { %1667 = vst.msk [vmem:[%s3167_s3 + $0x88] sm:$0xf] %vm1632_vm5, %v1918_v58  ;;  %v1919_v0 = vpack.c.bf16 %v1261_v59, %v1261_v59  ;;  %1709 = vst.msk [vmem:[%s3167_s3 + $0x130] sm:$0xf] %vm1632_vm5, %v1960_v60 }
 0x174   :  { %v1961_v1 = vpack.c.bf16 %v1303_v61, %v1303_v61  ;;  %v798_v3 = vpop.f32.mrb[76].mxu0  ;;  %v966_v5 = vpop.f32.mrb[76].mxu1 }
 0x175   :  { %1668 = vst.msk [vmem:[%s3167_s3 + $0x8c] sm:$0xf] %vm1632_vm5, %v1919_v0  ;;  %v1010_v6 = vadd.f32 %v798_v3, %v139_v62  ;;  %v2090_v7 = vpop.f32.mrb[77].mxu0  ;;  %v1052_v8 = vadd.f32 %v966_v5, %v181_v63  ;;  %v2174_v9 = vpop.f32.mrb[77].mxu1 }
 0x176   :  { %1710 = vst.msk [vmem:[%s3167_s3 + $0x134] sm:$0xf] %vm1632_vm5, %v1961_v1  ;;  %v1174_v10 = vld [vmem:[#allocation2 + $0x120] sm:$0xff]  ;;  %v1216_v11 = vld [vmem:[#allocation2 + $0x270] sm:$0xff]  ;;  %v801_v12 = vpop.f32.mrb[78].mxu0  ;;  %v969_v13 = vpop.f32.mrb[78].mxu1 }
 0x177   :  { %v1262_v14 = vadd.f32 %v3016_v28, %v1174_v10  ;;  %v1304_v15 = vadd.f32 %v3016_v28, %v1216_v11  ;;  %1092 = vst.msk [vmem:[#allocation2 + $0x130] sm:$0xff] %vm19_vm4, %v1010_v6  ;;  %v1011_v16 = vadd.f32 %v801_v12, %v140_v4  ;;  %v2091_v17 = vpop.f32.mrb[79].mxu0  ;;  %1134 = vst.msk [vmem:[#allocation2 + $0x280] sm:$0xff] %vm19_vm4, %v1052_v8  ;;  %v2175_v2 = vpop.f32.mrb[79].mxu1 }
 0x178   :  { %v1175_v18 = vld [vmem:[#allocation2 + $0x128] sm:$0xff] }
 0x179   :  { %v1217_v19 = vld [vmem:[#allocation2 + $0x278] sm:$0xff]  ;;  %v1920_v20 = vpack.c.bf16 %v1262_v14, %v1262_v14  ;;  %v1263_v21 = vadd.f32 %v3016_v28, %v1175_v18  ;;  %v1962_v22 = vpack.c.bf16 %v1304_v15, %v1304_v15  ;;  %1093 = vst.msk [vmem:[#allocation2 + $0x138] sm:$0xff] %vm19_vm4, %v1011_v16 }
 0x17a   :  { %v1305_v23 = vadd.f32 %v3016_v28, %v1217_v19 }
 0x17b   :  { %1669 = vst.msk [vmem:[%s3167_s3 + $0x90] sm:$0xf] %vm1632_vm5, %v1920_v20  ;;  %v1921_v25 = vpack.c.bf16 %v1263_v21, %v1263_v21  ;;  %1711 = vst.msk [vmem:[%s3167_s3 + $0x138] sm:$0xf] %vm1632_vm5, %v1962_v22 }
 0x17c   :  { %v1963_v26 = vpack.c.bf16 %v1305_v23, %v1305_v23  ;;  %v806_v27 = vpop.f32.mrb[80].mxu0 }
 0x17d   :  { %1670 = vst.msk [vmem:[%s3167_s3 + $0x94] sm:$0xf] %vm1632_vm5, %v1921_v25  ;;  %v1012_v30 = vadd.f32 %v806_v27, %v141_v24  ;;  %v2094_v31 = vpop.f32.mrb[81].mxu0 }
 0x17e   :  { %1712 = vst.msk [vmem:[%s3167_s3 + $0x13c] sm:$0xf] %vm1632_vm5, %v1963_v26  ;;  %v1176_v32 = vld [vmem:[#allocation2 + $0x130] sm:$0xff]  ;;  %v1218_v33 = vld [vmem:[#allocation2 + $0x280] sm:$0xff]  ;;  %v809_v34 = vpop.f32.mrb[82].mxu0 }
 0x17f   :  { %v1264_v35 = vadd.f32 %v3016_v28, %v1176_v32  ;;  %v1306_v36 = vadd.f32 %v3016_v28, %v1218_v33  ;;  %1094 = vst.msk [vmem:[#allocation2 + $0x140] sm:$0xff] %vm19_vm4, %v1012_v30  ;;  %v1013_v37 = vadd.f32 %v809_v34, %v142_v29  ;;  %v2095_v38 = vpop.f32.mrb[83].mxu0 }
 0x180   :  { %v1177_v39 = vld [vmem:[#allocation2 + $0x138] sm:$0xff] }
 0x181   :  { %v1922_v40 = vpack.c.bf16 %v1264_v35, %v1264_v35  ;;  %v1265_v41 = vadd.f32 %v3016_v28, %v1177_v39  ;;  %v1964_v42 = vpack.c.bf16 %v1306_v36, %v1306_v36  ;;  %1095 = vst.msk [vmem:[#allocation2 + $0x148] sm:$0xff] %vm19_vm4, %v1013_v37 }
 0x183   :  { %1671 = vst.msk [vmem:[%s3167_s3 + $0x98] sm:$0xf] %vm1632_vm5, %v1922_v40  ;;  %v1923_v43 = vpack.c.bf16 %v1265_v41, %v1265_v41  ;;  %1713 = vst.msk [vmem:[%s3167_s3 + $0x140] sm:$0xf] %vm1632_vm5, %v1964_v42 }
 0x185   :  { %1672 = vst.msk [vmem:[%s3167_s3 + $0x9c] sm:$0xf] %vm1632_vm5, %v1923_v43 }
 0x186   :  { %v1178_v44 = vld [vmem:[#allocation2 + $0x140] sm:$0xff] }
 0x187   :  { %v1266_v45 = vadd.f32 %v3016_v28, %v1178_v44 }
 0x188   :  { %v1179_v46 = vld [vmem:[#allocation2 + $0x148] sm:$0xff] }
 0x189   :  { %v1924_v47 = vpack.c.bf16 %v1266_v45, %v1266_v45  ;;  %v1267_v48 = vadd.f32 %v3016_v28, %v1179_v46 }
 0x18b   :  { %1673 = vst.msk [vmem:[%s3167_s3 + $0xa0] sm:$0xf] %vm1632_vm5, %v1924_v47  ;;  %v1925_v49 = vpack.c.bf16 %v1267_v48, %v1267_v48 }
 0x18d   :  { %1674 = vst.msk [vmem:[%s3167_s3 + $0xa4] sm:$0xf] %vm1632_vm5, %v1925_v49 }

// kernel: convnn_forward.10
= control target key start
LH: loop header
LB: loop body
LE: loop exit
PB: predicated region body
PF: predicated region fallthrough
CT: control target
= control target key end

     0   :  { %vm19_vm0 = vcmask 261120   ;;  %v1030_v0 = vmov 0   ;;  %v1031_v2 = vmov 0.0   ;;  %vm327_vm1 = vcmask 130048   ;;  %s1458_s1 = inlined_call_operand.vmem [shape: bf16[144,32], index: 1, kind: input, shape index: {}]   ;;  %s1459_s0 = inlined_call_operand.vmem [shape: bf16[242,144], index: 0, kind: input, shape index: {}]   ;;  %s1460_s2 = inlined_call_operand.vmem [shape: f32[1,32], index: 2, kind: input, shape index: {}]   ;;  %s1461_s3 = inlined_call_operand.vmem [shape: bf16[242,32], index: 3, kind: output, shape index: {}]  }
   0x1   :  { %376 = vmatprep.subr.bf16.mxu0 %v1030_v0  ;;  %954 = vmatprep.subr.bf16.mxu1 %v1030_v0  ;;  %v974_v1 = vld [vmem:[%s1458_s1] sm:$0xff]   ;;  %20 = vst.msk [vmem:[#allocation2] sm:$0xff] %vm19_vm0, %v1031_v2  ;;  %21 = vst.msk [vmem:[#allocation2 + $0x8] sm:$0xff] %vm19_vm0, %v1031_v2  ;;  %v975_v3 = vld [vmem:[%s1458_s1 + $0x8] sm:$0xff]   ;;  %vm50_vm2 = vcmask 254976   ;;  %vm797_vm3 = vcmask 257024  }
   0x2   :  { %22 = vst.msk [vmem:[#allocation2 + $0x10] sm:$0xff] %vm19_vm0, %v1031_v2  ;;  %23 = vst.msk [vmem:[#allocation2 + $0x18] sm:$0xff] %vm19_vm0, %v1031_v2  ;;  %377 = vmatpush1.bf16.msra.mxu0 %v974_v1  ;;  %963 = vmatpush1.bf16.msra.mxu1 %v974_v1  ;;  %v976_v4 = vld [vmem:[%s1458_s1 + $0x10] sm:$0xff]   ;;  %v977_v5 = vld [vmem:[%s1458_s1 + $0x18] sm:$0xff]   ;;  %vm828_vm4 = vcmask 253952  }
   0x3   :  { %24 = vst.msk [vmem:[#allocation2 + $0x20] sm:$0xff] %vm19_vm0, %v1031_v2  ;;  %25 = vst.msk [vmem:[#allocation2 + $0x28] sm:$0xff] %vm19_vm0, %v1031_v2  ;;  %378 = vmatprep.subr.bf16.mxu0 %v1030_v0  ;;  %955 = vmatprep.subr.bf16.mxu1 %v1030_v0  ;;  %v985_v6 = vld [vmem:[%s1459_s0 + $0x4] ss:$8 sps:$4 sm:$0xff]   ;;  %v980_v10 = vld [vmem:[%s1458_s1 + $0x30] sm:$0xff]  }
   0x4   :  { %26 = vst.msk [vmem:[#allocation2 + $0x30] sm:$0xff] %vm19_vm0, %v1031_v2  ;;  %27 = vst.msk [vmem:[#allocation2 + $0x38] sm:$0xff] %vm19_vm0, %v1031_v2  ;;  %v988_v7 = vld [vmem:[%s1459_s0 + $0x84] ss:$8 sps:$4 sm:$0xff]   ;;  %875 = vmatprep.mubr.msk.bf16.mxu0 %vm327_vm1, %v985_v6  ;;  %v981_v11 = vld [vmem:[%s1458_s1 + $0x38] sm:$0xff]  }
   0x5   :  { %28 = vst.msk [vmem:[#allocation2 + $0x40] sm:$0xff] %vm19_vm0, %v1031_v2  ;;  %29 = vst.msk [vmem:[#allocation2 + $0x48] sm:$0xff] %vm19_vm0, %v1031_v2  ;;  %883 = vmatprep.mubr.msk.bf16.mxu1 %vm327_vm1, %v988_v7  ;;  %v978_v8 = vld [vmem:[%s1458_s1 + $0x20] sm:$0xff]   ;;  %v979_v9 = vld [vmem:[%s1458_s1 + $0x28] sm:$0xff]  }
   0x6   :  { %30 = vst.msk [vmem:[#allocation2 + $0x50] sm:$0xff] %vm19_vm0, %v1031_v2  ;;  %31 = vst.msk [vmem:[#allocation2 + $0x58] sm:$0xff] %vm19_vm0, %v1031_v2  ;;  %379 = vmatpush1.bf16.msra.mxu0 %v975_v3  ;;  %964 = vmatpush1.bf16.msra.mxu1 %v975_v3  ;;  %v982_v12 = vld [vmem:[%s1458_s1 + $0x40] sm:$0xff]   ;;  %v989_v15 = vld [vmem:[%s1459_s0 + $0x14] ss:$8 sps:$4 sm:$0xff]  }
   0x7   :  { %32 = vst.msk [vmem:[#allocation2 + $0x60] sm:$0xff] %vm19_vm0, %v1031_v2  ;;  %33 = vst.msk [vmem:[#allocation2 + $0x68] sm:$0xff] %vm19_vm0, %v1031_v2  ;;  %380 = vmatprep.subr.bf16.mxu0 %v1030_v0  ;;  %956 = vmatprep.subr.bf16.mxu1 %v1030_v0  ;;  %v983_v13 = vld [vmem:[%s1459_s0] ss:$8 sps:$4 sm:$0xff]   ;;  %v991_v16 = vld [vmem:[%s1459_s0 + $0x94] ss:$8 sps:$4 sm:$0xff]  }
   0x8   :  { %34 = vst.msk [vmem:[#allocation2 + $0x70] sm:$0xff] %vm19_vm0, %v1031_v2  ;;  %35 = vst.msk [vmem:[#allocation2 + $0x78] sm:$0xff] %vm19_vm0, %v1031_v2  ;;  %v986_v14 = vld [vmem:[%s1459_s0 + $0x80] ss:$8 sps:$4 sm:$0xff]   ;;  %v993_v17 = vld [vmem:[%s1459_s0 + $0x10] ss:$8 sps:$4 sm:$0xff]  }
   0x9   :  { %36 = vst.msk [vmem:[#allocation2 + $0x80] sm:$0xff] %vm19_vm0, %v1031_v2  ;;  %37 = vst.msk [vmem:[#allocation2 + $0x88] sm:$0xff] %vm19_vm0, %v1031_v2  ;;  %v994_v18 = vld [vmem:[%s1459_s0 + $0x90] ss:$8 sps:$4 sm:$0xff]   ;;  %v995_v19 = vld [vmem:[%s1459_s0 + $0x24] ss:$8 sps:$4 sm:$0xff]  }
   0xa   :  { %38 = vst.msk [vmem:[#allocation2 + $0x90] sm:$0xff] %vm19_vm0, %v1031_v2  ;;  %39 = vst.msk [vmem:[#allocation2 + $0x98] sm:$0xff] %vm19_vm0, %v1031_v2  ;;  %381 = vmatpush1.bf16.msra.mxu0 %v976_v4  ;;  %965 = vmatpush1.bf16.msra.mxu1 %v976_v4  ;;  %v997_v20 = vld [vmem:[%s1459_s0 + $0xa4] ss:$8 sps:$4 sm:$0xff]   ;;  %v999_v21 = vld [vmem:[%s1459_s0 + $0x20] ss:$8 sps:$4 sm:$0xff]  }
   0xb   :  { %40 = vst.msk [vmem:[#allocation2 + $0xa0] sm:$0xff] %vm19_vm0, %v1031_v2  ;;  %41 = vst.msk [vmem:[#allocation2 + $0xa8] sm:$0xff] %vm19_vm0, %v1031_v2  ;;  %382 = vmatprep.subr.bf16.mxu0 %v1030_v0  ;;  %957 = vmatprep.subr.bf16.mxu1 %v1030_v0  ;;  %v1000_v22 = vld [vmem:[%s1459_s0 + $0xa0] ss:$8 sps:$4 sm:$0xff]   ;;  %v1001_v23 = vld [vmem:[%s1459_s0 + $0x34] ss:$8 sps:$4 sm:$0xff]  }
   0xc   :  { %42 = vst.msk [vmem:[#allocation2 + $0xb0] sm:$0xff] %vm19_vm0, %v1031_v2  ;;  %43 = vst.msk [vmem:[#allocation2 + $0xb8] sm:$0xff] %vm19_vm0, %v1031_v2  ;;  %v1003_v24 = vld [vmem:[%s1459_s0 + $0xb4] ss:$8 sps:$4 sm:$0xff]   ;;  %v1005_v25 = vld [vmem:[%s1459_s0 + $0x30] ss:$8 sps:$4 sm:$0xff]  }
   0xd   :  { %44 = vst.msk [vmem:[#allocation2 + $0xc0] sm:$0xff] %vm19_vm0, %v1031_v2  ;;  %45 = vst.msk [vmem:[#allocation2 + $0xc8] sm:$0xff] %vm19_vm0, %v1031_v2  ;;  %v1006_v26 = vld [vmem:[%s1459_s0 + $0xb0] ss:$8 sps:$4 sm:$0xff]   ;;  %v1007_v27 = vld [vmem:[%s1459_s0 + $0x44] ss:$8 sps:$4 sm:$0xff]  }
   0xe   :  { %46 = vst.msk [vmem:[#allocation2 + $0xd0] sm:$0xff] %vm19_vm0, %v1031_v2  ;;  %47 = vst.msk [vmem:[#allocation2 + $0xd8] sm:$0xff] %vm19_vm0, %v1031_v2  ;;  %383 = vmatpush1.bf16.msra.mxu0 %v977_v5  ;;  %966 = vmatpush1.bf16.msra.mxu1 %v977_v5  ;;  %v1009_v28 = vld [vmem:[%s1459_s0 + $0xc4] ss:$8 sps:$4 sm:$0xff]   ;;  %v1011_v29 = vld [vmem:[%s1459_s0 + $0x40] ss:$8 sps:$4 sm:$0xff]  }
   0xf   :  { %48 = vst.msk [vmem:[#allocation2 + $0xe0] sm:$0xff] %vm19_vm0, %v1031_v2  ;;  %49 = vst.msk [vmem:[#allocation2 + $0xe8] sm:$0xff] %vm19_vm0, %v1031_v2  ;;  %384 = vmatprep.subr.bf16.mxu0 %v1030_v0  ;;  %958 = vmatprep.subr.bf16.mxu1 %v1030_v0  ;;  %v1012_v30 = vld [vmem:[%s1459_s0 + $0xc0] ss:$8 sps:$4 sm:$0xff]   ;;  %v1013_v31 = vld [vmem:[%s1459_s0 + $0x54] ss:$8 sps:$4 sm:$0xff]  }
  0x10   :  { %v1015_v32 = vld [vmem:[%s1459_s0 + $0xd4] ss:$8 sps:$4 sm:$0xff]   ;;  %v1017_v33 = vld [vmem:[%s1459_s0 + $0x50] ss:$8 sps:$4 sm:$0xff]   ;;  %v1019_v35 = vld [vmem:[%s1459_s0 + $0x64] ss:$8 sps:$4 sm:$0xff]  }
  0x11   :  { %v1018_v34 = vld [vmem:[%s1459_s0 + $0xd0] ss:$8 sps:$4 sm:$0xff]   ;;  %v1021_v36 = vld [vmem:[%s1459_s0 + $0xe4] ss:$8 sps:$4 sm:$0xff]   ;;  %v1023_v38 = vld [vmem:[%s1459_s0 + $0x60] ss:$8 sps:$4 sm:$0xff]  }
  0x12   :  { %385 = vmatpush1.bf16.msra.mxu0 %v978_v8  ;;  %967 = vmatpush1.bf16.msra.mxu1 %v978_v8  ;;  %v113_v37 = vld [vmem:[%s1459_s0 + $0xf0] sm:$0x11]  ;;  %v1024_v39 = vld [vmem:[%s1459_s0 + $0xe0] ss:$8 sps:$4 sm:$0xff]   ;;  %51 = vst.msk [vmem:[#allocation2 + $0xf0] sm:$0x3] %vm50_vm2, %v1031_v2 }
  0x13   :  { %386 = vmatprep.subr.bf16.mxu0 %v1030_v0  ;;  %959 = vmatprep.subr.bf16.mxu1 %v1030_v0  ;;  %v1025_v40 = vld [vmem:[%s1459_s0 + $0x74] ss:$8 sps:$4 sm:$0xff]   ;;  %v865_v41 = vcombine.high %v113_v37, %v113_v37  ;;  %v1028_v42 = vld [vmem:[%s1459_s0 + $0x70] ss:$8 sps:$4 sm:$0xff]   ;;  %v864_v43 = vcombine.low %v113_v37, %v113_v37  ;;  %v52_v44 = vld [vmem:[#allocation2] sm:$0xff] }
  0x14   :  { %v68_v45 = vld [vmem:[#allocation2 + $0x80] sm:$0xff]  ;;  %v53_v48 = vld [vmem:[#allocation2 + $0x8] sm:$0xff]  ;;  %v54_v60 = vld [vmem:[#allocation2 + $0x10] sm:$0xff] }
  0x15   :  { %v69_v49 = vld [vmem:[#allocation2 + $0x88] sm:$0xff]  ;;  %v70_v61 = vld [vmem:[#allocation2 + $0x90] sm:$0xff]  ;;  %v1275_v62 = vld [vmem:[%s1460_s2] ss:$0 sm:$0xff] }
  0x16   :  { %387 = vmatpush1.bf16.msra.mxu0 %v979_v9  ;;  %968 = vmatpush1.bf16.msra.mxu1 %v979_v9  ;;  %v55_v1 = vld [vmem:[#allocation2 + $0x18] sm:$0xff] }
  0x17   :  { %388 = vmatprep.subr.bf16.mxu0 %v1030_v0  ;;  %960 = vmatprep.subr.bf16.mxu1 %v1030_v0  ;;  %v71_v2 = vld [vmem:[#allocation2 + $0x98] sm:$0xff] }
  0x1a   :  { %389 = vmatpush1.bf16.msra.mxu0 %v980_v10  ;;  %969 = vmatpush1.bf16.msra.mxu1 %v980_v10 }
  0x1b   :  { %390 = vmatprep.subr.bf16.mxu0 %v1030_v0  ;;  %961 = vmatprep.subr.bf16.mxu1 %v1030_v0 }
  0x1e   :  { %391 = vmatpush1.bf16.msra.mxu0 %v981_v11  ;;  %970 = vmatpush1.bf16.msra.mxu1 %v981_v11 }
  0x1f   :  { %392 = vmatprep.subr.bf16.mxu0 %v1030_v0  ;;  %962 = vmatprep.subr.bf16.mxu1 %v1030_v0 }
  0x22   :  { %393 = vmatpush1.bf16.msra.mxu0 %v982_v12  ;;  %971 = vmatpush1.bf16.msra.mxu1 %v982_v12 }
  0x25   :  { %409 = vmatmul.mubr.bf16.vlgmr.msra.gmra.mrb[0].mxu0 %v983_v13  ;;  %473 = vmatmul.mubr.bf16.vlgmr.msra.gmra.mrb[0].mxu1 %v986_v14 }
  0x26   :  { %876 = vmatprep.mubr.msk.bf16.mxu0 %vm327_vm1, %v989_v15  ;;  %884 = vmatprep.mubr.msk.bf16.mxu1 %vm327_vm1, %v991_v16 }
  0x2d   :  { %417 = vmatmul.mubr.bf16.gmra.mrb[4].mxu0 %v993_v17  ;;  %481 = vmatmul.mubr.bf16.gmra.mrb[4].mxu1 %v994_v18 }
  0x2e   :  { %877 = vmatprep.mubr.msk.bf16.mxu0 %vm327_vm1, %v995_v19  ;;  %885 = vmatprep.mubr.msk.bf16.mxu1 %vm327_vm1, %v997_v20 }
  0x35   :  { %425 = vmatmul.mubr.bf16.gmra.mrb[8].mxu0 %v999_v21  ;;  %489 = vmatmul.mubr.bf16.gmra.mrb[8].mxu1 %v1000_v22 }
  0x36   :  { %878 = vmatprep.mubr.msk.bf16.mxu0 %vm327_vm1, %v1001_v23  ;;  %886 = vmatprep.mubr.msk.bf16.mxu1 %vm327_vm1, %v1003_v24  ;;  %v56_v23 = vld [vmem:[#allocation2 + $0x20] sm:$0xff] }
  0x37   :  { %v72_v24 = vld [vmem:[#allocation2 + $0xa0] sm:$0xff] }
  0x3d   :  { %433 = vmatmul.mubr.bf16.gmra.mrb[12].mxu0 %v1005_v25  ;;  %497 = vmatmul.mubr.bf16.gmra.mrb[12].mxu1 %v1006_v26 }
  0x3e   :  { %879 = vmatprep.mubr.msk.bf16.mxu0 %vm327_vm1, %v1007_v27  ;;  %887 = vmatprep.mubr.msk.bf16.mxu1 %vm327_vm1, %v1009_v28 }
  0x45   :  { %441 = vmatmul.mubr.bf16.gmra.mrb[16].mxu0 %v1011_v29  ;;  %505 = vmatmul.mubr.bf16.gmra.mrb[16].mxu1 %v1012_v30  ;;  %v57_v29 = vld [vmem:[#allocation2 + $0x28] sm:$0xff] }
  0x46   :  { %880 = vmatprep.mubr.msk.bf16.mxu0 %vm327_vm1, %v1013_v31  ;;  %888 = vmatprep.mubr.msk.bf16.mxu1 %vm327_vm1, %v1015_v32  ;;  %v73_v30 = vld [vmem:[#allocation2 + $0xa8] sm:$0xff] }
  0x4d   :  { %449 = vmatmul.mubr.bf16.gmra.mrb[20].mxu0 %v1017_v33  ;;  %513 = vmatmul.mubr.bf16.gmra.mrb[20].mxu1 %v1018_v34 }
  0x4e   :  { %881 = vmatprep.mubr.msk.bf16.mxu0 %vm327_vm1, %v1019_v35  ;;  %889 = vmatprep.mubr.msk.bf16.mxu1 %vm327_vm1, %v1021_v36 }
  0x55   :  { %457 = vmatmul.mubr.bf16.gmra.mrb[24].mxu0 %v1023_v38  ;;  %521 = vmatmul.mubr.bf16.gmra.mrb[24].mxu1 %v1024_v39 }
  0x56   :  { %882 = vmatprep.mubr.msk.bf16.mxu0 %vm327_vm1, %v1025_v40  ;;  %890 = vmatprep.mubr.msk.bf16.mxu1 %vm327_vm1, %v865_v41 }
  0x5d   :  { %465 = vmatmul.mubr.bf16.gmra.mrb[28].mxu0 %v1028_v42  ;;  %529 = vmatmul.mubr.bf16.gmra.mrb[28].mxu1 %v864_v43 }
  0xf8   :  { %v410_v46 = vpop.f32.mrb[0].mxu0  ;;  %v474_v47 = vpop.f32.mrb[0].mxu1 }
  0xf9   :  { %v536_v50 = vadd.f32 %v410_v46, %v52_v44  ;;  %v552_v51 = vadd.f32 %v474_v47, %v68_v45  ;;  %v412_v52 = vpop.f32.mrb[1].mxu0  ;;  %v476_v53 = vpop.f32.mrb[1].mxu1 }
  0xfa   :  { %v413_v54 = vpop.f32.mrb[2].mxu0  ;;  %v477_v55 = vpop.f32.mrb[2].mxu1  ;;  %v74_v52 = vld [vmem:[#allocation2 + $0xb0] sm:$0xff] }
  0xfb   :  { %568 = vst.msk [vmem:[#allocation2] sm:$0xff] %vm19_vm0, %v536_v50  ;;  %584 = vst.msk [vmem:[#allocation2 + $0x80] sm:$0xff] %vm19_vm0, %v552_v51  ;;  %v537_v56 = vadd.f32 %v413_v54, %v53_v48  ;;  %v553_v57 = vadd.f32 %v477_v55, %v69_v49  ;;  %v415_v58 = vpop.f32.mrb[3].mxu0  ;;  %v479_v59 = vpop.f32.mrb[3].mxu1  ;;  %v58_v51 = vld [vmem:[#allocation2 + $0x30] sm:$0xff] }
  0xfc   :  { %v75_v58 = vld [vmem:[#allocation2 + $0xb8] sm:$0xff] }
  0xfd   :  { %569 = vst.msk [vmem:[#allocation2 + $0x8] sm:$0xff] %vm19_vm0, %v537_v56  ;;  %585 = vst.msk [vmem:[#allocation2 + $0x88] sm:$0xff] %vm19_vm0, %v553_v57  ;;  %v59_v57 = vld [vmem:[#allocation2 + $0x38] sm:$0xff] }
 0x100   :  { %v418_v63 = vpop.f32.mrb[4].mxu0  ;;  %v482_v0 = vpop.f32.mrb[4].mxu1 }
 0x101   :  { %v538_v3 = vadd.f32 %v418_v63, %v54_v60  ;;  %v554_v4 = vadd.f32 %v482_v0, %v70_v61  ;;  %v420_v5 = vpop.f32.mrb[5].mxu0  ;;  %v484_v6 = vpop.f32.mrb[5].mxu1 }
 0x102   :  { %v603_v7 = vld [vmem:[#allocation2] sm:$0xff]  ;;  %v421_v9 = vpop.f32.mrb[6].mxu0  ;;  %v485_v10 = vpop.f32.mrb[6].mxu1 }
 0x103   :  { %v619_v8 = vld [vmem:[#allocation2 + $0x80] sm:$0xff]  ;;  %v641_v11 = vadd.f32 %v1275_v62, %v603_v7  ;;  %570 = vst.msk [vmem:[#allocation2 + $0x10] sm:$0xff] %vm19_vm0, %v538_v3  ;;  %586 = vst.msk [vmem:[#allocation2 + $0x90] sm:$0xff] %vm19_vm0, %v554_v4  ;;  %v539_v13 = vadd.f32 %v421_v9, %v55_v1  ;;  %v555_v14 = vadd.f32 %v485_v10, %v71_v2  ;;  %v423_v15 = vpop.f32.mrb[7].mxu0  ;;  %v487_v16 = vpop.f32.mrb[7].mxu1 }
 0x104   :  { %v657_v12 = vadd.f32 %v1275_v62, %v619_v8  ;;  %v604_v17 = vld [vmem:[#allocation2 + $0x8] sm:$0xff]  ;;  %v60_v16 = vld [vmem:[#allocation2 + $0x40] sm:$0xff] }
 0x105   :  { %v620_v18 = vld [vmem:[#allocation2 + $0x88] sm:$0xff]  ;;  %v923_v19 = vpack.c.bf16 %v641_v11, %v641_v11  ;;  %v642_v21 = vadd.f32 %v1275_v62, %v604_v17  ;;  %571 = vst.msk [vmem:[#allocation2 + $0x18] sm:$0xff] %vm19_vm0, %v539_v13  ;;  %587 = vst.msk [vmem:[#allocation2 + $0x98] sm:$0xff] %vm19_vm0, %v555_v14  ;;  %v76_v17 = vld [vmem:[#allocation2 + $0xc0] sm:$0xff] }
 0x106   :  { %v939_v20 = vpack.c.bf16 %v657_v12, %v657_v12  ;;  %v658_v22 = vadd.f32 %v1275_v62, %v620_v18 }
 0x107   :  { %798 = vst.msk [vmem:[%s1461_s3] sm:$0xf] %vm797_vm3, %v923_v19  ;;  %v924_v25 = vpack.c.bf16 %v642_v21, %v642_v21 }
 0x108   :  { %814 = vst.msk [vmem:[%s1461_s3 + $0x40] sm:$0xf] %vm797_vm3, %v939_v20  ;;  %v940_v26 = vpack.c.bf16 %v658_v22, %v658_v22  ;;  %v426_v27 = vpop.f32.mrb[8].mxu0  ;;  %v490_v28 = vpop.f32.mrb[8].mxu1  ;;  %v61_v22 = vld [vmem:[#allocation2 + $0x48] sm:$0xff] }
 0x109   :  { %799 = vst.msk [vmem:[%s1461_s3 + $0x4] sm:$0xf] %vm797_vm3, %v924_v25  ;;  %v540_v31 = vadd.f32 %v426_v27, %v56_v23  ;;  %v556_v32 = vadd.f32 %v490_v28, %v72_v24  ;;  %v428_v33 = vpop.f32.mrb[9].mxu0  ;;  %v492_v34 = vpop.f32.mrb[9].mxu1  ;;  %v77_v23 = vld [vmem:[#allocation2 + $0xc8] sm:$0xff] }
 0x10a   :  { %815 = vst.msk [vmem:[%s1461_s3 + $0x44] sm:$0xf] %vm797_vm3, %v940_v26  ;;  %v605_v35 = vld [vmem:[#allocation2 + $0x10] sm:$0xff]  ;;  %v429_v37 = vpop.f32.mrb[10].mxu0  ;;  %v493_v38 = vpop.f32.mrb[10].mxu1 }
 0x10b   :  { %v621_v36 = vld [vmem:[#allocation2 + $0x90] sm:$0xff]  ;;  %v643_v39 = vadd.f32 %v1275_v62, %v605_v35  ;;  %572 = vst.msk [vmem:[#allocation2 + $0x20] sm:$0xff] %vm19_vm0, %v540_v31  ;;  %588 = vst.msk [vmem:[#allocation2 + $0xa0] sm:$0xff] %vm19_vm0, %v556_v32  ;;  %v541_v41 = vadd.f32 %v429_v37, %v57_v29  ;;  %v557_v42 = vadd.f32 %v493_v38, %v73_v30  ;;  %v431_v43 = vpop.f32.mrb[11].mxu0  ;;  %v495_v44 = vpop.f32.mrb[11].mxu1 }
 0x10c   :  { %v659_v40 = vadd.f32 %v1275_v62, %v621_v36  ;;  %v606_v45 = vld [vmem:[#allocation2 + $0x18] sm:$0xff]  ;;  %v62_v44 = vld [vmem:[#allocation2 + $0x50] sm:$0xff] }
 0x10d   :  { %v622_v46 = vld [vmem:[#allocation2 + $0x98] sm:$0xff]  ;;  %v925_v47 = vpack.c.bf16 %v643_v39, %v643_v39  ;;  %v644_v49 = vadd.f32 %v1275_v62, %v606_v45  ;;  %573 = vst.msk [vmem:[#allocation2 + $0x28] sm:$0xff] %vm19_vm0, %v541_v41  ;;  %589 = vst.msk [vmem:[#allocation2 + $0xa8] sm:$0xff] %vm19_vm0, %v557_v42  ;;  %v78_v45 = vld [vmem:[#allocation2 + $0xd0] sm:$0xff] }
 0x10e   :  { %v941_v48 = vpack.c.bf16 %v659_v40, %v659_v40  ;;  %v660_v50 = vadd.f32 %v1275_v62, %v622_v46 }
 0x10f   :  { %800 = vst.msk [vmem:[%s1461_s3 + $0x8] sm:$0xf] %vm797_vm3, %v925_v47  ;;  %v926_v53 = vpack.c.bf16 %v644_v49, %v644_v49 }
 0x110   :  { %816 = vst.msk [vmem:[%s1461_s3 + $0x48] sm:$0xf] %vm797_vm3, %v941_v48  ;;  %v942_v54 = vpack.c.bf16 %v660_v50, %v660_v50  ;;  %v434_v55 = vpop.f32.mrb[12].mxu0  ;;  %v498_v56 = vpop.f32.mrb[12].mxu1  ;;  %v63_v50 = vld [vmem:[#allocation2 + $0x58] sm:$0xff] }
 0x111   :  { %801 = vst.msk [vmem:[%s1461_s3 + $0xc] sm:$0xf] %vm797_vm3, %v926_v53  ;;  %v542_v59 = vadd.f32 %v434_v55, %v58_v51  ;;  %v558_v60 = vadd.f32 %v498_v56, %v74_v52  ;;  %v436_v61 = vpop.f32.mrb[13].mxu0  ;;  %v500_v63 = vpop.f32.mrb[13].mxu1  ;;  %v79_v51 = vld [vmem:[#allocation2 + $0xd8] sm:$0xff] }
 0x112   :  { %817 = vst.msk [vmem:[%s1461_s3 + $0x4c] sm:$0xf] %vm797_vm3, %v942_v54  ;;  %v607_v0 = vld [vmem:[#allocation2 + $0x20] sm:$0xff]  ;;  %v437_v2 = vpop.f32.mrb[14].mxu0  ;;  %v501_v3 = vpop.f32.mrb[14].mxu1 }
 0x113   :  { %v623_v1 = vld [vmem:[#allocation2 + $0xa0] sm:$0xff]  ;;  %v645_v4 = vadd.f32 %v1275_v62, %v607_v0  ;;  %574 = vst.msk [vmem:[#allocation2 + $0x30] sm:$0xff] %vm19_vm0, %v542_v59  ;;  %590 = vst.msk [vmem:[#allocation2 + $0xb0] sm:$0xff] %vm19_vm0, %v558_v60  ;;  %v543_v6 = vadd.f32 %v437_v2, %v59_v57  ;;  %v559_v7 = vadd.f32 %v501_v3, %v75_v58  ;;  %v439_v8 = vpop.f32.mrb[15].mxu0  ;;  %v503_v9 = vpop.f32.mrb[15].mxu1 }
 0x114   :  { %v661_v5 = vadd.f32 %v1275_v62, %v623_v1  ;;  %v608_v10 = vld [vmem:[#allocation2 + $0x28] sm:$0xff]  ;;  %v64_v9 = vld [vmem:[#allocation2 + $0x60] sm:$0xff] }
 0x115   :  { %v624_v11 = vld [vmem:[#allocation2 + $0xa8] sm:$0xff]  ;;  %v927_v12 = vpack.c.bf16 %v645_v4, %v645_v4  ;;  %v646_v14 = vadd.f32 %v1275_v62, %v608_v10  ;;  %575 = vst.msk [vmem:[#allocation2 + $0x38] sm:$0xff] %vm19_vm0, %v543_v6  ;;  %591 = vst.msk [vmem:[#allocation2 + $0xb8] sm:$0xff] %vm19_vm0, %v559_v7  ;;  %v80_v10 = vld [vmem:[#allocation2 + $0xe0] sm:$0xff] }
 0x116   :  { %v943_v13 = vpack.c.bf16 %v661_v5, %v661_v5  ;;  %v662_v15 = vadd.f32 %v1275_v62, %v624_v11 }
 0x117   :  { %802 = vst.msk [vmem:[%s1461_s3 + $0x10] sm:$0xf] %vm797_vm3, %v927_v12  ;;  %v928_v18 = vpack.c.bf16 %v646_v14, %v646_v14 }
 0x118   :  { %818 = vst.msk [vmem:[%s1461_s3 + $0x50] sm:$0xf] %vm797_vm3, %v943_v13  ;;  %v944_v19 = vpack.c.bf16 %v662_v15, %v662_v15  ;;  %v442_v20 = vpop.f32.mrb[16].mxu0  ;;  %v506_v21 = vpop.f32.mrb[16].mxu1  ;;  %v65_v15 = vld [vmem:[#allocation2 + $0x68] sm:$0xff] }
 0x119   :  { %803 = vst.msk [vmem:[%s1461_s3 + $0x14] sm:$0xf] %vm797_vm3, %v928_v18  ;;  %v544_v24 = vadd.f32 %v442_v20, %v60_v16  ;;  %v560_v25 = vadd.f32 %v506_v21, %v76_v17  ;;  %v444_v26 = vpop.f32.mrb[17].mxu0  ;;  %v508_v27 = vpop.f32.mrb[17].mxu1  ;;  %v81_v16 = vld [vmem:[#allocation2 + $0xe8] sm:$0xff] }
 0x11a   :  { %819 = vst.msk [vmem:[%s1461_s3 + $0x54] sm:$0xf] %vm797_vm3, %v944_v19  ;;  %v609_v28 = vld [vmem:[#allocation2 + $0x30] sm:$0xff]  ;;  %v445_v30 = vpop.f32.mrb[18].mxu0  ;;  %v509_v31 = vpop.f32.mrb[18].mxu1 }
 0x11b   :  { %v625_v29 = vld [vmem:[#allocation2 + $0xb0] sm:$0xff]  ;;  %v647_v32 = vadd.f32 %v1275_v62, %v609_v28  ;;  %576 = vst.msk [vmem:[#allocation2 + $0x40] sm:$0xff] %vm19_vm0, %v544_v24  ;;  %592 = vst.msk [vmem:[#allocation2 + $0xc0] sm:$0xff] %vm19_vm0, %v560_v25  ;;  %v545_v34 = vadd.f32 %v445_v30, %v61_v22  ;;  %v561_v35 = vadd.f32 %v509_v31, %v77_v23  ;;  %v447_v36 = vpop.f32.mrb[19].mxu0  ;;  %v511_v37 = vpop.f32.mrb[19].mxu1 }
 0x11c   :  { %v663_v33 = vadd.f32 %v1275_v62, %v625_v29  ;;  %v610_v38 = vld [vmem:[#allocation2 + $0x38] sm:$0xff]  ;;  %v66_v37 = vld [vmem:[#allocation2 + $0x70] sm:$0xff] }
 0x11d   :  { %v626_v39 = vld [vmem:[#allocation2 + $0xb8] sm:$0xff]  ;;  %v929_v40 = vpack.c.bf16 %v647_v32, %v647_v32  ;;  %v648_v42 = vadd.f32 %v1275_v62, %v610_v38  ;;  %577 = vst.msk [vmem:[#allocation2 + $0x48] sm:$0xff] %vm19_vm0, %v545_v34  ;;  %593 = vst.msk [vmem:[#allocation2 + $0xc8] sm:$0xff] %vm19_vm0, %v561_v35  ;;  %v82_v38 = vld [vmem:[#allocation2 + $0xf0] sm:$0x3] }
 0x11e   :  { %v945_v41 = vpack.c.bf16 %v663_v33, %v663_v33  ;;  %v664_v43 = vadd.f32 %v1275_v62, %v626_v39 }
 0x11f   :  { %804 = vst.msk [vmem:[%s1461_s3 + $0x18] sm:$0xf] %vm797_vm3, %v929_v40  ;;  %v930_v46 = vpack.c.bf16 %v648_v42, %v648_v42 }
 0x120   :  { %820 = vst.msk [vmem:[%s1461_s3 + $0x58] sm:$0xf] %vm797_vm3, %v945_v41  ;;  %v946_v47 = vpack.c.bf16 %v664_v43, %v664_v43  ;;  %v450_v48 = vpop.f32.mrb[20].mxu0  ;;  %v514_v49 = vpop.f32.mrb[20].mxu1  ;;  %v67_v43 = vld [vmem:[#allocation2 + $0x78] sm:$0xff] }
 0x121   :  { %805 = vst.msk [vmem:[%s1461_s3 + $0x1c] sm:$0xf] %vm797_vm3, %v930_v46  ;;  %v546_v52 = vadd.f32 %v450_v48, %v62_v44  ;;  %v562_v53 = vadd.f32 %v514_v49, %v78_v45  ;;  %v452_v54 = vpop.f32.mrb[21].mxu0  ;;  %v516_v55 = vpop.f32.mrb[21].mxu1 }
 0x122   :  { %821 = vst.msk [vmem:[%s1461_s3 + $0x5c] sm:$0xf] %vm797_vm3, %v946_v47  ;;  %v611_v56 = vld [vmem:[#allocation2 + $0x40] sm:$0xff]  ;;  %v453_v58 = vpop.f32.mrb[22].mxu0  ;;  %v517_v59 = vpop.f32.mrb[22].mxu1 }
 0x123   :  { %v627_v57 = vld [vmem:[#allocation2 + $0xc0] sm:$0xff]  ;;  %v649_v60 = vadd.f32 %v1275_v62, %v611_v56  ;;  %578 = vst.msk [vmem:[#allocation2 + $0x50] sm:$0xff] %vm19_vm0, %v546_v52  ;;  %594 = vst.msk [vmem:[#allocation2 + $0xd0] sm:$0xff] %vm19_vm0, %v562_v53  ;;  %v547_v63 = vadd.f32 %v453_v58, %v63_v50  ;;  %v563_v0 = vadd.f32 %v517_v59, %v79_v51  ;;  %v455_v1 = vpop.f32.mrb[23].mxu0  ;;  %v519_v2 = vpop.f32.mrb[23].mxu1 }
 0x124   :  { %v665_v61 = vadd.f32 %v1275_v62, %v627_v57  ;;  %v612_v3 = vld [vmem:[#allocation2 + $0x48] sm:$0xff] }
 0x125   :  { %v628_v4 = vld [vmem:[#allocation2 + $0xc8] sm:$0xff]  ;;  %v931_v5 = vpack.c.bf16 %v649_v60, %v649_v60  ;;  %v650_v7 = vadd.f32 %v1275_v62, %v612_v3  ;;  %579 = vst.msk [vmem:[#allocation2 + $0x58] sm:$0xff] %vm19_vm0, %v547_v63  ;;  %595 = vst.msk [vmem:[#allocation2 + $0xd8] sm:$0xff] %vm19_vm0, %v563_v0 }
 0x126   :  { %v947_v6 = vpack.c.bf16 %v665_v61, %v665_v61  ;;  %v666_v8 = vadd.f32 %v1275_v62, %v628_v4 }
 0x127   :  { %806 = vst.msk [vmem:[%s1461_s3 + $0x20] sm:$0xf] %vm797_vm3, %v931_v5  ;;  %v932_v11 = vpack.c.bf16 %v650_v7, %v650_v7 }
 0x128   :  { %822 = vst.msk [vmem:[%s1461_s3 + $0x60] sm:$0xf] %vm797_vm3, %v947_v6  ;;  %v948_v12 = vpack.c.bf16 %v666_v8, %v666_v8  ;;  %v458_v13 = vpop.f32.mrb[24].mxu0  ;;  %v522_v14 = vpop.f32.mrb[24].mxu1 }
 0x129   :  { %807 = vst.msk [vmem:[%s1461_s3 + $0x24] sm:$0xf] %vm797_vm3, %v932_v11  ;;  %v548_v17 = vadd.f32 %v458_v13, %v64_v9  ;;  %v564_v18 = vadd.f32 %v522_v14, %v80_v10  ;;  %v460_v19 = vpop.f32.mrb[25].mxu0  ;;  %v524_v20 = vpop.f32.mrb[25].mxu1 }
 0x12a   :  { %823 = vst.msk [vmem:[%s1461_s3 + $0x64] sm:$0xf] %vm797_vm3, %v948_v12  ;;  %v613_v21 = vld [vmem:[#allocation2 + $0x50] sm:$0xff]  ;;  %v461_v23 = vpop.f32.mrb[26].mxu0  ;;  %v525_v24 = vpop.f32.mrb[26].mxu1 }
 0x12b   :  { %v629_v22 = vld [vmem:[#allocation2 + $0xd0] sm:$0xff]  ;;  %v651_v25 = vadd.f32 %v1275_v62, %v613_v21  ;;  %580 = vst.msk [vmem:[#allocation2 + $0x60] sm:$0xff] %vm19_vm0, %v548_v17  ;;  %596 = vst.msk [vmem:[#allocation2 + $0xe0] sm:$0xff] %vm19_vm0, %v564_v18  ;;  %v549_v27 = vadd.f32 %v461_v23, %v65_v15  ;;  %v565_v28 = vadd.f32 %v525_v24, %v81_v16  ;;  %v463_v29 = vpop.f32.mrb[27].mxu0  ;;  %v527_v30 = vpop.f32.mrb[27].mxu1 }
 0x12c   :  { %v667_v26 = vadd.f32 %v1275_v62, %v629_v22  ;;  %v614_v31 = vld [vmem:[#allocation2 + $0x58] sm:$0xff] }
 0x12d   :  { %v630_v32 = vld [vmem:[#allocation2 + $0xd8] sm:$0xff]  ;;  %v933_v33 = vpack.c.bf16 %v651_v25, %v651_v25  ;;  %v652_v35 = vadd.f32 %v1275_v62, %v614_v31  ;;  %581 = vst.msk [vmem:[#allocation2 + $0x68] sm:$0xff] %vm19_vm0, %v549_v27  ;;  %597 = vst.msk [vmem:[#allocation2 + $0xe8] sm:$0xff] %vm19_vm0, %v565_v28 }
 0x12e   :  { %v949_v34 = vpack.c.bf16 %v667_v26, %v667_v26  ;;  %v668_v36 = vadd.f32 %v1275_v62, %v630_v32 }
 0x12f   :  { %808 = vst.msk [vmem:[%s1461_s3 + $0x28] sm:$0xf] %vm797_vm3, %v933_v33  ;;  %v934_v39 = vpack.c.bf16 %v652_v35, %v652_v35 }
 0x130   :  { %824 = vst.msk [vmem:[%s1461_s3 + $0x68] sm:$0xf] %vm797_vm3, %v949_v34  ;;  %v950_v40 = vpack.c.bf16 %v668_v36, %v668_v36  ;;  %v466_v41 = vpop.f32.mrb[28].mxu0  ;;  %v530_v42 = vpop.f32.mrb[28].mxu1 }
 0x131   :  { %809 = vst.msk [vmem:[%s1461_s3 + $0x2c] sm:$0xf] %vm797_vm3, %v934_v39  ;;  %v550_v44 = vadd.f32 %v466_v41, %v66_v37  ;;  %v566_v45 = vadd.f32 %v530_v42, %v82_v38  ;;  %v468_v46 = vpop.f32.mrb[29].mxu0  ;;  %v532_v47 = vpop.f32.mrb[29].mxu1 }
 0x132   :  { %825 = vst.msk [vmem:[%s1461_s3 + $0x6c] sm:$0xf] %vm797_vm3, %v950_v40  ;;  %v615_v48 = vld [vmem:[#allocation2 + $0x60] sm:$0xff]  ;;  %v469_v50 = vpop.f32.mrb[30].mxu0  ;;  %v533_v51 = vpop.f32.mrb[30].mxu1 }
 0x133   :  { %v631_v49 = vld [vmem:[#allocation2 + $0xe0] sm:$0xff]  ;;  %v653_v52 = vadd.f32 %v1275_v62, %v615_v48  ;;  %582 = vst.msk [vmem:[#allocation2 + $0x70] sm:$0xff] %vm19_vm0, %v550_v44  ;;  %v551_v54 = vadd.f32 %v469_v50, %v67_v43  ;;  %v471_v55 = vpop.f32.mrb[31].mxu0  ;;  %v534_v56 = vpop.f32.mrb[31].mxu1 }
 0x134   :  { %v669_v53 = vadd.f32 %v1275_v62, %v631_v49  ;;  %599 = vst.msk [vmem:[#allocation2 + $0xf0] sm:$0x3] %vm50_vm2, %v566_v45  ;;  %v616_v57 = vld [vmem:[#allocation2 + $0x68] sm:$0xff] }
 0x135   :  { %v632_v58 = vld [vmem:[#allocation2 + $0xe8] sm:$0xff]  ;;  %v935_v59 = vpack.c.bf16 %v653_v52, %v653_v52  ;;  %v654_v61 = vadd.f32 %v1275_v62, %v616_v57  ;;  %583 = vst.msk [vmem:[#allocation2 + $0x78] sm:$0xff] %vm19_vm0, %v551_v54 }
 0x136   :  { %v951_v60 = vpack.c.bf16 %v669_v53, %v669_v53  ;;  %v670_v63 = vadd.f32 %v1275_v62, %v632_v58 }
 0x137   :  { %810 = vst.msk [vmem:[%s1461_s3 + $0x30] sm:$0xf] %vm797_vm3, %v935_v59  ;;  %v936_v0 = vpack.c.bf16 %v654_v61, %v654_v61 }
 0x138   :  { %826 = vst.msk [vmem:[%s1461_s3 + $0x70] sm:$0xf] %vm797_vm3, %v951_v60  ;;  %v952_v1 = vpack.c.bf16 %v670_v63, %v670_v63 }
 0x139   :  { %811 = vst.msk [vmem:[%s1461_s3 + $0x34] sm:$0xf] %vm797_vm3, %v936_v0 }
 0x13a   :  { %827 = vst.msk [vmem:[%s1461_s3 + $0x74] sm:$0xf] %vm797_vm3, %v952_v1  ;;  %v617_v2 = vld [vmem:[#allocation2 + $0x70] sm:$0xff] }
 0x13b   :  { %v633_v3 = vld [vmem:[#allocation2 + $0xf0] sm:$0x3]  ;;  %v655_v4 = vadd.f32 %v1275_v62, %v617_v2 }
 0x13c   :  { %v671_v5 = vadd.f32 %v1275_v62, %v633_v3  ;;  %v618_v6 = vld [vmem:[#allocation2 + $0x78] sm:$0xff] }
 0x13d   :  { %v937_v7 = vpack.c.bf16 %v655_v4, %v655_v4  ;;  %v656_v9 = vadd.f32 %v1275_v62, %v618_v6 }
 0x13e   :  { %v953_v8 = vpack.c.bf16 %v671_v5, %v671_v5 }
 0x13f   :  { %812 = vst.msk [vmem:[%s1461_s3 + $0x38] sm:$0xf] %vm797_vm3, %v937_v7  ;;  %v938_v10 = vpack.c.bf16 %v656_v9, %v656_v9 }
 0x140   :  { %829 = vst.msk [vmem:[%s1461_s3 + $0x78] sm:$0x1] %vm828_vm4, %v953_v8 }
 0x141   :  { %813 = vst.msk [vmem:[%s1461_s3 + $0x3c] sm:$0xf] %vm797_vm3, %v938_v10 }

// kernel: convnn_forward.11
= control target key start
LH: loop header
LB: loop body
LE: loop exit
PB: predicated region body
PF: predicated region fallthrough
CT: control target
= control target key end

     0   :  { %s138_s22 = smov 96   ;;  %vm99_vm0 = vcmask 256000   ;;  %vm100_vm1 = vsmask.f32 2304  ;;  %v139_v36 = vmov 0   ;;  %s302_s0 = inlined_call_operand.vmem [shape: bf16[10,2,5,64], index: 0, kind: input, shape index: {}]   ;;  %s303_s1 = inlined_call_operand.vmem [shape: bf16[10,5,32], index: 1, kind: output, shape index: {}]  }
   0x1   :  { %v13_v0 = vld [vmem:[%s302_s0 + $0x10] sm:$0x7]  ;;  %v14_v1 = vld [vmem:[%s302_s0 + $0x14] sm:$0x7]  ;;  %v9_v2 = vld [vmem:[%s302_s0] sm:$0x7] }
   0x2   :  { %v31_v3 = vmax.bf16 %v14_v1, %v13_v0  ;;  %v10_v4 = vld [vmem:[%s302_s0 + $0x4] sm:$0x7]  ;;  %v15_v5 = vld [vmem:[%s302_s0 + $0x18] sm:$0x7]  ;;  %v16_v6 = vld [vmem:[%s302_s0 + $0x1c] sm:$0x7] }
   0x3   :  { %v29_v7 = vmax.bf16 %v10_v4, %v9_v2  ;;  %v11_v8 = vld [vmem:[%s302_s0 + $0x8] sm:$0x7]  ;;  %v12_v9 = vld [vmem:[%s302_s0 + $0xc] sm:$0x7]  ;;  %v32_v10 = vmax.bf16 %v16_v6, %v15_v5  ;;  %v17_v14 = vld [vmem:[%s302_s0 + $0x20] sm:$0x7] }
   0x4   :  { %53 = vrot.lane.b32.xlu1 %v31_v3, %s138_s22  ;;  %v30_v11 = vmax.bf16 %v12_v9, %v11_v8  ;;  %v19_v12 = vld [vmem:[%s302_s0 + $0x28] sm:$0x7]  ;;  %v20_v13 = vld [vmem:[%s302_s0 + $0x2c] sm:$0x7]  ;;  %v18_v15 = vld [vmem:[%s302_s0 + $0x24] sm:$0x7] }
   0x5   :  { %49 = vrot.lane.b32.xlu0 %v29_v7, %s138_s22  ;;  %v34_v16 = vmax.bf16 %v20_v13, %v19_v12  ;;  %v33_v17 = vmax.bf16 %v18_v15, %v17_v14  ;;  %v23_v18 = vld [vmem:[%s302_s0 + $0x38] sm:$0x7]  ;;  %v24_v19 = vld [vmem:[%s302_s0 + $0x3c] sm:$0x7]  ;;  %v21_v20 = vld [vmem:[%s302_s0 + $0x30] sm:$0x7] }
   0x6   :  { %v22_v21 = vld [vmem:[%s302_s0 + $0x34] sm:$0x7]  ;;  %v36_v22 = vmax.bf16 %v24_v19, %v23_v18  ;;  %v27_v24 = vld [vmem:[%s302_s0 + $0x48] sm:$0x7]  ;;  %v28_v25 = vld [vmem:[%s302_s0 + $0x4c] sm:$0x7] }
   0x7   :  { %v35_v23 = vmax.bf16 %v22_v21, %v21_v20  ;;  %v25_v26 = vld [vmem:[%s302_s0 + $0x40] sm:$0x7]  ;;  %v26_v27 = vld [vmem:[%s302_s0 + $0x44] sm:$0x7]  ;;  %v210_v28 = vmax.bf16 %v28_v25, %v27_v24  ;;  %vm216_vm2 = vmand %vm99_vm0, %vm100_vm1 }
   0x8   :  { %55 = vrot.lane.b32.xlu1 %v32_v10, %s138_s22  ;;  %v212_v29 = vmax.bf16 %v26_v27, %v25_v26  ;;  %v108_v34 = vld [vmem:[%s303_s1 + $0x8] sm:$0x7]  ;;  %v102_v38 = vld [vmem:[%s303_s1] sm:$0x7]  ;;  %v111_v45 = vld [vmem:[%s303_s1 + $0xc] sm:$0x7] }
   0x9   :  { %51 = vrot.lane.b32.xlu0 %v30_v11, %s138_s22  ;;  %v105_v48 = vld [vmem:[%s303_s1 + $0x4] sm:$0x7]  ;;  %v117_v55 = vld [vmem:[%s303_s1 + $0x14] sm:$0x7]  ;;  %v114_v58 = vld [vmem:[%s303_s1 + $0x10] sm:$0x7] }
   0xa   :  { %v123_v1 = vld [vmem:[%s303_s1 + $0x1c] sm:$0x7]  ;;  %v120_v4 = vld [vmem:[%s303_s1 + $0x18] sm:$0x7]  ;;  %v126_v14 = vld [vmem:[%s303_s1 + $0x20] sm:$0x7] }
   0xc   :  { %59 = vrot.lane.b32.xlu1 %v34_v16, %s138_s22 }
   0xd   :  { %57 = vrot.lane.b32.xlu0 %v33_v17, %s138_s22 }
  0x10   :  { %63 = vrot.lane.b32.xlu1 %v36_v22, %s138_s22 }
  0x11   :  { %61 = vrot.lane.b32.xlu0 %v35_v23, %s138_s22 }
  0x14   :  { %67 = vrot.lane.b32.xlu1 %v210_v28, %s138_s22 }
  0x15   :  { %65 = vrot.lane.b32.xlu0 %v212_v29, %s138_s22 }
  0x76   :  { %v54_v30 = vpop.permute.xlu1 %53 }
  0x77   :  { %v81_v31 = vmax.bf16 %v54_v30, %v31_v3  ;;  %v50_v32 = vpop.permute.xlu0 %49 }
  0x78   :  { %v79_v35 = vmax.bf16 %v50_v32, %v29_v7 }
  0x79   :  { %v91_v37 = vmax.bf16 %v139_v36, %v81_v31 }
  0x7a   :  { %v89_v39 = vmax.bf16 %v139_v36, %v79_v35  ;;  %v56_v40 = vpop.permute.xlu1 %55 }
  0x7b   :  { %v109_v41 = vsel %vm216_vm2, %v91_v37, %v108_v34  ;;  %v82_v42 = vmax.bf16 %v56_v40, %v32_v10  ;;  %v52_v43 = vpop.permute.xlu0 %51 }
  0x7c   :  { %110 = vst [vmem:[%s303_s1 + $0x8] sm:$0x7] %v109_v41  ;;  %v103_v44 = vsel %vm216_vm2, %v89_v39, %v102_v38  ;;  %v80_v46 = vmax.bf16 %v52_v43, %v30_v11  ;;  %v129_v11 = vld [vmem:[%s303_s1 + $0x24] sm:$0x7] }
  0x7d   :  { %104 = vst [vmem:[%s303_s1] sm:$0x7] %v103_v44  ;;  %v92_v47 = vmax.bf16 %v139_v36, %v82_v42 }
  0x7e   :  { %v90_v49 = vmax.bf16 %v139_v36, %v80_v46  ;;  %v60_v50 = vpop.permute.xlu1 %59 }
  0x7f   :  { %v112_v51 = vsel %vm216_vm2, %v92_v47, %v111_v45  ;;  %v84_v52 = vmax.bf16 %v60_v50, %v34_v16  ;;  %v58_v53 = vpop.permute.xlu0 %57 }
  0x80   :  { %113 = vst [vmem:[%s303_s1 + $0xc] sm:$0x7] %v112_v51  ;;  %v106_v54 = vsel %vm216_vm2, %v90_v49, %v105_v48  ;;  %v83_v56 = vmax.bf16 %v58_v53, %v33_v17 }
  0x81   :  { %107 = vst [vmem:[%s303_s1 + $0x4] sm:$0x7] %v106_v54  ;;  %v94_v57 = vmax.bf16 %v139_v36, %v84_v52 }
  0x82   :  { %v93_v59 = vmax.bf16 %v139_v36, %v83_v56  ;;  %v64_v60 = vpop.permute.xlu1 %63 }
  0x83   :  { %v118_v61 = vsel %vm216_vm2, %v94_v57, %v117_v55  ;;  %v86_v62 = vmax.bf16 %v64_v60, %v36_v22  ;;  %v62_v63 = vpop.permute.xlu0 %61 }
  0x84   :  { %119 = vst [vmem:[%s303_s1 + $0x14] sm:$0x7] %v118_v61  ;;  %v115_v0 = vsel %vm216_vm2, %v93_v59, %v114_v58  ;;  %v85_v2 = vmax.bf16 %v62_v63, %v35_v23 }
  0x85   :  { %116 = vst [vmem:[%s303_s1 + $0x10] sm:$0x7] %v115_v0  ;;  %v96_v3 = vmax.bf16 %v139_v36, %v86_v62 }
  0x86   :  { %v95_v5 = vmax.bf16 %v139_v36, %v85_v2  ;;  %v68_v6 = vpop.permute.xlu1 %67 }
  0x87   :  { %v124_v7 = vsel %vm216_vm2, %v96_v3, %v123_v1  ;;  %v88_v8 = vmax.bf16 %v68_v6, %v210_v28  ;;  %v66_v9 = vpop.permute.xlu0 %65 }
  0x88   :  { %125 = vst [vmem:[%s303_s1 + $0x1c] sm:$0x7] %v124_v7  ;;  %v121_v10 = vsel %vm216_vm2, %v95_v5, %v120_v4  ;;  %v87_v12 = vmax.bf16 %v66_v9, %v212_v29 }
  0x89   :  { %122 = vst [vmem:[%s303_s1 + $0x18] sm:$0x7] %v121_v10  ;;  %v98_v13 = vmax.bf16 %v139_v36, %v88_v8 }
  0x8a   :  { %v97_v15 = vmax.bf16 %v139_v36, %v87_v12 }
  0x8b   :  { %v130_v16 = vsel %vm216_vm2, %v98_v13, %v129_v11 }
  0x8c   :  { %131 = vst [vmem:[%s303_s1 + $0x24] sm:$0x7] %v130_v16  ;;  %v127_v17 = vsel %vm216_vm2, %v97_v15, %v126_v14 }
  0x8d   :  { %128 = vst [vmem:[%s303_s1 + $0x20] sm:$0x7] %v127_v17 }

// kernel: convnn_forward.13
= control target key start
LH: loop header
LB: loop body
LE: loop exit
PB: predicated region body
PF: predicated region fallthrough
CT: control target
= control target key end

     0   :  { %v246_v1 = vmov 0.0   ;;  %vm247_vm0 = vmmov 0   ;;  %vm20_vm1 = vcmask 25600   ;;  %s316_s0 = inlined_call_operand.vmem [shape: bf16[2,128], index: 0, kind: input, shape index: {}]   ;;  %s317_s1 = inlined_call_operand.vmem [shape: bf16[128,4], index: 1, kind: input, shape index: {}]   ;;  %s318_s2 = inlined_call_operand.vmem [shape: f32[1,4], index: 2, kind: input, shape index: {}]   ;;  %s319_s3 = inlined_call_operand.hbm [shape: f32[2,4], index: 3, kind: output, shape index: {}]  }
   0x1   :  { %v210_v0 = vld [vmem:[%s317_s1] sm:$0xff]   ;;  %187 = vmatprep.subr.bf16.mxu0 %v246_v1  ;;  %v211_v2 = vld [vmem:[%s317_s1 + $0x8] sm:$0xff]   ;;  %203 = vmatprep.mubr.msk.bf16.mxu0 %vm247_vm0, %v246_v1  ;;  %21 = vst.msk [vmem:[#allocation2] sm:$0x3] %vm20_vm1, %v246_v1  ;;  %v212_v3 = vld [vmem:[%s317_s1 + $0x10] sm:$0xff]  }
   0x2   :  { %188 = vmatpush3.bf16.msra.mxu0 %v210_v0 }
   0x3   :  { %189 = vmatprep.subr.bf16.mxu0 %v246_v1 }
   0x6   :  { %190 = vmatpush3.bf16.msra.mxu0 %v211_v2 }
   0x7   :  { %191 = vmatprep.subr.bf16.mxu0 %v246_v1 }
   0x8   :  { %8 = vsyncpa [#allocation4], 0  ;;  %v213_v4 = vld [vmem:[%s317_s1 + $0x18] sm:$0xff]   ;;  %v214_v5 = vld [vmem:[%s317_s1 + $0x20] sm:$0xff]  }
   0x9   :  { %v215_v6 = vld [vmem:[%s317_s1 + $0x28] sm:$0xff]   ;;  %v216_v7 = vld [vmem:[%s317_s1 + $0x30] sm:$0xff]   ;;  %v217_v8 = vld [vmem:[%s317_s1 + $0x38] sm:$0xff]  }
   0xa   :  { %192 = vmatpush3.bf16.msra.mxu0 %v212_v3  ;;  %v23_v9 = vld [vmem:[%s316_s0] sm:$0x1]  ;;  %s248_s0 = smov [#allocation3]  }
   0xb   :  { %193 = vmatprep.subr.bf16.mxu0 %v246_v1  ;;  %v22_v10 = vld [vmem:[#allocation2] sm:$0x3]  ;;  %s161_s1 = sshll.u32 %s248_s0, 4  ;;  %s162_s1 = int_to_ptr.vmem [resolvable:$true] %s161_s1 }
   0xc   :  { %v177_v16 = vld [vmem:[%s318_s2] ss:$0 sm:$0xff]  ;;  %s222_s2 = scalar_lea.vmem %s162_s1, 32  ;;  %p227_p1 = scmp.lt.s32.totalorder %s162_s1, %s162_s1 }
   0xd   :  { %p223_p0 = scmp.ne.s32.totalorder %s162_s1, %s222_s2  ;;  %p228_p2 = scmp.lt.s32.totalorder %s222_s2, %s222_s2 }
   0xe   :  { %194 = vmatpush3.bf16.msra.mxu0 %v213_v4 }
   0xf   :  { %195 = vmatprep.subr.bf16.mxu0 %v246_v1  ;;  %p229_p3 = por %p228_p2, %p227_p1 }
  0x11   :  { %p230_p4 = pnand %p229_p3, %p223_p0 }
  0x12   :  { %196 = vmatpush3.bf16.msra.mxu0 %v214_v5 }
  0x13   :  { %197 = vmatprep.subr.bf16.mxu0 %v246_v1 }
  0x16   :  { %198 = vmatpush3.bf16.msra.mxu0 %v215_v6 }
  0x17   :  { %199 = vmatprep.subr.bf16.mxu0 %v246_v1 }
  0x1a   :  { %200 = vmatpush3.bf16.msra.mxu0 %v216_v7 }
  0x1b   :  { %201 = vmatprep.subr.bf16.mxu0 %v246_v1 }
  0x1e   :  { %202 = vmatpush3.bf16.msra.mxu0 %v217_v8 }
  0x21   :  { %204 = vmatmul.mubr.bf16.vlgmr.msra.gmra.mrb[0].mxu0 %v23_v9 }
  0xf4   :  { %v122_v11 = vpop.f32.mrb[0].mxu0 }
  0xf5   :  { %v128_v12 = vadd.f32 %v122_v11, %v22_v10  ;;  %v205_v13 = vpop.f32.mrb[1].mxu0 }
  0xf6   :  { %v125_v14 = vpop.f32.mrb[2].mxu0 }
  0xf7   :  { %130 = vst.msk [vmem:[#allocation2] sm:$0x3] %vm20_vm1, %v128_v12  ;;  %v206_v15 = vpop.f32.mrb[3].mxu0 }
  0xfe   :  { %v134_v17 = vld [vmem:[#allocation2] sm:$0x3] }
  0xff   :  { %v142_v18 = vadd.f32 %v177_v16, %v134_v17 }
 0x101   :  { %v143_v19 = vsel %vm20_vm1, %v142_v18, -inf }
 0x102   :  { %144 = vmax.xlane.f32.xlu0 %v143_v19 }
 0x18f   :  { %v145_v20 = vpop.xlane.xlu0 %144 }
 0x190   :  { %v146_v21 = vsub.f32 %v142_v18, %v145_v20 }
 0x192   :  { %v147_v22 = vmul.f32 1.442695, %v146_v21 }
 0x194   :  { %218 = vpow2.f32 %v147_v22 }
 0x19e   :  { %v219_v23 = vpop.eup %218 }
 0x19f   :  { %v149_v24 = vsel %vm20_vm1, %v219_v23, 0.0 }
 0x1a0   :  { %150 = vadd.xlane.f32.xlu0 %v149_v24 }
 0x22d   :  { %v151_v25 = vpop.xlane.xlu0 %150 }
 0x22e   :  { %220 = vrcp.f32 %v151_v25 }
 0x238   :  { %v221_v26 = vpop.eup %220 }
 0x239   :  { %v153_v27 = vmul.f32 %v221_v26, %v219_v23 }
 0x23b   :  { %154 = vst.msk [vmem:[#allocation3] sm:$0x3] %vm20_vm1, %v153_v27 }
 0x23c   :  { %233 = shalt.err (!%p230_p4)
}
 0x23d   :  { %s234_s7 = scalar_lea.hbm %s319_s3, 32 }
 0x23e   :  { %p235_p5 = scmp.ne.s32.totalorder %s319_s3, %s234_s7  ;;  %p238_p6 = scmp.lt.u32.totalorder %s234_s7, %s319_s3 }
 0x240   :  { %p240_p7 = pnand %p238_p6, %p235_p5 }
 0x242   :  { %243 = shalt.err (!%p240_p7)
}
 0x243   :  { %164 = dma.vmem_to_hbm [thread:$0]  %s162_s1, 32, %s319_s3, [#allocation4]  }
 0x244   :  { %244 = dma.done.wait [#allocation4], 32  }
 0x245   :  { %245 = vsyncadd [#allocation4], 4294967264 }
 0x246   :  { %168 = vsyncpa [#allocation4], 1 }

// kernel: convnn_forward.12
= control target key start
LH: loop header
LB: loop body
LE: loop exit
PB: predicated region body
PF: predicated region fallthrough
CT: control target
= control target key end

     0   :  { %v845_v1 = vmov 0.0   ;;  %v846_v23 = vmov 1966171168   ;;  %v127_v25 = vlaneseq  ;;  %vm847_vm0 = vmmov 0   ;;  %s1031_s1 = inlined_call_operand.vmem [shape: bf16[800,128], index: 1, kind: input, shape index: {}]   ;;  %s1032_s0 = inlined_call_operand.vmem [shape: bf16[2,800], index: 0, kind: input, shape index: {}]   ;;  %s1033_s2 = inlined_call_operand.vmem [shape: f32[1,128], index: 2, kind: input, shape index: {}]   ;;  %s1034_s3 = inlined_call_operand.vmem [shape: bf16[2,128], index: 3, kind: output, shape index: {}]  }
   0x1   :  { %v794_v0 = vld [vmem:[%s1031_s1 + $0x40] sm:$0xff]   ;;  %19 = vst [vmem:[#allocation2] sm:$0x3] %v845_v1  ;;  %v798_v5 = vld [vmem:[%s1031_s1 + $0x48] sm:$0xff]   ;;  %v802_v9 = vld [vmem:[%s1031_s1 + $0x50] sm:$0xff]   ;;  %v125_v24 = vunpack.c.l.s4 %v846_v23  ;;  %vm477_vm1 = vcmask 261120  }
   0x2   :  { %v795_v2 = vld [vmem:[%s1031_s1 + $0xc0] sm:$0xff]   ;;  %714 = vmatprep.subr.bf16.mxu0 %v794_v0  ;;  %v799_v6 = vld [vmem:[%s1031_s1 + $0xc8] sm:$0xff]   ;;  %v803_v10 = vld [vmem:[%s1031_s1 + $0xd0] sm:$0xff]   ;;  %v128_v31 = vshrl.u32 %v127_v25, 7 }
   0x3   :  { %v796_v3 = vld [vmem:[%s1031_s1] sm:$0xff]   ;;  %736 = vmatprep.subr.bf16.mxu1 %v795_v2  ;;  %v800_v7 = vld [vmem:[%s1031_s1 + $0x8] sm:$0xff]   ;;  %v804_v11 = vld [vmem:[%s1031_s1 + $0x10] sm:$0xff]   ;;  %v126_v30 = vunpack.c.0.s8 %v125_v24 }
   0x4   :  { %v797_v4 = vld [vmem:[%s1031_s1 + $0x80] sm:$0xff]   ;;  %715 = vmatpush3.bf16.msra.mxu0 %v796_v3  ;;  %v801_v8 = vld [vmem:[%s1031_s1 + $0x88] sm:$0xff]   ;;  %v805_v12 = vld [vmem:[%s1031_s1 + $0x90] sm:$0xff]  }
   0x5   :  { %737 = vmatpush3.bf16.msra.mxu1 %v797_v4  ;;  %716 = vmatprep.subr.bf16.mxu0 %v798_v5  ;;  %v806_v13 = vld [vmem:[%s1031_s1 + $0x58] sm:$0xff]   ;;  %v810_v17 = vld [vmem:[%s1031_s1 + $0x60] sm:$0xff]   ;;  %v814_v21 = vld [vmem:[%s1031_s1 + $0x68] sm:$0xff]   ;;  %v129_v36 = vsub.s32 %v126_v30, %v128_v31 }
   0x6   :  { %738 = vmatprep.subr.bf16.mxu1 %v799_v6  ;;  %v807_v14 = vld [vmem:[%s1031_s1 + $0xd8] sm:$0xff]   ;;  %v811_v18 = vld [vmem:[%s1031_s1 + $0xe0] sm:$0xff]   ;;  %v815_v22 = vld [vmem:[%s1031_s1 + $0xe8] sm:$0xff]  }
   0x7   :  { %v808_v15 = vld [vmem:[%s1031_s1 + $0x18] sm:$0xff]   ;;  %v812_v19 = vld [vmem:[%s1031_s1 + $0x20] sm:$0xff]   ;;  %v816_v26 = vld [vmem:[%s1031_s1 + $0x28] sm:$0xff]  }
   0x8   :  { %717 = vmatpush3.bf16.msra.mxu0 %v800_v7  ;;  %v809_v16 = vld [vmem:[%s1031_s1 + $0x98] sm:$0xff]   ;;  %v813_v20 = vld [vmem:[%s1031_s1 + $0xa0] sm:$0xff]   ;;  %v817_v27 = vld [vmem:[%s1031_s1 + $0xa8] sm:$0xff]  }
   0x9   :  { %739 = vmatpush3.bf16.msra.mxu1 %v801_v8  ;;  %718 = vmatprep.subr.bf16.mxu0 %v802_v9  ;;  %v818_v28 = vld [vmem:[%s1031_s1 + $0x70] sm:$0xff]   ;;  %v822_v34 = vld [vmem:[%s1031_s1 + $0x78] sm:$0xff]   ;;  %v21_v39 = vld [vmem:[%s1032_s0] sm:$0x7f] }
   0xa   :  { %740 = vmatprep.subr.bf16.mxu1 %v803_v10  ;;  %v819_v29 = vld [vmem:[%s1031_s1 + $0xf0] sm:$0xff]   ;;  %v823_v35 = vld [vmem:[%s1031_s1 + $0xf8] sm:$0xff]   ;;  %v123_v40 = vcombine.high %v21_v39, %v21_v39  ;;  %v130_v41 = vrot.slane %v21_v39, %v129_v36  ;;  %v827_v42 = vld [vmem:[%s1031_s1 + $0x140] sm:$0xff]  }
   0xb   :  { %v820_v32 = vld [vmem:[%s1031_s1 + $0x30] sm:$0xff]   ;;  %v824_v37 = vld [vmem:[%s1031_s1 + $0x38] sm:$0xff]   ;;  %v828_v47 = vld [vmem:[%s1031_s1 + $0x100] sm:$0xff]  }
   0xc   :  { %719 = vmatpush3.bf16.msra.mxu0 %v804_v11  ;;  %v821_v33 = vld [vmem:[%s1031_s1 + $0xb0] sm:$0xff]   ;;  %v825_v38 = vld [vmem:[%s1031_s1 + $0xb8] sm:$0xff]   ;;  %v138_v43 = vcombine.high %v130_v41, %v130_v41  ;;  %v146_v44 = vrot.slane %v130_v41, %v129_v36  ;;  %v137_v45 = vrot.slane %v123_v40, %v129_v36  ;;  %v829_v50 = vld [vmem:[%s1031_s1 + $0x148] sm:$0xff]  }
   0xd   :  { %741 = vmatpush3.bf16.msra.mxu1 %v805_v12  ;;  %720 = vmatprep.subr.bf16.mxu0 %v806_v13  ;;  %v830_v53 = vld [vmem:[%s1031_s1 + $0x108] sm:$0xff]   ;;  %v831_v54 = vld [vmem:[%s1031_s1 + $0x150] sm:$0xff]   ;;  %v833_v56 = vld [vmem:[%s1031_s1 + $0x158] sm:$0xff]  }
   0xe   :  { %742 = vmatprep.subr.bf16.mxu1 %v807_v14  ;;  %v160_v46 = vrot.slane %v138_v43, %v129_v36  ;;  %v139_v48 = vcombine.high %v137_v45, %v137_v45  ;;  %v168_v49 = vcombine.high %v146_v44, %v146_v44  ;;  %v832_v55 = vld [vmem:[%s1031_s1 + $0x110] sm:$0xff]   ;;  %v841_v57 = vld [vmem:[%s1031_s1 + $0x180] sm:$0xff]   ;;  %v153_v58 = vrot.slane %v137_v45, %v129_v36  ;;  %v834_v59 = vld [vmem:[%s1031_s1 + $0x118] sm:$0xff]  }
   0xf   :  { %v835_v60 = vld [vmem:[%s1031_s1 + $0x160] sm:$0xff]   ;;  %v844_v61 = vld [vmem:[%s1031_s1 + $0x188] sm:$0xff]   ;;  %v839_v2 = vld [vmem:[%s1031_s1 + $0x170] sm:$0xff]  }
  0x10   :  { %721 = vmatpush3.bf16.msra.mxu0 %v808_v15  ;;  %513 = vmatprep.mubr.bf16.mxu0 %v160_v46  ;;  %v170_v51 = vcombine.high %v160_v46, %v160_v46  ;;  %v167_v52 = vrot.slane %v139_v48, %v129_v36  ;;  %v169_v62 = vcombine.high %v153_v58, %v153_v58  ;;  %v836_v63 = vld [vmem:[%s1031_s1 + $0x120] sm:$0xff]   ;;  %v837_v0 = vld [vmem:[%s1031_s1 + $0x168] sm:$0xff]   ;;  %v840_v3 = vld [vmem:[%s1031_s1 + $0x130] sm:$0xff]  }
  0x11   :  { %743 = vmatpush3.bf16.msra.mxu1 %v809_v16  ;;  %722 = vmatprep.subr.bf16.mxu0 %v810_v17  ;;  %v842_v4 = vld [vmem:[%s1031_s1 + $0x178] sm:$0xff]   ;;  %v713_v30 = vld [vmem:[%s1033_s2] ss:$0 sm:$0xff] }
  0x12   :  { %744 = vmatprep.subr.bf16.mxu1 %v811_v18  ;;  %553 = vmatprep.mubr.bf16.mxu1 %v170_v51  ;;  %v843_v5 = vld [vmem:[%s1031_s1 + $0x138] sm:$0xff]  }
  0x14   :  { %723 = vmatpush3.bf16.msra.mxu0 %v812_v19 }
  0x15   :  { %745 = vmatpush3.bf16.msra.mxu1 %v813_v20  ;;  %724 = vmatprep.subr.bf16.mxu0 %v814_v21 }
  0x16   :  { %746 = vmatprep.subr.bf16.mxu1 %v815_v22 }
  0x18   :  { %725 = vmatpush3.bf16.msra.mxu0 %v816_v26 }
  0x19   :  { %747 = vmatpush3.bf16.msra.mxu1 %v817_v27  ;;  %726 = vmatprep.subr.bf16.mxu0 %v818_v28  ;;  %v20_v27 = vld [vmem:[#allocation2] sm:$0x3] }
  0x1a   :  { %748 = vmatprep.subr.bf16.mxu1 %v819_v29 }
  0x1c   :  { %727 = vmatpush3.bf16.msra.mxu0 %v820_v32 }
  0x1d   :  { %749 = vmatpush3.bf16.msra.mxu1 %v821_v33  ;;  %728 = vmatprep.subr.bf16.mxu0 %v822_v34 }
  0x1e   :  { %750 = vmatprep.subr.bf16.mxu1 %v823_v35 }
  0x20   :  { %729 = vmatpush3.bf16.msra.mxu0 %v824_v37 }
  0x21   :  { %751 = vmatpush3.bf16.msra.mxu1 %v825_v38  ;;  %758 = vmatprep.subr.bf16.mxu0 %v827_v42 }
  0x22   :  { %783 = vmatprep.subr.bf16.mxu1 %v845_v1 }
  0x23   :  { %514 = vmatmul.mubr.bf16.vlgmr.msra.gmra.mrb[0].mxu0 %v146_v44 }
  0x24   :  { %759 = vmatpush3.bf16.msra.mxu0 %v828_v47  ;;  %554 = vmatmul.mubr.bf16.vlgmr.msra.gmra.mrb[0].mxu1 %v168_v49 }
  0x25   :  { %760 = vmatprep.subr.bf16.mxu0 %v829_v50  ;;  %593 = vmatprep.mubr.bf16.mxu0 %v167_v52 }
  0x26   :  { %787 = vmatprep.mubr.msk.bf16.mxu1 %vm847_vm0, %v845_v1  ;;  %784 = vmatpush3.bf16.msra.mxu1 %v841_v57 }
  0x27   :  { %785 = vmatprep.subr.bf16.mxu1 %v845_v1  ;;  %v838_v1 = vld [vmem:[%s1031_s1 + $0x128] sm:$0xff]  }
  0x28   :  { %761 = vmatpush3.bf16.msra.mxu0 %v830_v53 }
  0x29   :  { %762 = vmatprep.subr.bf16.mxu0 %v831_v54 }
  0x2a   :  { %786 = vmatpush3.bf16.msra.mxu1 %v844_v61 }
  0x2c   :  { %763 = vmatpush3.bf16.msra.mxu0 %v832_v55 }
  0x2d   :  { %764 = vmatprep.subr.bf16.mxu0 %v833_v56  ;;  %788 = vmatmul.mubr.msk.bf16.vlgmr.msra.gmra.mrb[4].mxu1 %vm477_vm1, %v169_v62 }
  0x30   :  { %765 = vmatpush3.bf16.msra.mxu0 %v834_v59 }
  0x31   :  { %766 = vmatprep.subr.bf16.mxu0 %v835_v60 }
  0x34   :  { %767 = vmatpush3.bf16.msra.mxu0 %v836_v63 }
  0x35   :  { %768 = vmatprep.subr.bf16.mxu0 %v837_v0 }
  0x38   :  { %769 = vmatpush3.bf16.msra.mxu0 %v838_v1 }
  0x39   :  { %770 = vmatprep.subr.bf16.mxu0 %v839_v2 }
  0x3c   :  { %771 = vmatpush3.bf16.msra.mxu0 %v840_v3 }
  0x3d   :  { %772 = vmatprep.subr.bf16.mxu0 %v842_v4 }
  0x40   :  { %773 = vmatpush3.bf16.msra.mxu0 %v843_v5 }
  0x43   :  { %594 = vmatmul.mubr.bf16.vlgmr.msra.gmra.mrb[4].mxu0 %v153_v58 }
  0xf6   :  { %v730_v6 = vpop.f32.mrb[0].mxu0 }
  0xf7   :  { %v731_v7 = vpop.f32.mrb[1].mxu0  ;;  %v752_v8 = vpop.f32.mrb[0].mxu1 }
  0xf8   :  { %v732_v9 = vadd.f32 %v731_v7, %v730_v6  ;;  %v733_v10 = vpop.f32.mrb[2].mxu0  ;;  %v753_v11 = vpop.f32.mrb[1].mxu1 }
  0xf9   :  { %v734_v12 = vpop.f32.mrb[3].mxu0  ;;  %v754_v13 = vadd.f32 %v753_v11, %v752_v8  ;;  %v755_v14 = vpop.f32.mrb[2].mxu1 }
  0xfa   :  { %v756_v15 = vpop.f32.mrb[3].mxu1 }
  0xfb   :  { %v556_v16 = vadd.f32 %v754_v13, %v732_v9 }
 0x100   :  { %v635_v17 = vpop.f32.mrb[4].mxu1 }
 0x101   :  { %v789_v18 = vpop.f32.mrb[5].mxu1 }
 0x102   :  { %v638_v19 = vpop.f32.mrb[6].mxu1 }
 0x103   :  { %v790_v20 = vpop.f32.mrb[7].mxu1 }
 0x116   :  { %v774_v21 = vpop.f32.mrb[4].mxu0 }
 0x117   :  { %v775_v22 = vpop.f32.mrb[5].mxu0 }
 0x118   :  { %v776_v23 = vadd.f32 %v775_v22, %v774_v21  ;;  %v777_v24 = vpop.f32.mrb[6].mxu0 }
 0x119   :  { %v778_v25 = vpop.f32.mrb[7].mxu0 }
 0x11a   :  { %v596_v26 = vadd.f32 %v776_v23, %v556_v16 }
 0x11c   :  { %v636_v28 = vadd.f32 %v635_v17, %v596_v26 }
 0x11e   :  { %v641_v29 = vadd.f32 %v636_v28, %v20_v27 }
 0x120   :  { %642 = vst [vmem:[#allocation2] sm:$0x3] %v641_v29 }
 0x127   :  { %v646_v31 = vld [vmem:[#allocation2] sm:$0x3] }
 0x128   :  { %v654_v32 = vadd.f32 %v713_v30, %v646_v31 }
 0x12a   :  { %v655_v33 = vmax.f32 %v654_v32, 0.0 }
 0x12c   :  { %v656_v34 = vpack.c.bf16 %v655_v33, %v655_v33 }
 0x12e   :  { %657 = vst [vmem:[%s1034_s3] sm:$0x1] %v656_v34 }

</bundles_post_ra>
